<compile_context>
chip_gen: v6e
topology: v6e:2x2x1
jax: 0.10.0
libtpu: 0.0.40
codegen_flags: <defaults>
</compile_context>

<pallas_src>
import functools

import jax
import jax.numpy as jnp
from jax.experimental import pallas as pl
from jax.experimental.pallas import tpu as pltpu

F32 = jnp.float32
BF16 = jnp.bfloat16
EPS = 1e-5          # PyTorch BatchNorm2d default eps


# ---------------------------------------------------------------------------
# The fused Pallas kernel (one batch sample per grid step)
# ---------------------------------------------------------------------------

def _normal_cell_kernel(x0_ref, x1_ref, wpre0_ref, wpre1_ref, pw_w_ref,
                        pw_b_ref, dw3_ref, dw5_ref, inv_ref, o_ref,
                        *, H, W, C):
    """Whole normal_cell forward for one sample; intermediates stay in VMEM."""
    WC = W * C
    lane = jax.lax.broadcasted_iota(jnp.int32, (H, WC), 1)
    row = jax.lax.broadcasted_iota(jnp.int32, (H, WC), 0)

    # ---- zero-padded window shifts: XLU roll + cheap VPU mask ---------------
    def lane_shift(x, o):
        """y[h, w*C+c] = x[h, (w+o)*C+c], zero outside [0, W)."""
        if o == 0:
            return x
        a = o * C
        y = pltpu.roll(x, (-a) % WC, axis=1)
        valid = (lane < WC - a) if o > 0 else (lane >= -a)
        return jnp.where(valid, y, 0.0)

    def row_shift(x, o):
        """y[h, :] = x[h+o, :], zero outside [0, H)."""
        if o == 0:
            return x
        y = pltpu.roll(x, (-o) % H, axis=0)
        valid = (row < H - o) if o > 0 else (row >= -o)
        return jnp.where(valid, y, 0.0)

    def make_wsh(x, offsets):
        return {o: lane_shift(x, o) for o in offsets}

    # ---- fused 1x1 conv (block-diag bf16 MXU matmul) + folded eval BN -------
    def pw_bn(x, w_bd, b_idx):
        y = jnp.dot(x.astype(BF16), w_bd, preferred_element_type=jnp.float32)
        return y + pw_b_ref[b_idx, :]

    # ---- depthwise KxK conv, stride 1, 'same' zero padding ------------------
    def dw_conv(wsh, taps, K, d):
        """wsh: {pixel offset -> lane-shifted (H, WC) activation}.

        taps: (K*K, WC) lane-tiled weights; taps[ky*K+kx, w*C+c] = w[ky,kx,c].
        """
        p = d * (K - 1) // 2
        acc0 = jnp.zeros((H, WC), F32)   # two partial accumulators to shorten
        acc1 = jnp.zeros((H, WC), F32)   # the dependent VALU add chain
        t = 0
        for kx in range(K):
            xs = wsh[kx * d - p]         # hoisted / shared W-shift
            for ky in range(K):
                term = row_shift(xs, ky * d - p) * taps[ky * K + kx, :]
                if t % 2 == 0:
                    acc0 = acc0 + term
                else:
                    acc1 = acc1 + term
                t += 1
        return acc0 + acc1

    def avg_pool3(wsh):
        """3x3 avg pool, stride 1, pad 1, count_include_pad=False."""
        acc0 = jnp.zeros((H, WC), F32)
        acc1 = jnp.zeros((H, WC), F32)
        t = 0
        for kx in range(3):
            xs = wsh[kx - 1]
            for ky in range(3):
                term = row_shift(xs, ky - 1)
                if t % 2 == 0:
                    acc0 = acc0 + term
                else:
                    acc1 = acc1 + term
                t += 1
        return (acc0 + acc1) * inv_ref[...]   # precomputed inverse divisor

    # ---- DARTS primitive ops -------------------------------------------------
    def sep_conv(wsh_x, dw_ref, dwA, dwB, bA, bB, K):
        p = (K - 1) // 2
        h = dw_conv(wsh_x, dw_ref[dwA], K, 1)
        h = pw_bn(h, pw_w_ref[bA - 2], bA)
        hr = jnp.maximum(h, 0.0)
        h = dw_conv(make_wsh(hr, tuple(range(-p, p + 1))), dw_ref[dwB], K, 1)
        return pw_bn(h, pw_w_ref[bB - 2], bB)

    def dil_conv3(wsh_x, dwA, bA):
        h = dw_conv(wsh_x, dw3_ref[dwA], 3, 2)   # 3x3, dilation 2, pad 2
        return pw_bn(h, pw_w_ref[bA - 2], bA)

    # ---- preprocess: ReLUConvBN 1x1 on both inputs ---------------------------
    s0 = pw_bn(jnp.maximum(x0_ref[...], 0.0), wpre0_ref[...], 0)
    s1 = pw_bn(jnp.maximum(x1_ref[...], 0.0), wpre1_ref[...], 1)

    # ReLU(s0)/ReLU(s1) and their W-direction window shifts computed once and
    # shared by every edge they feed.
    r0 = jnp.maximum(s0, 0.0)
    r1 = jnp.maximum(s1, 0.0)
    wsh_r0 = make_wsh(r0, (-2, -1, 0, 1, 2))   # e02, e03, e04, e05
    wsh_r1 = make_wsh(r1, (-2, -1, 0, 1, 2))   # e13, e14
    wsh_s1 = make_wsh(s1, (-1, 0, 1))          # avg_pool_3

    # drop_path is identity (eval); edge_(1,2) skip_connect (stride 1) == Id.
    o_ref[0] = sep_conv(wsh_r0, dw3_ref, 0, 1, 2, 3, 3) + s1                        # node 2
    o_ref[1] = dil_conv3(wsh_r0, 2, 4) + sep_conv(wsh_r1, dw3_ref, 3, 4, 5, 6, 3)   # node 3
    o_ref[2] = (sep_conv(wsh_r0, dw3_ref, 5, 6, 7, 8, 3)
                + sep_conv(wsh_r1, dw5_ref, 0, 1, 9, 10, 5))                        # node 4
    o_ref[3] = dil_conv3(wsh_r0, 7, 11) + avg_pool3(wsh_s1)                         # node 5


# ---------------------------------------------------------------------------
# Wrapper (layout conversion NCHW <-> lane-dense fused, single pallas_call)
# ---------------------------------------------------------------------------

def normal_cell_forward(packed, x0_nchw, x1_nchw):
    N, Cp0, H, W = x0_nchw.shape
    Cp1 = x1_nchw.shape[1]
    WC = packed["pw_b"].shape[1]
    C = WC // W
    WCp0, WCp1 = W * Cp0, W * Cp1

    # NCHW -> lane-dense fused (N, H, W*C) (one-time XLA transpose).
    # TODO(synk): when cells are stacked, keep activations in this fused layout
    # between cells and only convert NCHW at the network boundary.
    x0f = jnp.transpose(x0_nchw, (0, 2, 3, 1)).reshape(N, H, WCp0).astype(F32)
    x1f = jnp.transpose(x1_nchw, (0, 2, 3, 1)).reshape(N, H, WCp1).astype(F32)

    n_pw = packed["pw_w"].shape[0]
    n_b = packed["pw_b"].shape[0]

    kernel = functools.partial(_normal_cell_kernel, H=H, W=W, C=C)

    # Grid over the batch: pure data-parallel split (on v7x both TensorCores
    # get a program).  Weight specs have constant index_maps -> fetched once,
    # VMEM-resident across grid steps.
    out = pl.pallas_call(
        kernel,
        grid=(N,),
        out_shape=jax.ShapeDtypeStruct((4, N, H, WC), F32),
        in_specs=[
            pl.BlockSpec((None, H, WCp0), lambda n: (n, 0, 0)),       # x0
            pl.BlockSpec((None, H, WCp1), lambda n: (n, 0, 0)),       # x1
            pl.BlockSpec((WCp0, WC), lambda n: (0, 0)),               # wpre0 (bf16)
            pl.BlockSpec((WCp1, WC), lambda n: (0, 0)),               # wpre1 (bf16)
            pl.BlockSpec((n_pw, WC, WC), lambda n: (0, 0, 0)),        # pw_w  (bf16)
            pl.BlockSpec((n_b, WC), lambda n: (0, 0)),                # pw_b
            pl.BlockSpec(packed["dw3"].shape, lambda n: (0, 0, 0)),   # dw3 taps
            pl.BlockSpec(packed["dw5"].shape, lambda n: (0, 0, 0)),   # dw5 taps
            pl.BlockSpec((H, WC), lambda n: (0, 0)),                  # avg-pool 1/cnt
        ],
        out_specs=pl.BlockSpec((4, None, H, WC), lambda n: (0, n, 0, 0)),
        compiler_params=pltpu.CompilerParams(
            dimension_semantics=("parallel",)),
    )(x0f, x1f, packed["wpre0"], packed["wpre1"], packed["pw_w"],
      packed["pw_b"], packed["dw3"], packed["dw5"], packed["inv_div"])

    # (4, N, H, W*C) -> (N, 4*C, H, W): module API is NCHW channel-concat.
    out = out.reshape(4, N, H, W, C).transpose(1, 0, 4, 2, 3)
    return out.reshape(N, 4 * C, H, W)


# ---------------------------------------------------------------------------
# Parameter packing into lane-dense kernel operands
# ---------------------------------------------------------------------------

def _block_diag_1x1_bf16(w_1x1, scale, W):
    """(Cin, Cout) 1x1 conv weight -> (W*Cin, W*Cout) block-diag kron(I_W, w)
    with the eval-mode BN scale folded into output columns, cast to bf16."""
    wb = jnp.kron(jnp.eye(W, dtype=F32), w_1x1.astype(F32))
    return (wb * jnp.tile(scale.astype(F32), W)[None, :]).astype(BF16)


def _tile_lanes(v, W):
    """(C,) -> (W*C,): value at fused lane w*C + c is v[c]."""
    return jnp.tile(v.astype(F32), W)


def _tile_dw_taps(w_dw, W):
    """(K, K, C) -> (K*K, W*C): per-tap lane-tiled depthwise weights."""
    K = w_dw.shape[0]
    C = w_dw.shape[-1]
    return jnp.tile(w_dw.reshape(K * K, C).astype(F32), (1, W))


def _avg_pool_inv_div(H, W, C):
    """(H, W*C) inverse divisor for 3x3/pad1 avg pool, count_include_pad=False."""
    rows = jnp.arange(H)
    cols = jnp.arange(W)
    cnt_h = jnp.where((rows == 0) | (rows == H - 1), 2, 3).astype(F32)
    cnt_w = jnp.where((cols == 0) | (cols == W - 1), 2, 3).astype(F32)
    cnt_w = jnp.repeat(cnt_w, C)                       # (W*C,)
    return 1.0 / (cnt_h[:, None] * cnt_w[None, :])     # (H, W*C)


def pack_normal_cell(params, H, W):
    """Repack per-op params into the fused kernel's lane-dense operands."""
    p = params
    C = p["pre0"]["scale"].shape[0]

    def bd(w, s):
        return _block_diag_1x1_bf16(w, s, W)

    def tl(v):
        return _tile_lanes(v, W)

    # 1x1-conv weights (block-diag, BN scale folded, bf16).  Bias order:
    # pre0, pre1, then the 10 internal pointwise convs (pw_w index = bias-2).
    pw_w = jnp.stack([
        bd(p["e02"]["pw1"], p["e02"]["scale1"]), bd(p["e02"]["pw2"], p["e02"]["scale2"]),
        bd(p["e03"]["pw"], p["e03"]["scale"]),
        bd(p["e13"]["pw1"], p["e13"]["scale1"]), bd(p["e13"]["pw2"], p["e13"]["scale2"]),
        bd(p["e04"]["pw1"], p["e04"]["scale1"]), bd(p["e04"]["pw2"], p["e04"]["scale2"]),
        bd(p["e14"]["pw1"], p["e14"]["scale1"]), bd(p["e14"]["pw2"], p["e14"]["scale2"]),
        bd(p["e05"]["pw"], p["e05"]["scale"]),
    ])
    pw_b = jnp.stack([
        tl(p["pre0"]["bias"]), tl(p["pre1"]["bias"]),
        tl(p["e02"]["bias1"]), tl(p["e02"]["bias2"]),
        tl(p["e03"]["bias"]),
        tl(p["e13"]["bias1"]), tl(p["e13"]["bias2"]),
        tl(p["e04"]["bias1"]), tl(p["e04"]["bias2"]),
        tl(p["e14"]["bias1"]), tl(p["e14"]["bias2"]),
        tl(p["e05"]["bias"]),
    ])
    dw3 = jnp.stack([
        _tile_dw_taps(p["e02"]["dw1"], W), _tile_dw_taps(p["e02"]["dw2"], W),
        _tile_dw_taps(p["e03"]["dw"], W),
        _tile_dw_taps(p["e13"]["dw1"], W), _tile_dw_taps(p["e13"]["dw2"], W),
        _tile_dw_taps(p["e04"]["dw1"], W), _tile_dw_taps(p["e04"]["dw2"], W),
        _tile_dw_taps(p["e05"]["dw"], W),
    ])
    dw5 = jnp.stack([
        _tile_dw_taps(p["e14"]["dw1"], W), _tile_dw_taps(p["e14"]["dw2"], W),
    ])
    return dict(
        wpre0=bd(p["pre0"]["w"], p["pre0"]["scale"]),
        wpre1=bd(p["pre1"]["w"], p["pre1"]["scale"]),
        pw_w=pw_w, pw_b=pw_b, dw3=dw3, dw5=dw5,
        inv_div=_avg_pool_inv_div(H, W, C),
    )


# ---------------------------------------------------------------------------
# Deterministic synthetic parameter init (eval-mode BN folded)
# ---------------------------------------------------------------------------

def _bn_fold(key, c):
    k1, k2, k3, k4 = jax.random.split(key, 4)
    gamma = 1.0 + 0.1 * jax.random.normal(k1, (c,), F32)
    beta = 0.1 * jax.random.normal(k2, (c,), F32)
    mean = 0.1 * jax.random.normal(k3, (c,), F32)
    var = 1.0 + 0.1 * jax.random.uniform(k4, (c,), F32)
    scale = gamma / jnp.sqrt(var + EPS)
    bias = beta - mean * scale
    return scale, bias


def init_relu_conv_bn(key, cin, cout):
    kw, kb = jax.random.split(key)
    w = 0.1 * jax.random.normal(kw, (cin, cout), F32)
    scale, bias = _bn_fold(kb, cout)
    return dict(w=w, scale=scale, bias=bias)


def init_sep_conv(key, c, K):
    k = jax.random.split(key, 6)
    s1, b1 = _bn_fold(k[4], c)
    s2, b2 = _bn_fold(k[5], c)
    return dict(
        dw1=0.1 * jax.random.normal(k[0], (K, K, c), F32),
        pw1=0.1 * jax.random.normal(k[1], (c, c), F32),
        scale1=s1, bias1=b1,
        dw2=0.1 * jax.random.normal(k[2], (K, K, c), F32),
        pw2=0.1 * jax.random.normal(k[3], (c, c), F32),
        scale2=s2, bias2=b2,
    )


def init_dil_conv(key, c):
    k = jax.random.split(key, 3)
    s, b = _bn_fold(k[2], c)
    return dict(
        dw=0.1 * jax.random.normal(k[0], (3, 3, c), F32),
        pw=0.1 * jax.random.normal(k[1], (c, c), F32),
        scale=s, bias=b,
    )


def init_normal_cell(key, c_prev_0, c_prev_1, c_now):
    ks = jax.random.split(key, 8)
    # TODO(synk): ReduceOperator (FactorizedReduce) branch not instantiated;
    # reduction_prev_0=False here so both preprocessors are ReLUConvBN 1x1.
    return dict(
        pre0=init_relu_conv_bn(ks[0], c_prev_0, c_now),
        pre1=init_relu_conv_bn(ks[1], c_prev_1, c_now),
        e02=init_sep_conv(ks[2], c_now, 3),   # edge_(0,2): sep_conv_3
        e03=init_dil_conv(ks[3], c_now),      # edge_(0,3): dil_conv_3
        e13=init_sep_conv(ks[4], c_now, 3),   # edge_(1,3): sep_conv_3
        e04=init_sep_conv(ks[5], c_now, 3),   # edge_(0,4): sep_conv_3
        e14=init_sep_conv(ks[6], c_now, 5),   # edge_(1,4): sep_conv_5
        e05=init_dil_conv(ks[7], c_now),      # edge_(0,5): dil_conv_3
    )


if __name__ == "__main__":
    key = jax.random.PRNGKey(0)
    kx0, kx1, kp = jax.random.split(key, 3)

    # W * C_NOW = 128 -> fully lane-dense fused layout.
    N, C_PREV0, C_PREV1, C_NOW, H, W = 2, 8, 8, 8, 16, 16
    x0 = jax.random.normal(kx0, (N, C_PREV0, H, W), F32)
    x1 = jax.random.normal(kx1, (N, C_PREV1, H, W), F32)

    params = init_normal_cell(kp, C_PREV0, C_PREV1, C_NOW)
    packed = pack_normal_cell(params, H, W)

    fwd = jax.jit(functools.partial(normal_cell_forward, packed))
    out = jax.block_until_ready(fwd(x0, x1))

    assert out.shape == (N, 4 * C_NOW, H, W), out.shape
    assert out.dtype == jnp.float32
    assert bool(jnp.all(jnp.isfinite(out)))
    print("KERNEL_OK")
</pallas_src>

<mosaic_0001>
module attributes {stable_mosaic.version = 11 : i64} {
  func.func @_normal_cell_kernel(%arg0: i32, %arg1: memref<1x16x128xf32, #tpu.memory_space<vmem>>, %arg2: memref<1x16x128xf32, #tpu.memory_space<vmem>>, %arg3: memref<128x128xbf16, #tpu.memory_space<vmem>>, %arg4: memref<128x128xbf16, #tpu.memory_space<vmem>>, %arg5: memref<10x128x128xbf16, #tpu.memory_space<vmem>>, %arg6: memref<12x128xf32, #tpu.memory_space<vmem>>, %arg7: memref<8x9x128xf32, #tpu.memory_space<vmem>>, %arg8: memref<2x25x128xf32, #tpu.memory_space<vmem>>, %arg9: memref<16x128xf32, #tpu.memory_space<vmem>>, %arg10: memref<4x1x16x128xf32, #tpu.memory_space<vmem>>) attributes {dimension_semantics = [#tpu.dimension_semantics<parallel>], iteration_bounds = array<i64: 2>, scalar_prefetch = 0 : i64, scratch_operands = 0 : i64, tpu.core_type = #tpu.core_type<tc>, window_params = [{transform_indices = @transform_0, window_bounds = array<i64: 1, 16, 128>}, {transform_indices = @transform_1, window_bounds = array<i64: 1, 16, 128>}, {pipeline_mode = #tpu.pipeline_mode<synchronous>, transform_indices = @transform_2, window_bounds = array<i64: 128, 128>}, {pipeline_mode = #tpu.pipeline_mode<synchronous>, transform_indices = @transform_3, window_bounds = array<i64: 128, 128>}, {pipeline_mode = #tpu.pipeline_mode<synchronous>, transform_indices = @transform_4, window_bounds = array<i64: 10, 128, 128>}, {pipeline_mode = #tpu.pipeline_mode<synchronous>, transform_indices = @transform_5, window_bounds = array<i64: 12, 128>}, {pipeline_mode = #tpu.pipeline_mode<synchronous>, transform_indices = @transform_6, window_bounds = array<i64: 8, 9, 128>}, {pipeline_mode = #tpu.pipeline_mode<synchronous>, transform_indices = @transform_7, window_bounds = array<i64: 2, 25, 128>}, {pipeline_mode = #tpu.pipeline_mode<synchronous>, transform_indices = @transform_8, window_bounds = array<i64: 16, 128>}, {transform_indices = @transform_9, window_bounds = array<i64: 4, 1, 16, 128>}]} {
    %0 = tpu.iota {dimensions = array<i32: 1>} : vector<16x128xi32>
    %1 = tpu.iota {dimensions = array<i32: 0>} : vector<16x128xi32>
    %c0 = arith.constant 0 : index
    %c0_0 = arith.constant 0 : index
    %c0_1 = arith.constant 0 : index
    %2 = vector.load %arg1[%c0, %c0_0, %c0_1] : memref<1x16x128xf32, #tpu.memory_space<vmem>>, vector<1x16x128xf32>
    %3 = vector.shape_cast %2 : vector<1x16x128xf32> to vector<16x128xf32>
    %cst = arith.constant 0.000000e+00 : f32
    %4 = vector.broadcast %cst : f32 to vector<16x128xf32>
    %5 = arith.maximumf %3, %4 : vector<16x128xf32>
    %c0_2 = arith.constant 0 : index
    %c0_3 = arith.constant 0 : index
    %6 = vector.load %arg3[%c0_2, %c0_3] : memref<128x128xbf16, #tpu.memory_space<vmem>>, vector<128x128xbf16>
    %7 = arith.truncf %5 : vector<16x128xf32> to vector<16x128xbf16>
    %cst_4 = arith.constant dense<0.000000e+00> : vector<16x128xf32>
    %8 = tpu.matmul %7, %6, %cst_4 {dimension_numbers = #tpu.dot_dimension_numbers<[1], [0], [0], [1], [0, 0, 1, 1], [], []>} : vector<16x128xbf16>, vector<128x128xbf16>, vector<16x128xf32> -> vector<16x128xf32>
    %c0_5 = arith.constant 0 : index
    %c0_6 = arith.constant 0 : index
    %9 = vector.load %arg6[%c0_5, %c0_6] : memref<12x128xf32, #tpu.memory_space<vmem>>, vector<1x128xf32>
    %10 = vector.shape_cast %9 : vector<1x128xf32> to vector<128xf32>
    %11 = vector.shape_cast %10 : vector<128xf32> to vector<1x128xf32>
    %12 = vector.broadcast %11 : vector<1x128xf32> to vector<16x128xf32>
    %13 = arith.addf %8, %12 : vector<16x128xf32>
    %c0_7 = arith.constant 0 : index
    %c0_8 = arith.constant 0 : index
    %c0_9 = arith.constant 0 : index
    %14 = vector.load %arg2[%c0_7, %c0_8, %c0_9] : memref<1x16x128xf32, #tpu.memory_space<vmem>>, vector<1x16x128xf32>
    %15 = vector.shape_cast %14 : vector<1x16x128xf32> to vector<16x128xf32>
    %cst_10 = arith.constant 0.000000e+00 : f32
    %16 = vector.broadcast %cst_10 : f32 to vector<16x128xf32>
    %17 = arith.maximumf %15, %16 : vector<16x128xf32>
    %c0_11 = arith.constant 0 : index
    %c0_12 = arith.constant 0 : index
    %18 = vector.load %arg4[%c0_11, %c0_12] : memref<128x128xbf16, #tpu.memory_space<vmem>>, vector<128x128xbf16>
    %19 = arith.truncf %17 : vector<16x128xf32> to vector<16x128xbf16>
    %cst_13 = arith.constant dense<0.000000e+00> : vector<16x128xf32>
    %20 = tpu.matmul %19, %18, %cst_13 {dimension_numbers = #tpu.dot_dimension_numbers<[1], [0], [0], [1], [0, 0, 1, 1], [], []>} : vector<16x128xbf16>, vector<128x128xbf16>, vector<16x128xf32> -> vector<16x128xf32>
    %c1 = arith.constant 1 : index
    %c0_14 = arith.constant 0 : index
    %21 = vector.load %arg6[%c1, %c0_14] : memref<12x128xf32, #tpu.memory_space<vmem>>, vector<1x128xf32>
    %22 = vector.shape_cast %21 : vector<1x128xf32> to vector<128xf32>
    %23 = vector.shape_cast %22 : vector<128xf32> to vector<1x128xf32>
    %24 = vector.broadcast %23 : vector<1x128xf32> to vector<16x128xf32>
    %25 = arith.addf %20, %24 : vector<16x128xf32>
    %cst_15 = arith.constant 0.000000e+00 : f32
    %26 = vector.broadcast %cst_15 : f32 to vector<16x128xf32>
    %27 = arith.maximumf %13, %26 : vector<16x128xf32>
    %cst_16 = arith.constant 0.000000e+00 : f32
    %28 = vector.broadcast %cst_16 : f32 to vector<16x128xf32>
    %29 = arith.maximumf %25, %28 : vector<16x128xf32>
    %c16_i32 = arith.constant 16 : i32
    %30 = tpu.dynamic_rotate %27 by %c16_i32 dim 1 : vector<16x128xf32>, i32 -> vector<16x128xf32>
    %c16_i32_17 = arith.constant 16 : i32
    %31 = vector.broadcast %c16_i32_17 : i32 to vector<16x128xi32>
    %32 = arith.cmpi sge, %0, %31 : vector<16x128xi32>
    %cst_18 = arith.constant 0.000000e+00 : f32
    %33 = vector.broadcast %cst_18 : f32 to vector<16x128xf32>
    %34 = arith.select %32, %30, %33 : vector<16x128xi1>, vector<16x128xf32>
    %c8_i32 = arith.constant 8 : i32
    %35 = tpu.dynamic_rotate %27 by %c8_i32 dim 1 : vector<16x128xf32>, i32 -> vector<16x128xf32>
    %c8_i32_19 = arith.constant 8 : i32
    %36 = vector.broadcast %c8_i32_19 : i32 to vector<16x128xi32>
    %37 = arith.cmpi sge, %0, %36 : vector<16x128xi32>
    %cst_20 = arith.constant 0.000000e+00 : f32
    %38 = vector.broadcast %cst_20 : f32 to vector<16x128xf32>
    %39 = arith.select %37, %35, %38 : vector<16x128xi1>, vector<16x128xf32>
    %c120_i32 = arith.constant 120 : i32
    %40 = tpu.dynamic_rotate %27 by %c120_i32 dim 1 : vector<16x128xf32>, i32 -> vector<16x128xf32>
    %c120_i32_21 = arith.constant 120 : i32
    %41 = vector.broadcast %c120_i32_21 : i32 to vector<16x128xi32>
    %42 = arith.cmpi slt, %0, %41 : vector<16x128xi32>
    %cst_22 = arith.constant 0.000000e+00 : f32
    %43 = vector.broadcast %cst_22 : f32 to vector<16x128xf32>
    %44 = arith.select %42, %40, %43 : vector<16x128xi1>, vector<16x128xf32>
    %c112_i32 = arith.constant 112 : i32
    %45 = tpu.dynamic_rotate %27 by %c112_i32 dim 1 : vector<16x128xf32>, i32 -> vector<16x128xf32>
    %c112_i32_23 = arith.constant 112 : i32
    %46 = vector.broadcast %c112_i32_23 : i32 to vector<16x128xi32>
    %47 = arith.cmpi slt, %0, %46 : vector<16x128xi32>
    %cst_24 = arith.constant 0.000000e+00 : f32
    %48 = vector.broadcast %cst_24 : f32 to vector<16x128xf32>
    %49 = arith.select %47, %45, %48 : vector<16x128xi1>, vector<16x128xf32>
    %c16_i32_25 = arith.constant 16 : i32
    %50 = tpu.dynamic_rotate %29 by %c16_i32_25 dim 1 : vector<16x128xf32>, i32 -> vector<16x128xf32>
    %c16_i32_26 = arith.constant 16 : i32
    %51 = vector.broadcast %c16_i32_26 : i32 to vector<16x128xi32>
    %52 = arith.cmpi sge, %0, %51 : vector<16x128xi32>
    %cst_27 = arith.constant 0.000000e+00 : f32
    %53 = vector.broadcast %cst_27 : f32 to vector<16x128xf32>
    %54 = arith.select %52, %50, %53 : vector<16x128xi1>, vector<16x128xf32>
    %c8_i32_28 = arith.constant 8 : i32
    %55 = tpu.dynamic_rotate %29 by %c8_i32_28 dim 1 : vector<16x128xf32>, i32 -> vector<16x128xf32>
    %c8_i32_29 = arith.constant 8 : i32
    %56 = vector.broadcast %c8_i32_29 : i32 to vector<16x128xi32>
    %57 = arith.cmpi sge, %0, %56 : vector<16x128xi32>
    %cst_30 = arith.constant 0.000000e+00 : f32
    %58 = vector.broadcast %cst_30 : f32 to vector<16x128xf32>
    %59 = arith.select %57, %55, %58 : vector<16x128xi1>, vector<16x128xf32>
    %c120_i32_31 = arith.constant 120 : i32
    %60 = tpu.dynamic_rotate %29 by %c120_i32_31 dim 1 : vector<16x128xf32>, i32 -> vector<16x128xf32>
    %c120_i32_32 = arith.constant 120 : i32
    %61 = vector.broadcast %c120_i32_32 : i32 to vector<16x128xi32>
    %62 = arith.cmpi slt, %0, %61 : vector<16x128xi32>
    %cst_33 = arith.constant 0.000000e+00 : f32
    %63 = vector.broadcast %cst_33 : f32 to vector<16x128xf32>
    %64 = arith.select %62, %60, %63 : vector<16x128xi1>, vector<16x128xf32>
    %c112_i32_34 = arith.constant 112 : i32
    %65 = tpu.dynamic_rotate %29 by %c112_i32_34 dim 1 : vector<16x128xf32>, i32 -> vector<16x128xf32>
    %c112_i32_35 = arith.constant 112 : i32
    %66 = vector.broadcast %c112_i32_35 : i32 to vector<16x128xi32>
    %67 = arith.cmpi slt, %0, %66 : vector<16x128xi32>
    %cst_36 = arith.constant 0.000000e+00 : f32
    %68 = vector.broadcast %cst_36 : f32 to vector<16x128xf32>
    %69 = arith.select %67, %65, %68 : vector<16x128xi1>, vector<16x128xf32>
    %c8_i32_37 = arith.constant 8 : i32
    %70 = tpu.dynamic_rotate %25 by %c8_i32_37 dim 1 : vector<16x128xf32>, i32 -> vector<16x128xf32>
    %c8_i32_38 = arith.constant 8 : i32
    %71 = vector.broadcast %c8_i32_38 : i32 to vector<16x128xi32>
    %72 = arith.cmpi sge, %0, %71 : vector<16x128xi32>
    %cst_39 = arith.constant 0.000000e+00 : f32
    %73 = vector.broadcast %cst_39 : f32 to vector<16x128xf32>
    %74 = arith.select %72, %70, %73 : vector<16x128xi1>, vector<16x128xf32>
    %c120_i32_40 = arith.constant 120 : i32
    %75 = tpu.dynamic_rotate %25 by %c120_i32_40 dim 1 : vector<16x128xf32>, i32 -> vector<16x128xf32>
    %c120_i32_41 = arith.constant 120 : i32
    %76 = vector.broadcast %c120_i32_41 : i32 to vector<16x128xi32>
    %77 = arith.cmpi slt, %0, %76 : vector<16x128xi32>
    %cst_42 = arith.constant 0.000000e+00 : f32
    %78 = vector.broadcast %cst_42 : f32 to vector<16x128xf32>
    %79 = arith.select %77, %75, %78 : vector<16x128xi1>, vector<16x128xf32>
    %c0_43 = arith.constant 0 : index
    %c0_44 = arith.constant 0 : index
    %c0_45 = arith.constant 0 : index
    %80 = vector.load %arg7[%c0_43, %c0_44, %c0_45] : memref<8x9x128xf32, #tpu.memory_space<vmem>>, vector<1x9x128xf32>
    %81 = vector.shape_cast %80 : vector<1x9x128xf32> to vector<9x128xf32>
    %cst_46 = arith.constant 0.000000e+00 : f32
    %82 = vector.broadcast %cst_46 : f32 to vector<16x128xf32>
    %cst_47 = arith.constant 0.000000e+00 : f32
    %83 = vector.broadcast %cst_47 : f32 to vector<16x128xf32>
    %c1_i32 = arith.constant 1 : i32
    %84 = tpu.dynamic_rotate %39 by %c1_i32 dim 0 : vector<16x128xf32>, i32 -> vector<16x128xf32>
    %c1_i32_48 = arith.constant 1 : i32
    %85 = vector.broadcast %c1_i32_48 : i32 to vector<16x128xi32>
    %86 = arith.cmpi sge, %1, %85 : vector<16x128xi32>
    %cst_49 = arith.constant 0.000000e+00 : f32
    %87 = vector.broadcast %cst_49 : f32 to vector<16x128xf32>
    %88 = arith.select %86, %84, %87 : vector<16x128xi1>, vector<16x128xf32>
    %89 = vector.extract_strided_slice %81 {offsets = [0, 0], sizes = [1, 128], strides = [1, 1]} : vector<9x128xf32> to vector<1x128xf32>
    %90 = vector.shape_cast %89 : vector<1x128xf32> to vector<128xf32>
    %91 = vector.shape_cast %90 : vector<128xf32> to vector<1x128xf32>
    %92 = vector.broadcast %91 : vector<1x128xf32> to vector<16x128xf32>
    %93 = arith.mulf %88, %92 : vector<16x128xf32>
    %94 = arith.addf %82, %93 : vector<16x128xf32>
    %95 = vector.extract_strided_slice %81 {offsets = [3, 0], sizes = [1, 128], strides = [1, 1]} : vector<9x128xf32> to vector<1x128xf32>
    %96 = vector.shape_cast %95 : vector<1x128xf32> to vector<128xf32>
    %97 = vector.shape_cast %96 : vector<128xf32> to vector<1x128xf32>
    %98 = vector.broadcast %97 : vector<1x128xf32> to vector<16x128xf32>
    %99 = arith.mulf %39, %98 : vector<16x128xf32>
    %100 = arith.addf %83, %99 : vector<16x128xf32>
    %c15_i32 = arith.constant 15 : i32
    %101 = tpu.dynamic_rotate %39 by %c15_i32 dim 0 : vector<16x128xf32>, i32 -> vector<16x128xf32>
    %c15_i32_50 = arith.constant 15 : i32
    %102 = vector.broadcast %c15_i32_50 : i32 to vector<16x128xi32>
    %103 = arith.cmpi slt, %1, %102 : vector<16x128xi32>
    %cst_51 = arith.constant 0.000000e+00 : f32
    %104 = vector.broadcast %cst_51 : f32 to vector<16x128xf32>
    %105 = arith.select %103, %101, %104 : vector<16x128xi1>, vector<16x128xf32>
    %106 = vector.extract_strided_slice %81 {offsets = [6, 0], sizes = [1, 128], strides = [1, 1]} : vector<9x128xf32> to vector<1x128xf32>
    %107 = vector.shape_cast %106 : vector<1x128xf32> to vector<128xf32>
    %108 = vector.shape_cast %107 : vector<128xf32> to vector<1x128xf32>
    %109 = vector.broadcast %108 : vector<1x128xf32> to vector<16x128xf32>
    %110 = arith.mulf %105, %109 : vector<16x128xf32>
    %111 = arith.addf %94, %110 : vector<16x128xf32>
    %c1_i32_52 = arith.constant 1 : i32
    %112 = tpu.dynamic_rotate %27 by %c1_i32_52 dim 0 : vector<16x128xf32>, i32 -> vector<16x128xf32>
    %c1_i32_53 = arith.constant 1 : i32
    %113 = vector.broadcast %c1_i32_53 : i32 to vector<16x128xi32>
    %114 = arith.cmpi sge, %1, %113 : vector<16x128xi32>
    %cst_54 = arith.constant 0.000000e+00 : f32
    %115 = vector.broadcast %cst_54 : f32 to vector<16x128xf32>
    %116 = arith.select %114, %112, %115 : vector<16x128xi1>, vector<16x128xf32>
    %117 = vector.extract_strided_slice %81 {offsets = [1, 0], sizes = [1, 128], strides = [1, 1]} : vector<9x128xf32> to vector<1x128xf32>
    %118 = vector.shape_cast %117 : vector<1x128xf32> to vector<128xf32>
    %119 = vector.shape_cast %118 : vector<128xf32> to vector<1x128xf32>
    %120 = vector.broadcast %119 : vector<1x128xf32> to vector<16x128xf32>
    %121 = arith.mulf %116, %120 : vector<16x128xf32>
    %122 = arith.addf %100, %121 : vector<16x128xf32>
    %123 = vector.extract_strided_slice %81 {offsets = [4, 0], sizes = [1, 128], strides = [1, 1]} : vector<9x128xf32> to vector<1x128xf32>
    %124 = vector.shape_cast %123 : vector<1x128xf32> to vector<128xf32>
    %125 = vector.shape_cast %124 : vector<128xf32> to vector<1x128xf32>
    %126 = vector.broadcast %125 : vector<1x128xf32> to vector<16x128xf32>
    %127 = arith.mulf %27, %126 : vector<16x128xf32>
    %128 = arith.addf %111, %127 : vector<16x128xf32>
    %c15_i32_55 = arith.constant 15 : i32
    %129 = tpu.dynamic_rotate %27 by %c15_i32_55 dim 0 : vector<16x128xf32>, i32 -> vector<16x128xf32>
    %c15_i32_56 = arith.constant 15 : i32
    %130 = vector.broadcast %c15_i32_56 : i32 to vector<16x128xi32>
    %131 = arith.cmpi slt, %1, %130 : vector<16x128xi32>
    %cst_57 = arith.constant 0.000000e+00 : f32
    %132 = vector.broadcast %cst_57 : f32 to vector<16x128xf32>
    %133 = arith.select %131, %129, %132 : vector<16x128xi1>, vector<16x128xf32>
    %134 = vector.extract_strided_slice %81 {offsets = [7, 0], sizes = [1, 128], strides = [1, 1]} : vector<9x128xf32> to vector<1x128xf32>
    %135 = vector.shape_cast %134 : vector<1x128xf32> to vector<128xf32>
    %136 = vector.shape_cast %135 : vector<128xf32> to vector<1x128xf32>
    %137 = vector.broadcast %136 : vector<1x128xf32> to vector<16x128xf32>
    %138 = arith.mulf %133, %137 : vector<16x128xf32>
    %139 = arith.addf %122, %138 : vector<16x128xf32>
    %c1_i32_58 = arith.constant 1 : i32
    %140 = tpu.dynamic_rotate %44 by %c1_i32_58 dim 0 : vector<16x128xf32>, i32 -> vector<16x128xf32>
    %c1_i32_59 = arith.constant 1 : i32
    %141 = vector.broadcast %c1_i32_59 : i32 to vector<16x128xi32>
    %142 = arith.cmpi sge, %1, %141 : vector<16x128xi32>
    %cst_60 = arith.constant 0.000000e+00 : f32
    %143 = vector.broadcast %cst_60 : f32 to vector<16x128xf32>
    %144 = arith.select %142, %140, %143 : vector<16x128xi1>, vector<16x128xf32>
    %145 = vector.extract_strided_slice %81 {offsets = [2, 0], sizes = [1, 128], strides = [1, 1]} : vector<9x128xf32> to vector<1x128xf32>
    %146 = vector.shape_cast %145 : vector<1x128xf32> to vector<128xf32>
    %147 = vector.shape_cast %146 : vector<128xf32> to vector<1x128xf32>
    %148 = vector.broadcast %147 : vector<1x128xf32> to vector<16x128xf32>
    %149 = arith.mulf %144, %148 : vector<16x128xf32>
    %150 = arith.addf %128, %149 : vector<16x128xf32>
    %151 = vector.extract_strided_slice %81 {offsets = [5, 0], sizes = [1, 128], strides = [1, 1]} : vector<9x128xf32> to vector<1x128xf32>
    %152 = vector.shape_cast %151 : vector<1x128xf32> to vector<128xf32>
    %153 = vector.shape_cast %152 : vector<128xf32> to vector<1x128xf32>
    %154 = vector.broadcast %153 : vector<1x128xf32> to vector<16x128xf32>
    %155 = arith.mulf %44, %154 : vector<16x128xf32>
    %156 = arith.addf %139, %155 : vector<16x128xf32>
    %c15_i32_61 = arith.constant 15 : i32
    %157 = tpu.dynamic_rotate %44 by %c15_i32_61 dim 0 : vector<16x128xf32>, i32 -> vector<16x128xf32>
    %c15_i32_62 = arith.constant 15 : i32
    %158 = vector.broadcast %c15_i32_62 : i32 to vector<16x128xi32>
    %159 = arith.cmpi slt, %1, %158 : vector<16x128xi32>
    %cst_63 = arith.constant 0.000000e+00 : f32
    %160 = vector.broadcast %cst_63 : f32 to vector<16x128xf32>
    %161 = arith.select %159, %157, %160 : vector<16x128xi1>, vector<16x128xf32>
    %162 = vector.extract_strided_slice %81 {offsets = [8, 0], sizes = [1, 128], strides = [1, 1]} : vector<9x128xf32> to vector<1x128xf32>
    %163 = vector.shape_cast %162 : vector<1x128xf32> to vector<128xf32>
    %164 = vector.shape_cast %163 : vector<128xf32> to vector<1x128xf32>
    %165 = vector.broadcast %164 : vector<1x128xf32> to vector<16x128xf32>
    %166 = arith.mulf %161, %165 : vector<16x128xf32>
    %167 = arith.addf %150, %166 : vector<16x128xf32>
    %168 = arith.addf %167, %156 : vector<16x128xf32>
    %c0_64 = arith.constant 0 : index
    %c0_65 = arith.constant 0 : index
    %c0_66 = arith.constant 0 : index
    %169 = vector.load %arg5[%c0_64, %c0_65, %c0_66] : memref<10x128x128xbf16, #tpu.memory_space<vmem>>, vector<1x128x128xbf16>
    %170 = vector.shape_cast %169 : vector<1x128x128xbf16> to vector<128x128xbf16>
    %171 = arith.truncf %168 : vector<16x128xf32> to vector<16x128xbf16>
    %cst_67 = arith.constant dense<0.000000e+00> : vector<16x128xf32>
    %172 = tpu.matmul %171, %170, %cst_67 {dimension_numbers = #tpu.dot_dimension_numbers<[1], [0], [0], [1], [0, 0, 1, 1], [], []>} : vector<16x128xbf16>, vector<128x128xbf16>, vector<16x128xf32> -> vector<16x128xf32>
    %c2 = arith.constant 2 : index
    %c0_68 = arith.constant 0 : index
    %173 = vector.load %arg6[%c2, %c0_68] : memref<12x128xf32, #tpu.memory_space<vmem>>, vector<1x128xf32>
    %174 = vector.shape_cast %173 : vector<1x128xf32> to vector<128xf32>
    %175 = vector.shape_cast %174 : vector<128xf32> to vector<1x128xf32>
    %176 = vector.broadcast %175 : vector<1x128xf32> to vector<16x128xf32>
    %177 = arith.addf %172, %176 : vector<16x128xf32>
    %cst_69 = arith.constant 0.000000e+00 : f32
    %178 = vector.broadcast %cst_69 : f32 to vector<16x128xf32>
    %179 = arith.maximumf %177, %178 : vector<16x128xf32>
    %c8_i32_70 = arith.constant 8 : i32
    %180 = tpu.dynamic_rotate %179 by %c8_i32_70 dim 1 : vector<16x128xf32>, i32 -> vector<16x128xf32>
    %c8_i32_71 = arith.constant 8 : i32
    %181 = vector.broadcast %c8_i32_71 : i32 to vector<16x128xi32>
    %182 = arith.cmpi sge, %0, %181 : vector<16x128xi32>
    %cst_72 = arith.constant 0.000000e+00 : f32
    %183 = vector.broadcast %cst_72 : f32 to vector<16x128xf32>
    %184 = arith.select %182, %180, %183 : vector<16x128xi1>, vector<16x128xf32>
    %c120_i32_73 = arith.constant 120 : i32
    %185 = tpu.dynamic_rotate %179 by %c120_i32_73 dim 1 : vector<16x128xf32>, i32 -> vector<16x128xf32>
    %c120_i32_74 = arith.constant 120 : i32
    %186 = vector.broadcast %c120_i32_74 : i32 to vector<16x128xi32>
    %187 = arith.cmpi slt, %0, %186 : vector<16x128xi32>
    %cst_75 = arith.constant 0.000000e+00 : f32
    %188 = vector.broadcast %cst_75 : f32 to vector<16x128xf32>
    %189 = arith.select %187, %185, %188 : vector<16x128xi1>, vector<16x128xf32>
    %c1_76 = arith.constant 1 : index
    %c0_77 = arith.constant 0 : index
    %c0_78 = arith.constant 0 : index
    %190 = vector.load %arg7[%c1_76, %c0_77, %c0_78] : memref<8x9x128xf32, #tpu.memory_space<vmem>>, vector<1x9x128xf32>
    %191 = vector.shape_cast %190 : vector<1x9x128xf32> to vector<9x128xf32>
    %cst_79 = arith.constant 0.000000e+00 : f32
    %192 = vector.broadcast %cst_79 : f32 to vector<16x128xf32>
    %cst_80 = arith.constant 0.000000e+00 : f32
    %193 = vector.broadcast %cst_80 : f32 to vector<16x128xf32>
    %c1_i32_81 = arith.constant 1 : i32
    %194 = tpu.dynamic_rotate %184 by %c1_i32_81 dim 0 : vector<16x128xf32>, i32 -> vector<16x128xf32>
    %c1_i32_82 = arith.constant 1 : i32
    %195 = vector.broadcast %c1_i32_82 : i32 to vector<16x128xi32>
    %196 = arith.cmpi sge, %1, %195 : vector<16x128xi32>
    %cst_83 = arith.constant 0.000000e+00 : f32
    %197 = vector.broadcast %cst_83 : f32 to vector<16x128xf32>
    %198 = arith.select %196, %194, %197 : vector<16x128xi1>, vector<16x128xf32>
    %199 = vector.extract_strided_slice %191 {offsets = [0, 0], sizes = [1, 128], strides = [1, 1]} : vector<9x128xf32> to vector<1x128xf32>
    %200 = vector.shape_cast %199 : vector<1x128xf32> to vector<128xf32>
    %201 = vector.shape_cast %200 : vector<128xf32> to vector<1x128xf32>
    %202 = vector.broadcast %201 : vector<1x128xf32> to vector<16x128xf32>
    %203 = arith.mulf %198, %202 : vector<16x128xf32>
    %204 = arith.addf %192, %203 : vector<16x128xf32>
    %205 = vector.extract_strided_slice %191 {offsets = [3, 0], sizes = [1, 128], strides = [1, 1]} : vector<9x128xf32> to vector<1x128xf32>
    %206 = vector.shape_cast %205 : vector<1x128xf32> to vector<128xf32>
    %207 = vector.shape_cast %206 : vector<128xf32> to vector<1x128xf32>
    %208 = vector.broadcast %207 : vector<1x128xf32> to vector<16x128xf32>
    %209 = arith.mulf %184, %208 : vector<16x128xf32>
    %210 = arith.addf %193, %209 : vector<16x128xf32>
    %c15_i32_84 = arith.constant 15 : i32
    %211 = tpu.dynamic_rotate %184 by %c15_i32_84 dim 0 : vector<16x128xf32>, i32 -> vector<16x128xf32>
    %c15_i32_85 = arith.constant 15 : i32
    %212 = vector.broadcast %c15_i32_85 : i32 to vector<16x128xi32>
    %213 = arith.cmpi slt, %1, %212 : vector<16x128xi32>
    %cst_86 = arith.constant 0.000000e+00 : f32
    %214 = vector.broadcast %cst_86 : f32 to vector<16x128xf32>
    %215 = arith.select %213, %211, %214 : vector<16x128xi1>, vector<16x128xf32>
    %216 = vector.extract_strided_slice %191 {offsets = [6, 0], sizes = [1, 128], strides = [1, 1]} : vector<9x128xf32> to vector<1x128xf32>
    %217 = vector.shape_cast %216 : vector<1x128xf32> to vector<128xf32>
    %218 = vector.shape_cast %217 : vector<128xf32> to vector<1x128xf32>
    %219 = vector.broadcast %218 : vector<1x128xf32> to vector<16x128xf32>
    %220 = arith.mulf %215, %219 : vector<16x128xf32>
    %221 = arith.addf %204, %220 : vector<16x128xf32>
    %c1_i32_87 = arith.constant 1 : i32
    %222 = tpu.dynamic_rotate %179 by %c1_i32_87 dim 0 : vector<16x128xf32>, i32 -> vector<16x128xf32>
    %c1_i32_88 = arith.constant 1 : i32
    %223 = vector.broadcast %c1_i32_88 : i32 to vector<16x128xi32>
    %224 = arith.cmpi sge, %1, %223 : vector<16x128xi32>
    %cst_89 = arith.constant 0.000000e+00 : f32
    %225 = vector.broadcast %cst_89 : f32 to vector<16x128xf32>
    %226 = arith.select %224, %222, %225 : vector<16x128xi1>, vector<16x128xf32>
    %227 = vector.extract_strided_slice %191 {offsets = [1, 0], sizes = [1, 128], strides = [1, 1]} : vector<9x128xf32> to vector<1x128xf32>
    %228 = vector.shape_cast %227 : vector<1x128xf32> to vector<128xf32>
    %229 = vector.shape_cast %228 : vector<128xf32> to vector<1x128xf32>
    %230 = vector.broadcast %229 : vector<1x128xf32> to vector<16x128xf32>
    %231 = arith.mulf %226, %230 : vector<16x128xf32>
    %232 = arith.addf %210, %231 : vector<16x128xf32>
    %233 = vector.extract_strided_slice %191 {offsets = [4, 0], sizes = [1, 128], strides = [1, 1]} : vector<9x128xf32> to vector<1x128xf32>
    %234 = vector.shape_cast %233 : vector<1x128xf32> to vector<128xf32>
    %235 = vector.shape_cast %234 : vector<128xf32> to vector<1x128xf32>
    %236 = vector.broadcast %235 : vector<1x128xf32> to vector<16x128xf32>
    %237 = arith.mulf %179, %236 : vector<16x128xf32>
    %238 = arith.addf %221, %237 : vector<16x128xf32>
    %c15_i32_90 = arith.constant 15 : i32
    %239 = tpu.dynamic_rotate %179 by %c15_i32_90 dim 0 : vector<16x128xf32>, i32 -> vector<16x128xf32>
    %c15_i32_91 = arith.constant 15 : i32
    %240 = vector.broadcast %c15_i32_91 : i32 to vector<16x128xi32>
    %241 = arith.cmpi slt, %1, %240 : vector<16x128xi32>
    %cst_92 = arith.constant 0.000000e+00 : f32
    %242 = vector.broadcast %cst_92 : f32 to vector<16x128xf32>
    %243 = arith.select %241, %239, %242 : vector<16x128xi1>, vector<16x128xf32>
    %244 = vector.extract_strided_slice %191 {offsets = [7, 0], sizes = [1, 128], strides = [1, 1]} : vector<9x128xf32> to vector<1x128xf32>
    %245 = vector.shape_cast %244 : vector<1x128xf32> to vector<128xf32>
    %246 = vector.shape_cast %245 : vector<128xf32> to vector<1x128xf32>
    %247 = vector.broadcast %246 : vector<1x128xf32> to vector<16x128xf32>
    %248 = arith.mulf %243, %247 : vector<16x128xf32>
    %249 = arith.addf %232, %248 : vector<16x128xf32>
    %c1_i32_93 = arith.constant 1 : i32
    %250 = tpu.dynamic_rotate %189 by %c1_i32_93 dim 0 : vector<16x128xf32>, i32 -> vector<16x128xf32>
    %c1_i32_94 = arith.constant 1 : i32
    %251 = vector.broadcast %c1_i32_94 : i32 to vector<16x128xi32>
    %252 = arith.cmpi sge, %1, %251 : vector<16x128xi32>
    %cst_95 = arith.constant 0.000000e+00 : f32
    %253 = vector.broadcast %cst_95 : f32 to vector<16x128xf32>
    %254 = arith.select %252, %250, %253 : vector<16x128xi1>, vector<16x128xf32>
    %255 = vector.extract_strided_slice %191 {offsets = [2, 0], sizes = [1, 128], strides = [1, 1]} : vector<9x128xf32> to vector<1x128xf32>
    %256 = vector.shape_cast %255 : vector<1x128xf32> to vector<128xf32>
    %257 = vector.shape_cast %256 : vector<128xf32> to vector<1x128xf32>
    %258 = vector.broadcast %257 : vector<1x128xf32> to vector<16x128xf32>
    %259 = arith.mulf %254, %258 : vector<16x128xf32>
    %260 = arith.addf %238, %259 : vector<16x128xf32>
    %261 = vector.extract_strided_slice %191 {offsets = [5, 0], sizes = [1, 128], strides = [1, 1]} : vector<9x128xf32> to vector<1x128xf32>
    %262 = vector.shape_cast %261 : vector<1x128xf32> to vector<128xf32>
    %263 = vector.shape_cast %262 : vector<128xf32> to vector<1x128xf32>
    %264 = vector.broadcast %263 : vector<1x128xf32> to vector<16x128xf32>
    %265 = arith.mulf %189, %264 : vector<16x128xf32>
    %266 = arith.addf %249, %265 : vector<16x128xf32>
    %c15_i32_96 = arith.constant 15 : i32
    %267 = tpu.dynamic_rotate %189 by %c15_i32_96 dim 0 : vector<16x128xf32>, i32 -> vector<16x128xf32>
    %c15_i32_97 = arith.constant 15 : i32
    %268 = vector.broadcast %c15_i32_97 : i32 to vector<16x128xi32>
    %269 = arith.cmpi slt, %1, %268 : vector<16x128xi32>
    %cst_98 = arith.constant 0.000000e+00 : f32
    %270 = vector.broadcast %cst_98 : f32 to vector<16x128xf32>
    %271 = arith.select %269, %267, %270 : vector<16x128xi1>, vector<16x128xf32>
    %272 = vector.extract_strided_slice %191 {offsets = [8, 0], sizes = [1, 128], strides = [1, 1]} : vector<9x128xf32> to vector<1x128xf32>
    %273 = vector.shape_cast %272 : vector<1x128xf32> to vector<128xf32>
    %274 = vector.shape_cast %273 : vector<128xf32> to vector<1x128xf32>
    %275 = vector.broadcast %274 : vector<1x128xf32> to vector<16x128xf32>
    %276 = arith.mulf %271, %275 : vector<16x128xf32>
    %277 = arith.addf %260, %276 : vector<16x128xf32>
    %278 = arith.addf %277, %266 : vector<16x128xf32>
    %c1_99 = arith.constant 1 : index
    %c0_100 = arith.constant 0 : index
    %c0_101 = arith.constant 0 : index
    %279 = vector.load %arg5[%c1_99, %c0_100, %c0_101] : memref<10x128x128xbf16, #tpu.memory_space<vmem>>, vector<1x128x128xbf16>
    %280 = vector.shape_cast %279 : vector<1x128x128xbf16> to vector<128x128xbf16>
    %281 = arith.truncf %278 : vector<16x128xf32> to vector<16x128xbf16>
    %cst_102 = arith.constant dense<0.000000e+00> : vector<16x128xf32>
    %282 = tpu.matmul %281, %280, %cst_102 {dimension_numbers = #tpu.dot_dimension_numbers<[1], [0], [0], [1], [0, 0, 1, 1], [], []>} : vector<16x128xbf16>, vector<128x128xbf16>, vector<16x128xf32> -> vector<16x128xf32>
    %c3 = arith.constant 3 : index
    %c0_103 = arith.constant 0 : index
    %283 = vector.load %arg6[%c3, %c0_103] : memref<12x128xf32, #tpu.memory_space<vmem>>, vector<1x128xf32>
    %284 = vector.shape_cast %283 : vector<1x128xf32> to vector<128xf32>
    %285 = vector.shape_cast %284 : vector<128xf32> to vector<1x128xf32>
    %286 = vector.broadcast %285 : vector<1x128xf32> to vector<16x128xf32>
    %287 = arith.addf %282, %286 : vector<16x128xf32>
    %288 = arith.addf %287, %25 : vector<16x128xf32>
    %c0_104 = arith.constant 0 : index
    %c0_105 = arith.constant 0 : index
    %c0_106 = arith.constant 0 : index
    %c0_107 = arith.constant 0 : index
    %289 = vector.load %arg10[%c0_104, %c0_105, %c0_106, %c0_107] : memref<4x1x16x128xf32, #tpu.memory_space<vmem>>, vector<1x1x16x128xf32>
    %290 = vector.shape_cast %289 : vector<1x1x16x128xf32> to vector<16x128xf32>
    %291 = vector.shape_cast %288 : vector<16x128xf32> to vector<1x1x16x128xf32>
    tpu.vector_store %arg10[%c0_104, %c0_105, %c0_106, %c0_107], %291 {strides = array<i32>} : memref<4x1x16x128xf32, #tpu.memory_space<vmem>>, vector<1x1x16x128xf32>,
    %c2_108 = arith.constant 2 : index
    %c0_109 = arith.constant 0 : index
    %c0_110 = arith.constant 0 : index
    %292 = vector.load %arg7[%c2_108, %c0_109, %c0_110] : memref<8x9x128xf32, #tpu.memory_space<vmem>>, vector<1x9x128xf32>
    %293 = vector.shape_cast %292 : vector<1x9x128xf32> to vector<9x128xf32>
    %cst_111 = arith.constant 0.000000e+00 : f32
    %294 = vector.broadcast %cst_111 : f32 to vector<16x128xf32>
    %cst_112 = arith.constant 0.000000e+00 : f32
    %295 = vector.broadcast %cst_112 : f32 to vector<16x128xf32>
    %c2_i32 = arith.constant 2 : i32
    %296 = tpu.dynamic_rotate %34 by %c2_i32 dim 0 : vector<16x128xf32>, i32 -> vector<16x128xf32>
    %c2_i32_113 = arith.constant 2 : i32
    %297 = vector.broadcast %c2_i32_113 : i32 to vector<16x128xi32>
    %298 = arith.cmpi sge, %1, %297 : vector<16x128xi32>
    %cst_114 = arith.constant 0.000000e+00 : f32
    %299 = vector.broadcast %cst_114 : f32 to vector<16x128xf32>
    %300 = arith.select %298, %296, %299 : vector<16x128xi1>, vector<16x128xf32>
    %301 = vector.extract_strided_slice %293 {offsets = [0, 0], sizes = [1, 128], strides = [1, 1]} : vector<9x128xf32> to vector<1x128xf32>
    %302 = vector.shape_cast %301 : vector<1x128xf32> to vector<128xf32>
    %303 = vector.shape_cast %302 : vector<128xf32> to vector<1x128xf32>
    %304 = vector.broadcast %303 : vector<1x128xf32> to vector<16x128xf32>
    %305 = arith.mulf %300, %304 : vector<16x128xf32>
    %306 = arith.addf %294, %305 : vector<16x128xf32>
    %307 = vector.extract_strided_slice %293 {offsets = [3, 0], sizes = [1, 128], strides = [1, 1]} : vector<9x128xf32> to vector<1x128xf32>
    %308 = vector.shape_cast %307 : vector<1x128xf32> to vector<128xf32>
    %309 = vector.shape_cast %308 : vector<128xf32> to vector<1x128xf32>
    %310 = vector.broadcast %309 : vector<1x128xf32> to vector<16x128xf32>
    %311 = arith.mulf %34, %310 : vector<16x128xf32>
    %312 = arith.addf %295, %311 : vector<16x128xf32>
    %c14_i32 = arith.constant 14 : i32
    %313 = tpu.dynamic_rotate %34 by %c14_i32 dim 0 : vector<16x128xf32>, i32 -> vector<16x128xf32>
    %c14_i32_115 = arith.constant 14 : i32
    %314 = vector.broadcast %c14_i32_115 : i32 to vector<16x128xi32>
    %315 = arith.cmpi slt, %1, %314 : vector<16x128xi32>
    %cst_116 = arith.constant 0.000000e+00 : f32
    %316 = vector.broadcast %cst_116 : f32 to vector<16x128xf32>
    %317 = arith.select %315, %313, %316 : vector<16x128xi1>, vector<16x128xf32>
    %318 = vector.extract_strided_slice %293 {offsets = [6, 0], sizes = [1, 128], strides = [1, 1]} : vector<9x128xf32> to vector<1x128xf32>
    %319 = vector.shape_cast %318 : vector<1x128xf32> to vector<128xf32>
    %320 = vector.shape_cast %319 : vector<128xf32> to vector<1x128xf32>
    %321 = vector.broadcast %320 : vector<1x128xf32> to vector<16x128xf32>
    %322 = arith.mulf %317, %321 : vector<16x128xf32>
    %323 = arith.addf %306, %322 : vector<16x128xf32>
    %c2_i32_117 = arith.constant 2 : i32
    %324 = tpu.dynamic_rotate %27 by %c2_i32_117 dim 0 : vector<16x128xf32>, i32 -> vector<16x128xf32>
    %c2_i32_118 = arith.constant 2 : i32
    %325 = vector.broadcast %c2_i32_118 : i32 to vector<16x128xi32>
    %326 = arith.cmpi sge, %1, %325 : vector<16x128xi32>
    %cst_119 = arith.constant 0.000000e+00 : f32
    %327 = vector.broadcast %cst_119 : f32 to vector<16x128xf32>
    %328 = arith.select %326, %324, %327 : vector<16x128xi1>, vector<16x128xf32>
    %329 = vector.extract_strided_slice %293 {offsets = [1, 0], sizes = [1, 128], strides = [1, 1]} : vector<9x128xf32> to vector<1x128xf32>
    %330 = vector.shape_cast %329 : vector<1x128xf32> to vector<128xf32>
    %331 = vector.shape_cast %330 : vector<128xf32> to vector<1x128xf32>
    %332 = vector.broadcast %331 : vector<1x128xf32> to vector<16x128xf32>
    %333 = arith.mulf %328, %332 : vector<16x128xf32>
    %334 = arith.addf %312, %333 : vector<16x128xf32>
    %335 = vector.extract_strided_slice %293 {offsets = [4, 0], sizes = [1, 128], strides = [1, 1]} : vector<9x128xf32> to vector<1x128xf32>
    %336 = vector.shape_cast %335 : vector<1x128xf32> to vector<128xf32>
    %337 = vector.shape_cast %336 : vector<128xf32> to vector<1x128xf32>
    %338 = vector.broadcast %337 : vector<1x128xf32> to vector<16x128xf32>
    %339 = arith.mulf %27, %338 : vector<16x128xf32>
    %340 = arith.addf %323, %339 : vector<16x128xf32>
    %c14_i32_120 = arith.constant 14 : i32
    %341 = tpu.dynamic_rotate %27 by %c14_i32_120 dim 0 : vector<16x128xf32>, i32 -> vector<16x128xf32>
    %c14_i32_121 = arith.constant 14 : i32
    %342 = vector.broadcast %c14_i32_121 : i32 to vector<16x128xi32>
    %343 = arith.cmpi slt, %1, %342 : vector<16x128xi32>
    %cst_122 = arith.constant 0.000000e+00 : f32
    %344 = vector.broadcast %cst_122 : f32 to vector<16x128xf32>
    %345 = arith.select %343, %341, %344 : vector<16x128xi1>, vector<16x128xf32>
    %346 = vector.extract_strided_slice %293 {offsets = [7, 0], sizes = [1, 128], strides = [1, 1]} : vector<9x128xf32> to vector<1x128xf32>
    %347 = vector.shape_cast %346 : vector<1x128xf32> to vector<128xf32>
    %348 = vector.shape_cast %347 : vector<128xf32> to vector<1x128xf32>
    %349 = vector.broadcast %348 : vector<1x128xf32> to vector<16x128xf32>
    %350 = arith.mulf %345, %349 : vector<16x128xf32>
    %351 = arith.addf %334, %350 : vector<16x128xf32>
    %c2_i32_123 = arith.constant 2 : i32
    %352 = tpu.dynamic_rotate %49 by %c2_i32_123 dim 0 : vector<16x128xf32>, i32 -> vector<16x128xf32>
    %c2_i32_124 = arith.constant 2 : i32
    %353 = vector.broadcast %c2_i32_124 : i32 to vector<16x128xi32>
    %354 = arith.cmpi sge, %1, %353 : vector<16x128xi32>
    %cst_125 = arith.constant 0.000000e+00 : f32
    %355 = vector.broadcast %cst_125 : f32 to vector<16x128xf32>
    %356 = arith.select %354, %352, %355 : vector<16x128xi1>, vector<16x128xf32>
    %357 = vector.extract_strided_slice %293 {offsets = [2, 0], sizes = [1, 128], strides = [1, 1]} : vector<9x128xf32> to vector<1x128xf32>
    %358 = vector.shape_cast %357 : vector<1x128xf32> to vector<128xf32>
    %359 = vector.shape_cast %358 : vector<128xf32> to vector<1x128xf32>
    %360 = vector.broadcast %359 : vector<1x128xf32> to vector<16x128xf32>
    %361 = arith.mulf %356, %360 : vector<16x128xf32>
    %362 = arith.addf %340, %361 : vector<16x128xf32>
    %363 = vector.extract_strided_slice %293 {offsets = [5, 0], sizes = [1, 128], strides = [1, 1]} : vector<9x128xf32> to vector<1x128xf32>
    %364 = vector.shape_cast %363 : vector<1x128xf32> to vector<128xf32>
    %365 = vector.shape_cast %364 : vector<128xf32> to vector<1x128xf32>
    %366 = vector.broadcast %365 : vector<1x128xf32> to vector<16x128xf32>
    %367 = arith.mulf %49, %366 : vector<16x128xf32>
    %368 = arith.addf %351, %367 : vector<16x128xf32>
    %c14_i32_126 = arith.constant 14 : i32
    %369 = tpu.dynamic_rotate %49 by %c14_i32_126 dim 0 : vector<16x128xf32>, i32 -> vector<16x128xf32>
    %c14_i32_127 = arith.constant 14 : i32
    %370 = vector.broadcast %c14_i32_127 : i32 to vector<16x128xi32>
    %371 = arith.cmpi slt, %1, %370 : vector<16x128xi32>
    %cst_128 = arith.constant 0.000000e+00 : f32
    %372 = vector.broadcast %cst_128 : f32 to vector<16x128xf32>
    %373 = arith.select %371, %369, %372 : vector<16x128xi1>, vector<16x128xf32>
    %374 = vector.extract_strided_slice %293 {offsets = [8, 0], sizes = [1, 128], strides = [1, 1]} : vector<9x128xf32> to vector<1x128xf32>
    %375 = vector.shape_cast %374 : vector<1x128xf32> to vector<128xf32>
    %376 = vector.shape_cast %375 : vector<128xf32> to vector<1x128xf32>
    %377 = vector.broadcast %376 : vector<1x128xf32> to vector<16x128xf32>
    %378 = arith.mulf %373, %377 : vector<16x128xf32>
    %379 = arith.addf %362, %378 : vector<16x128xf32>
    %380 = arith.addf %379, %368 : vector<16x128xf32>
    %c2_129 = arith.constant 2 : index
    %c0_130 = arith.constant 0 : index
    %c0_131 = arith.constant 0 : index
    %381 = vector.load %arg5[%c2_129, %c0_130, %c0_131] : memref<10x128x128xbf16, #tpu.memory_space<vmem>>, vector<1x128x128xbf16>
    %382 = vector.shape_cast %381 : vector<1x128x128xbf16> to vector<128x128xbf16>
    %383 = arith.truncf %380 : vector<16x128xf32> to vector<16x128xbf16>
    %cst_132 = arith.constant dense<0.000000e+00> : vector<16x128xf32>
    %384 = tpu.matmul %383, %382, %cst_132 {dimension_numbers = #tpu.dot_dimension_numbers<[1], [0], [0], [1], [0, 0, 1, 1], [], []>} : vector<16x128xbf16>, vector<128x128xbf16>, vector<16x128xf32> -> vector<16x128xf32>
    %c4 = arith.constant 4 : index
    %c0_133 = arith.constant 0 : index
    %385 = vector.load %arg6[%c4, %c0_133] : memref<12x128xf32, #tpu.memory_space<vmem>>, vector<1x128xf32>
    %386 = vector.shape_cast %385 : vector<1x128xf32> to vector<128xf32>
    %387 = vector.shape_cast %386 : vector<128xf32> to vector<1x128xf32>
    %388 = vector.broadcast %387 : vector<1x128xf32> to vector<16x128xf32>
    %389 = arith.addf %384, %388 : vector<16x128xf32>
    %c3_134 = arith.constant 3 : index
    %c0_135 = arith.constant 0 : index
    %c0_136 = arith.constant 0 : index
    %390 = vector.load %arg7[%c3_134, %c0_135, %c0_136] : memref<8x9x128xf32, #tpu.memory_space<vmem>>, vector<1x9x128xf32>
    %391 = vector.shape_cast %390 : vector<1x9x128xf32> to vector<9x128xf32>
    %cst_137 = arith.constant 0.000000e+00 : f32
    %392 = vector.broadcast %cst_137 : f32 to vector<16x128xf32>
    %cst_138 = arith.constant 0.000000e+00 : f32
    %393 = vector.broadcast %cst_138 : f32 to vector<16x128xf32>
    %c1_i32_139 = arith.constant 1 : i32
    %394 = tpu.dynamic_rotate %59 by %c1_i32_139 dim 0 : vector<16x128xf32>, i32 -> vector<16x128xf32>
    %c1_i32_140 = arith.constant 1 : i32
    %395 = vector.broadcast %c1_i32_140 : i32 to vector<16x128xi32>
    %396 = arith.cmpi sge, %1, %395 : vector<16x128xi32>
    %cst_141 = arith.constant 0.000000e+00 : f32
    %397 = vector.broadcast %cst_141 : f32 to vector<16x128xf32>
    %398 = arith.select %396, %394, %397 : vector<16x128xi1>, vector<16x128xf32>
    %399 = vector.extract_strided_slice %391 {offsets = [0, 0], sizes = [1, 128], strides = [1, 1]} : vector<9x128xf32> to vector<1x128xf32>
    %400 = vector.shape_cast %399 : vector<1x128xf32> to vector<128xf32>
    %401 = vector.shape_cast %400 : vector<128xf32> to vector<1x128xf32>
    %402 = vector.broadcast %401 : vector<1x128xf32> to vector<16x128xf32>
    %403 = arith.mulf %398, %402 : vector<16x128xf32>
    %404 = arith.addf %392, %403 : vector<16x128xf32>
    %405 = vector.extract_strided_slice %391 {offsets = [3, 0], sizes = [1, 128], strides = [1, 1]} : vector<9x128xf32> to vector<1x128xf32>
    %406 = vector.shape_cast %405 : vector<1x128xf32> to vector<128xf32>
    %407 = vector.shape_cast %406 : vector<128xf32> to vector<1x128xf32>
    %408 = vector.broadcast %407 : vector<1x128xf32> to vector<16x128xf32>
    %409 = arith.mulf %59, %408 : vector<16x128xf32>
    %410 = arith.addf %393, %409 : vector<16x128xf32>
    %c15_i32_142 = arith.constant 15 : i32
    %411 = tpu.dynamic_rotate %59 by %c15_i32_142 dim 0 : vector<16x128xf32>, i32 -> vector<16x128xf32>
    %c15_i32_143 = arith.constant 15 : i32
    %412 = vector.broadcast %c15_i32_143 : i32 to vector<16x128xi32>
    %413 = arith.cmpi slt, %1, %412 : vector<16x128xi32>
    %cst_144 = arith.constant 0.000000e+00 : f32
    %414 = vector.broadcast %cst_144 : f32 to vector<16x128xf32>
    %415 = arith.select %413, %411, %414 : vector<16x128xi1>, vector<16x128xf32>
    %416 = vector.extract_strided_slice %391 {offsets = [6, 0], sizes = [1, 128], strides = [1, 1]} : vector<9x128xf32> to vector<1x128xf32>
    %417 = vector.shape_cast %416 : vector<1x128xf32> to vector<128xf32>
    %418 = vector.shape_cast %417 : vector<128xf32> to vector<1x128xf32>
    %419 = vector.broadcast %418 : vector<1x128xf32> to vector<16x128xf32>
    %420 = arith.mulf %415, %419 : vector<16x128xf32>
    %421 = arith.addf %404, %420 : vector<16x128xf32>
    %c1_i32_145 = arith.constant 1 : i32
    %422 = tpu.dynamic_rotate %29 by %c1_i32_145 dim 0 : vector<16x128xf32>, i32 -> vector<16x128xf32>
    %c1_i32_146 = arith.constant 1 : i32
    %423 = vector.broadcast %c1_i32_146 : i32 to vector<16x128xi32>
    %424 = arith.cmpi sge, %1, %423 : vector<16x128xi32>
    %cst_147 = arith.constant 0.000000e+00 : f32
    %425 = vector.broadcast %cst_147 : f32 to vector<16x128xf32>
    %426 = arith.select %424, %422, %425 : vector<16x128xi1>, vector<16x128xf32>
    %427 = vector.extract_strided_slice %391 {offsets = [1, 0], sizes = [1, 128], strides = [1, 1]} : vector<9x128xf32> to vector<1x128xf32>
    %428 = vector.shape_cast %427 : vector<1x128xf32> to vector<128xf32>
    %429 = vector.shape_cast %428 : vector<128xf32> to vector<1x128xf32>
    %430 = vector.broadcast %429 : vector<1x128xf32> to vector<16x128xf32>
    %431 = arith.mulf %426, %430 : vector<16x128xf32>
    %432 = arith.addf %410, %431 : vector<16x128xf32>
    %433 = vector.extract_strided_slice %391 {offsets = [4, 0], sizes = [1, 128], strides = [1, 1]} : vector<9x128xf32> to vector<1x128xf32>
    %434 = vector.shape_cast %433 : vector<1x128xf32> to vector<128xf32>
    %435 = vector.shape_cast %434 : vector<128xf32> to vector<1x128xf32>
    %436 = vector.broadcast %435 : vector<1x128xf32> to vector<16x128xf32>
    %437 = arith.mulf %29, %436 : vector<16x128xf32>
    %438 = arith.addf %421, %437 : vector<16x128xf32>
    %c15_i32_148 = arith.constant 15 : i32
    %439 = tpu.dynamic_rotate %29 by %c15_i32_148 dim 0 : vector<16x128xf32>, i32 -> vector<16x128xf32>
    %c15_i32_149 = arith.constant 15 : i32
    %440 = vector.broadcast %c15_i32_149 : i32 to vector<16x128xi32>
    %441 = arith.cmpi slt, %1, %440 : vector<16x128xi32>
    %cst_150 = arith.constant 0.000000e+00 : f32
    %442 = vector.broadcast %cst_150 : f32 to vector<16x128xf32>
    %443 = arith.select %441, %439, %442 : vector<16x128xi1>, vector<16x128xf32>
    %444 = vector.extract_strided_slice %391 {offsets = [7, 0], sizes = [1, 128], strides = [1, 1]} : vector<9x128xf32> to vector<1x128xf32>
    %445 = vector.shape_cast %444 : vector<1x128xf32> to vector<128xf32>
    %446 = vector.shape_cast %445 : vector<128xf32> to vector<1x128xf32>
    %447 = vector.broadcast %446 : vector<1x128xf32> to vector<16x128xf32>
    %448 = arith.mulf %443, %447 : vector<16x128xf32>
    %449 = arith.addf %432, %448 : vector<16x128xf32>
    %c1_i32_151 = arith.constant 1 : i32
    %450 = tpu.dynamic_rotate %64 by %c1_i32_151 dim 0 : vector<16x128xf32>, i32 -> vector<16x128xf32>
    %c1_i32_152 = arith.constant 1 : i32
    %451 = vector.broadcast %c1_i32_152 : i32 to vector<16x128xi32>
    %452 = arith.cmpi sge, %1, %451 : vector<16x128xi32>
    %cst_153 = arith.constant 0.000000e+00 : f32
    %453 = vector.broadcast %cst_153 : f32 to vector<16x128xf32>
    %454 = arith.select %452, %450, %453 : vector<16x128xi1>, vector<16x128xf32>
    %455 = vector.extract_strided_slice %391 {offsets = [2, 0], sizes = [1, 128], strides = [1, 1]} : vector<9x128xf32> to vector<1x128xf32>
    %456 = vector.shape_cast %455 : vector<1x128xf32> to vector<128xf32>
    %457 = vector.shape_cast %456 : vector<128xf32> to vector<1x128xf32>
    %458 = vector.broadcast %457 : vector<1x128xf32> to vector<16x128xf32>
    %459 = arith.mulf %454, %458 : vector<16x128xf32>
    %460 = arith.addf %438, %459 : vector<16x128xf32>
    %461 = vector.extract_strided_slice %391 {offsets = [5, 0], sizes = [1, 128], strides = [1, 1]} : vector<9x128xf32> to vector<1x128xf32>
    %462 = vector.shape_cast %461 : vector<1x128xf32> to vector<128xf32>
    %463 = vector.shape_cast %462 : vector<128xf32> to vector<1x128xf32>
    %464 = vector.broadcast %463 : vector<1x128xf32> to vector<16x128xf32>
    %465 = arith.mulf %64, %464 : vector<16x128xf32>
    %466 = arith.addf %449, %465 : vector<16x128xf32>
    %c15_i32_154 = arith.constant 15 : i32
    %467 = tpu.dynamic_rotate %64 by %c15_i32_154 dim 0 : vector<16x128xf32>, i32 -> vector<16x128xf32>
    %c15_i32_155 = arith.constant 15 : i32
    %468 = vector.broadcast %c15_i32_155 : i32 to vector<16x128xi32>
    %469 = arith.cmpi slt, %1, %468 : vector<16x128xi32>
    %cst_156 = arith.constant 0.000000e+00 : f32
    %470 = vector.broadcast %cst_156 : f32 to vector<16x128xf32>
    %471 = arith.select %469, %467, %470 : vector<16x128xi1>, vector<16x128xf32>
    %472 = vector.extract_strided_slice %391 {offsets = [8, 0], sizes = [1, 128], strides = [1, 1]} : vector<9x128xf32> to vector<1x128xf32>
    %473 = vector.shape_cast %472 : vector<1x128xf32> to vector<128xf32>
    %474 = vector.shape_cast %473 : vector<128xf32> to vector<1x128xf32>
    %475 = vector.broadcast %474 : vector<1x128xf32> to vector<16x128xf32>
    %476 = arith.mulf %471, %475 : vector<16x128xf32>
    %477 = arith.addf %460, %476 : vector<16x128xf32>
    %478 = arith.addf %477, %466 : vector<16x128xf32>
    %c3_157 = arith.constant 3 : index
    %c0_158 = arith.constant 0 : index
    %c0_159 = arith.constant 0 : index
    %479 = vector.load %arg5[%c3_157, %c0_158, %c0_159] : memref<10x128x128xbf16, #tpu.memory_space<vmem>>, vector<1x128x128xbf16>
    %480 = vector.shape_cast %479 : vector<1x128x128xbf16> to vector<128x128xbf16>
    %481 = arith.truncf %478 : vector<16x128xf32> to vector<16x128xbf16>
    %cst_160 = arith.constant dense<0.000000e+00> : vector<16x128xf32>
    %482 = tpu.matmul %481, %480, %cst_160 {dimension_numbers = #tpu.dot_dimension_numbers<[1], [0], [0], [1], [0, 0, 1, 1], [], []>} : vector<16x128xbf16>, vector<128x128xbf16>, vector<16x128xf32> -> vector<16x128xf32>
    %c5 = arith.constant 5 : index
    %c0_161 = arith.constant 0 : index
    %483 = vector.load %arg6[%c5, %c0_161] : memref<12x128xf32, #tpu.memory_space<vmem>>, vector<1x128xf32>
    %484 = vector.shape_cast %483 : vector<1x128xf32> to vector<128xf32>
    %485 = vector.shape_cast %484 : vector<128xf32> to vector<1x128xf32>
    %486 = vector.broadcast %485 : vector<1x128xf32> to vector<16x128xf32>
    %487 = arith.addf %482, %486 : vector<16x128xf32>
    %cst_162 = arith.constant 0.000000e+00 : f32
    %488 = vector.broadcast %cst_162 : f32 to vector<16x128xf32>
    %489 = arith.maximumf %487, %488 : vector<16x128xf32>
    %c8_i32_163 = arith.constant 8 : i32
    %490 = tpu.dynamic_rotate %489 by %c8_i32_163 dim 1 : vector<16x128xf32>, i32 -> vector<16x128xf32>
    %c8_i32_164 = arith.constant 8 : i32
    %491 = vector.broadcast %c8_i32_164 : i32 to vector<16x128xi32>
    %492 = arith.cmpi sge, %0, %491 : vector<16x128xi32>
    %cst_165 = arith.constant 0.000000e+00 : f32
    %493 = vector.broadcast %cst_165 : f32 to vector<16x128xf32>
    %494 = arith.select %492, %490, %493 : vector<16x128xi1>, vector<16x128xf32>
    %c120_i32_166 = arith.constant 120 : i32
    %495 = tpu.dynamic_rotate %489 by %c120_i32_166 dim 1 : vector<16x128xf32>, i32 -> vector<16x128xf32>
    %c120_i32_167 = arith.constant 120 : i32
    %496 = vector.broadcast %c120_i32_167 : i32 to vector<16x128xi32>
    %497 = arith.cmpi slt, %0, %496 : vector<16x128xi32>
    %cst_168 = arith.constant 0.000000e+00 : f32
    %498 = vector.broadcast %cst_168 : f32 to vector<16x128xf32>
    %499 = arith.select %497, %495, %498 : vector<16x128xi1>, vector<16x128xf32>
    %c4_169 = arith.constant 4 : index
    %c0_170 = arith.constant 0 : index
    %c0_171 = arith.constant 0 : index
    %500 = vector.load %arg7[%c4_169, %c0_170, %c0_171] : memref<8x9x128xf32, #tpu.memory_space<vmem>>, vector<1x9x128xf32>
    %501 = vector.shape_cast %500 : vector<1x9x128xf32> to vector<9x128xf32>
    %cst_172 = arith.constant 0.000000e+00 : f32
    %502 = vector.broadcast %cst_172 : f32 to vector<16x128xf32>
    %cst_173 = arith.constant 0.000000e+00 : f32
    %503 = vector.broadcast %cst_173 : f32 to vector<16x128xf32>
    %c1_i32_174 = arith.constant 1 : i32
    %504 = tpu.dynamic_rotate %494 by %c1_i32_174 dim 0 : vector<16x128xf32>, i32 -> vector<16x128xf32>
    %c1_i32_175 = arith.constant 1 : i32
    %505 = vector.broadcast %c1_i32_175 : i32 to vector<16x128xi32>
    %506 = arith.cmpi sge, %1, %505 : vector<16x128xi32>
    %cst_176 = arith.constant 0.000000e+00 : f32
    %507 = vector.broadcast %cst_176 : f32 to vector<16x128xf32>
    %508 = arith.select %506, %504, %507 : vector<16x128xi1>, vector<16x128xf32>
    %509 = vector.extract_strided_slice %501 {offsets = [0, 0], sizes = [1, 128], strides = [1, 1]} : vector<9x128xf32> to vector<1x128xf32>
    %510 = vector.shape_cast %509 : vector<1x128xf32> to vector<128xf32>
    %511 = vector.shape_cast %510 : vector<128xf32> to vector<1x128xf32>
    %512 = vector.broadcast %511 : vector<1x128xf32> to vector<16x128xf32>
    %513 = arith.mulf %508, %512 : vector<16x128xf32>
    %514 = arith.addf %502, %513 : vector<16x128xf32>
    %515 = vector.extract_strided_slice %501 {offsets = [3, 0], sizes = [1, 128], strides = [1, 1]} : vector<9x128xf32> to vector<1x128xf32>
    %516 = vector.shape_cast %515 : vector<1x128xf32> to vector<128xf32>
    %517 = vector.shape_cast %516 : vector<128xf32> to vector<1x128xf32>
    %518 = vector.broadcast %517 : vector<1x128xf32> to vector<16x128xf32>
    %519 = arith.mulf %494, %518 : vector<16x128xf32>
    %520 = arith.addf %503, %519 : vector<16x128xf32>
    %c15_i32_177 = arith.constant 15 : i32
    %521 = tpu.dynamic_rotate %494 by %c15_i32_177 dim 0 : vector<16x128xf32>, i32 -> vector<16x128xf32>
    %c15_i32_178 = arith.constant 15 : i32
    %522 = vector.broadcast %c15_i32_178 : i32 to vector<16x128xi32>
    %523 = arith.cmpi slt, %1, %522 : vector<16x128xi32>
    %cst_179 = arith.constant 0.000000e+00 : f32
    %524 = vector.broadcast %cst_179 : f32 to vector<16x128xf32>
    %525 = arith.select %523, %521, %524 : vector<16x128xi1>, vector<16x128xf32>
    %526 = vector.extract_strided_slice %501 {offsets = [6, 0], sizes = [1, 128], strides = [1, 1]} : vector<9x128xf32> to vector<1x128xf32>
    %527 = vector.shape_cast %526 : vector<1x128xf32> to vector<128xf32>
    %528 = vector.shape_cast %527 : vector<128xf32> to vector<1x128xf32>
    %529 = vector.broadcast %528 : vector<1x128xf32> to vector<16x128xf32>
    %530 = arith.mulf %525, %529 : vector<16x128xf32>
    %531 = arith.addf %514, %530 : vector<16x128xf32>
    %c1_i32_180 = arith.constant 1 : i32
    %532 = tpu.dynamic_rotate %489 by %c1_i32_180 dim 0 : vector<16x128xf32>, i32 -> vector<16x128xf32>
    %c1_i32_181 = arith.constant 1 : i32
    %533 = vector.broadcast %c1_i32_181 : i32 to vector<16x128xi32>
    %534 = arith.cmpi sge, %1, %533 : vector<16x128xi32>
    %cst_182 = arith.constant 0.000000e+00 : f32
    %535 = vector.broadcast %cst_182 : f32 to vector<16x128xf32>
    %536 = arith.select %534, %532, %535 : vector<16x128xi1>, vector<16x128xf32>
    %537 = vector.extract_strided_slice %501 {offsets = [1, 0], sizes = [1, 128], strides = [1, 1]} : vector<9x128xf32> to vector<1x128xf32>
    %538 = vector.shape_cast %537 : vector<1x128xf32> to vector<128xf32>
    %539 = vector.shape_cast %538 : vector<128xf32> to vector<1x128xf32>
    %540 = vector.broadcast %539 : vector<1x128xf32> to vector<16x128xf32>
    %541 = arith.mulf %536, %540 : vector<16x128xf32>
    %542 = arith.addf %520, %541 : vector<16x128xf32>
    %543 = vector.extract_strided_slice %501 {offsets = [4, 0], sizes = [1, 128], strides = [1, 1]} : vector<9x128xf32> to vector<1x128xf32>
    %544 = vector.shape_cast %543 : vector<1x128xf32> to vector<128xf32>
    %545 = vector.shape_cast %544 : vector<128xf32> to vector<1x128xf32>
    %546 = vector.broadcast %545 : vector<1x128xf32> to vector<16x128xf32>
    %547 = arith.mulf %489, %546 : vector<16x128xf32>
    %548 = arith.addf %531, %547 : vector<16x128xf32>
    %c15_i32_183 = arith.constant 15 : i32
    %549 = tpu.dynamic_rotate %489 by %c15_i32_183 dim 0 : vector<16x128xf32>, i32 -> vector<16x128xf32>
    %c15_i32_184 = arith.constant 15 : i32
    %550 = vector.broadcast %c15_i32_184 : i32 to vector<16x128xi32>
    %551 = arith.cmpi slt, %1, %550 : vector<16x128xi32>
    %cst_185 = arith.constant 0.000000e+00 : f32
    %552 = vector.broadcast %cst_185 : f32 to vector<16x128xf32>
    %553 = arith.select %551, %549, %552 : vector<16x128xi1>, vector<16x128xf32>
    %554 = vector.extract_strided_slice %501 {offsets = [7, 0], sizes = [1, 128], strides = [1, 1]} : vector<9x128xf32> to vector<1x128xf32>
    %555 = vector.shape_cast %554 : vector<1x128xf32> to vector<128xf32>
    %556 = vector.shape_cast %555 : vector<128xf32> to vector<1x128xf32>
    %557 = vector.broadcast %556 : vector<1x128xf32> to vector<16x128xf32>
    %558 = arith.mulf %553, %557 : vector<16x128xf32>
    %559 = arith.addf %542, %558 : vector<16x128xf32>
    %c1_i32_186 = arith.constant 1 : i32
    %560 = tpu.dynamic_rotate %499 by %c1_i32_186 dim 0 : vector<16x128xf32>, i32 -> vector<16x128xf32>
    %c1_i32_187 = arith.constant 1 : i32
    %561 = vector.broadcast %c1_i32_187 : i32 to vector<16x128xi32>
    %562 = arith.cmpi sge, %1, %561 : vector<16x128xi32>
    %cst_188 = arith.constant 0.000000e+00 : f32
    %563 = vector.broadcast %cst_188 : f32 to vector<16x128xf32>
    %564 = arith.select %562, %560, %563 : vector<16x128xi1>, vector<16x128xf32>
    %565 = vector.extract_strided_slice %501 {offsets = [2, 0], sizes = [1, 128], strides = [1, 1]} : vector<9x128xf32> to vector<1x128xf32>
    %566 = vector.shape_cast %565 : vector<1x128xf32> to vector<128xf32>
    %567 = vector.shape_cast %566 : vector<128xf32> to vector<1x128xf32>
    %568 = vector.broadcast %567 : vector<1x128xf32> to vector<16x128xf32>
    %569 = arith.mulf %564, %568 : vector<16x128xf32>
    %570 = arith.addf %548, %569 : vector<16x128xf32>
    %571 = vector.extract_strided_slice %501 {offsets = [5, 0], sizes = [1, 128], strides = [1, 1]} : vector<9x128xf32> to vector<1x128xf32>
    %572 = vector.shape_cast %571 : vector<1x128xf32> to vector<128xf32>
    %573 = vector.shape_cast %572 : vector<128xf32> to vector<1x128xf32>
    %574 = vector.broadcast %573 : vector<1x128xf32> to vector<16x128xf32>
    %575 = arith.mulf %499, %574 : vector<16x128xf32>
    %576 = arith.addf %559, %575 : vector<16x128xf32>
    %c15_i32_189 = arith.constant 15 : i32
    %577 = tpu.dynamic_rotate %499 by %c15_i32_189 dim 0 : vector<16x128xf32>, i32 -> vector<16x128xf32>
    %c15_i32_190 = arith.constant 15 : i32
    %578 = vector.broadcast %c15_i32_190 : i32 to vector<16x128xi32>
    %579 = arith.cmpi slt, %1, %578 : vector<16x128xi32>
    %cst_191 = arith.constant 0.000000e+00 : f32
    %580 = vector.broadcast %cst_191 : f32 to vector<16x128xf32>
    %581 = arith.select %579, %577, %580 : vector<16x128xi1>, vector<16x128xf32>
    %582 = vector.extract_strided_slice %501 {offsets = [8, 0], sizes = [1, 128], strides = [1, 1]} : vector<9x128xf32> to vector<1x128xf32>
    %583 = vector.shape_cast %582 : vector<1x128xf32> to vector<128xf32>
    %584 = vector.shape_cast %583 : vector<128xf32> to vector<1x128xf32>
    %585 = vector.broadcast %584 : vector<1x128xf32> to vector<16x128xf32>
    %586 = arith.mulf %581, %585 : vector<16x128xf32>
    %587 = arith.addf %570, %586 : vector<16x128xf32>
    %588 = arith.addf %587, %576 : vector<16x128xf32>
    %c4_192 = arith.constant 4 : index
    %c0_193 = arith.constant 0 : index
    %c0_194 = arith.constant 0 : index
    %589 = vector.load %arg5[%c4_192, %c0_193, %c0_194] : memref<10x128x128xbf16, #tpu.memory_space<vmem>>, vector<1x128x128xbf16>
    %590 = vector.shape_cast %589 : vector<1x128x128xbf16> to vector<128x128xbf16>
    %591 = arith.truncf %588 : vector<16x128xf32> to vector<16x128xbf16>
    %cst_195 = arith.constant dense<0.000000e+00> : vector<16x128xf32>
    %592 = tpu.matmul %591, %590, %cst_195 {dimension_numbers = #tpu.dot_dimension_numbers<[1], [0], [0], [1], [0, 0, 1, 1], [], []>} : vector<16x128xbf16>, vector<128x128xbf16>, vector<16x128xf32> -> vector<16x128xf32>
    %c6 = arith.constant 6 : index
    %c0_196 = arith.constant 0 : index
    %593 = vector.load %arg6[%c6, %c0_196] : memref<12x128xf32, #tpu.memory_space<vmem>>, vector<1x128xf32>
    %594 = vector.shape_cast %593 : vector<1x128xf32> to vector<128xf32>
    %595 = vector.shape_cast %594 : vector<128xf32> to vector<1x128xf32>
    %596 = vector.broadcast %595 : vector<1x128xf32> to vector<16x128xf32>
    %597 = arith.addf %592, %596 : vector<16x128xf32>
    %598 = arith.addf %389, %597 : vector<16x128xf32>
    %c1_197 = arith.constant 1 : index
    %c0_198 = arith.constant 0 : index
    %c0_199 = arith.constant 0 : index
    %c0_200 = arith.constant 0 : index
    %599 = vector.load %arg10[%c1_197, %c0_198, %c0_199, %c0_200] : memref<4x1x16x128xf32, #tpu.memory_space<vmem>>, vector<1x1x16x128xf32>
    %600 = vector.shape_cast %599 : vector<1x1x16x128xf32> to vector<16x128xf32>
    %601 = vector.shape_cast %598 : vector<16x128xf32> to vector<1x1x16x128xf32>
    tpu.vector_store %arg10[%c1_197, %c0_198, %c0_199, %c0_200], %601 {strides = array<i32>} : memref<4x1x16x128xf32, #tpu.memory_space<vmem>>, vector<1x1x16x128xf32>,
    %c5_201 = arith.constant 5 : index
    %c0_202 = arith.constant 0 : index
    %c0_203 = arith.constant 0 : index
    %602 = vector.load %arg7[%c5_201, %c0_202, %c0_203] : memref<8x9x128xf32, #tpu.memory_space<vmem>>, vector<1x9x128xf32>
    %603 = vector.shape_cast %602 : vector<1x9x128xf32> to vector<9x128xf32>
    %cst_204 = arith.constant 0.000000e+00 : f32
    %604 = vector.broadcast %cst_204 : f32 to vector<16x128xf32>
    %cst_205 = arith.constant 0.000000e+00 : f32
    %605 = vector.broadcast %cst_205 : f32 to vector<16x128xf32>
    %c1_i32_206 = arith.constant 1 : i32
    %606 = tpu.dynamic_rotate %39 by %c1_i32_206 dim 0 : vector<16x128xf32>, i32 -> vector<16x128xf32>
    %c1_i32_207 = arith.constant 1 : i32
    %607 = vector.broadcast %c1_i32_207 : i32 to vector<16x128xi32>
    %608 = arith.cmpi sge, %1, %607 : vector<16x128xi32>
    %cst_208 = arith.constant 0.000000e+00 : f32
    %609 = vector.broadcast %cst_208 : f32 to vector<16x128xf32>
    %610 = arith.select %608, %606, %609 : vector<16x128xi1>, vector<16x128xf32>
    %611 = vector.extract_strided_slice %603 {offsets = [0, 0], sizes = [1, 128], strides = [1, 1]} : vector<9x128xf32> to vector<1x128xf32>
    %612 = vector.shape_cast %611 : vector<1x128xf32> to vector<128xf32>
    %613 = vector.shape_cast %612 : vector<128xf32> to vector<1x128xf32>
    %614 = vector.broadcast %613 : vector<1x128xf32> to vector<16x128xf32>
    %615 = arith.mulf %610, %614 : vector<16x128xf32>
    %616 = arith.addf %604, %615 : vector<16x128xf32>
    %617 = vector.extract_strided_slice %603 {offsets = [3, 0], sizes = [1, 128], strides = [1, 1]} : vector<9x128xf32> to vector<1x128xf32>
    %618 = vector.shape_cast %617 : vector<1x128xf32> to vector<128xf32>
    %619 = vector.shape_cast %618 : vector<128xf32> to vector<1x128xf32>
    %620 = vector.broadcast %619 : vector<1x128xf32> to vector<16x128xf32>
    %621 = arith.mulf %39, %620 : vector<16x128xf32>
    %622 = arith.addf %605, %621 : vector<16x128xf32>
    %c15_i32_209 = arith.constant 15 : i32
    %623 = tpu.dynamic_rotate %39 by %c15_i32_209 dim 0 : vector<16x128xf32>, i32 -> vector<16x128xf32>
    %c15_i32_210 = arith.constant 15 : i32
    %624 = vector.broadcast %c15_i32_210 : i32 to vector<16x128xi32>
    %625 = arith.cmpi slt, %1, %624 : vector<16x128xi32>
    %cst_211 = arith.constant 0.000000e+00 : f32
    %626 = vector.broadcast %cst_211 : f32 to vector<16x128xf32>
    %627 = arith.select %625, %623, %626 : vector<16x128xi1>, vector<16x128xf32>
    %628 = vector.extract_strided_slice %603 {offsets = [6, 0], sizes = [1, 128], strides = [1, 1]} : vector<9x128xf32> to vector<1x128xf32>
    %629 = vector.shape_cast %628 : vector<1x128xf32> to vector<128xf32>
    %630 = vector.shape_cast %629 : vector<128xf32> to vector<1x128xf32>
    %631 = vector.broadcast %630 : vector<1x128xf32> to vector<16x128xf32>
    %632 = arith.mulf %627, %631 : vector<16x128xf32>
    %633 = arith.addf %616, %632 : vector<16x128xf32>
    %c1_i32_212 = arith.constant 1 : i32
    %634 = tpu.dynamic_rotate %27 by %c1_i32_212 dim 0 : vector<16x128xf32>, i32 -> vector<16x128xf32>
    %c1_i32_213 = arith.constant 1 : i32
    %635 = vector.broadcast %c1_i32_213 : i32 to vector<16x128xi32>
    %636 = arith.cmpi sge, %1, %635 : vector<16x128xi32>
    %cst_214 = arith.constant 0.000000e+00 : f32
    %637 = vector.broadcast %cst_214 : f32 to vector<16x128xf32>
    %638 = arith.select %636, %634, %637 : vector<16x128xi1>, vector<16x128xf32>
    %639 = vector.extract_strided_slice %603 {offsets = [1, 0], sizes = [1, 128], strides = [1, 1]} : vector<9x128xf32> to vector<1x128xf32>
    %640 = vector.shape_cast %639 : vector<1x128xf32> to vector<128xf32>
    %641 = vector.shape_cast %640 : vector<128xf32> to vector<1x128xf32>
    %642 = vector.broadcast %641 : vector<1x128xf32> to vector<16x128xf32>
    %643 = arith.mulf %638, %642 : vector<16x128xf32>
    %644 = arith.addf %622, %643 : vector<16x128xf32>
    %645 = vector.extract_strided_slice %603 {offsets = [4, 0], sizes = [1, 128], strides = [1, 1]} : vector<9x128xf32> to vector<1x128xf32>
    %646 = vector.shape_cast %645 : vector<1x128xf32> to vector<128xf32>
    %647 = vector.shape_cast %646 : vector<128xf32> to vector<1x128xf32>
    %648 = vector.broadcast %647 : vector<1x128xf32> to vector<16x128xf32>
    %649 = arith.mulf %27, %648 : vector<16x128xf32>
    %650 = arith.addf %633, %649 : vector<16x128xf32>
    %c15_i32_215 = arith.constant 15 : i32
    %651 = tpu.dynamic_rotate %27 by %c15_i32_215 dim 0 : vector<16x128xf32>, i32 -> vector<16x128xf32>
    %c15_i32_216 = arith.constant 15 : i32
    %652 = vector.broadcast %c15_i32_216 : i32 to vector<16x128xi32>
    %653 = arith.cmpi slt, %1, %652 : vector<16x128xi32>
    %cst_217 = arith.constant 0.000000e+00 : f32
    %654 = vector.broadcast %cst_217 : f32 to vector<16x128xf32>
    %655 = arith.select %653, %651, %654 : vector<16x128xi1>, vector<16x128xf32>
    %656 = vector.extract_strided_slice %603 {offsets = [7, 0], sizes = [1, 128], strides = [1, 1]} : vector<9x128xf32> to vector<1x128xf32>
    %657 = vector.shape_cast %656 : vector<1x128xf32> to vector<128xf32>
    %658 = vector.shape_cast %657 : vector<128xf32> to vector<1x128xf32>
    %659 = vector.broadcast %658 : vector<1x128xf32> to vector<16x128xf32>
    %660 = arith.mulf %655, %659 : vector<16x128xf32>
    %661 = arith.addf %644, %660 : vector<16x128xf32>
    %c1_i32_218 = arith.constant 1 : i32
    %662 = tpu.dynamic_rotate %44 by %c1_i32_218 dim 0 : vector<16x128xf32>, i32 -> vector<16x128xf32>
    %c1_i32_219 = arith.constant 1 : i32
    %663 = vector.broadcast %c1_i32_219 : i32 to vector<16x128xi32>
    %664 = arith.cmpi sge, %1, %663 : vector<16x128xi32>
    %cst_220 = arith.constant 0.000000e+00 : f32
    %665 = vector.broadcast %cst_220 : f32 to vector<16x128xf32>
    %666 = arith.select %664, %662, %665 : vector<16x128xi1>, vector<16x128xf32>
    %667 = vector.extract_strided_slice %603 {offsets = [2, 0], sizes = [1, 128], strides = [1, 1]} : vector<9x128xf32> to vector<1x128xf32>
    %668 = vector.shape_cast %667 : vector<1x128xf32> to vector<128xf32>
    %669 = vector.shape_cast %668 : vector<128xf32> to vector<1x128xf32>
    %670 = vector.broadcast %669 : vector<1x128xf32> to vector<16x128xf32>
    %671 = arith.mulf %666, %670 : vector<16x128xf32>
    %672 = arith.addf %650, %671 : vector<16x128xf32>
    %673 = vector.extract_strided_slice %603 {offsets = [5, 0], sizes = [1, 128], strides = [1, 1]} : vector<9x128xf32> to vector<1x128xf32>
    %674 = vector.shape_cast %673 : vector<1x128xf32> to vector<128xf32>
    %675 = vector.shape_cast %674 : vector<128xf32> to vector<1x128xf32>
    %676 = vector.broadcast %675 : vector<1x128xf32> to vector<16x128xf32>
    %677 = arith.mulf %44, %676 : vector<16x128xf32>
    %678 = arith.addf %661, %677 : vector<16x128xf32>
    %c15_i32_221 = arith.constant 15 : i32
    %679 = tpu.dynamic_rotate %44 by %c15_i32_221 dim 0 : vector<16x128xf32>, i32 -> vector<16x128xf32>
    %c15_i32_222 = arith.constant 15 : i32
    %680 = vector.broadcast %c15_i32_222 : i32 to vector<16x128xi32>
    %681 = arith.cmpi slt, %1, %680 : vector<16x128xi32>
    %cst_223 = arith.constant 0.000000e+00 : f32
    %682 = vector.broadcast %cst_223 : f32 to vector<16x128xf32>
    %683 = arith.select %681, %679, %682 : vector<16x128xi1>, vector<16x128xf32>
    %684 = vector.extract_strided_slice %603 {offsets = [8, 0], sizes = [1, 128], strides = [1, 1]} : vector<9x128xf32> to vector<1x128xf32>
    %685 = vector.shape_cast %684 : vector<1x128xf32> to vector<128xf32>
    %686 = vector.shape_cast %685 : vector<128xf32> to vector<1x128xf32>
    %687 = vector.broadcast %686 : vector<1x128xf32> to vector<16x128xf32>
    %688 = arith.mulf %683, %687 : vector<16x128xf32>
    %689 = arith.addf %672, %688 : vector<16x128xf32>
    %690 = arith.addf %689, %678 : vector<16x128xf32>
    %c5_224 = arith.constant 5 : index
    %c0_225 = arith.constant 0 : index
    %c0_226 = arith.constant 0 : index
    %691 = vector.load %arg5[%c5_224, %c0_225, %c0_226] : memref<10x128x128xbf16, #tpu.memory_space<vmem>>, vector<1x128x128xbf16>
    %692 = vector.shape_cast %691 : vector<1x128x128xbf16> to vector<128x128xbf16>
    %693 = arith.truncf %690 : vector<16x128xf32> to vector<16x128xbf16>
    %cst_227 = arith.constant dense<0.000000e+00> : vector<16x128xf32>
    %694 = tpu.matmul %693, %692, %cst_227 {dimension_numbers = #tpu.dot_dimension_numbers<[1], [0], [0], [1], [0, 0, 1, 1], [], []>} : vector<16x128xbf16>, vector<128x128xbf16>, vector<16x128xf32> -> vector<16x128xf32>
    %c7 = arith.constant 7 : index
    %c0_228 = arith.constant 0 : index
    %695 = vector.load %arg6[%c7, %c0_228] : memref<12x128xf32, #tpu.memory_space<vmem>>, vector<1x128xf32>
    %696 = vector.shape_cast %695 : vector<1x128xf32> to vector<128xf32>
    %697 = vector.shape_cast %696 : vector<128xf32> to vector<1x128xf32>
    %698 = vector.broadcast %697 : vector<1x128xf32> to vector<16x128xf32>
    %699 = arith.addf %694, %698 : vector<16x128xf32>
    %cst_229 = arith.constant 0.000000e+00 : f32
    %700 = vector.broadcast %cst_229 : f32 to vector<16x128xf32>
    %701 = arith.maximumf %699, %700 : vector<16x128xf32>
    %c8_i32_230 = arith.constant 8 : i32
    %702 = tpu.dynamic_rotate %701 by %c8_i32_230 dim 1 : vector<16x128xf32>, i32 -> vector<16x128xf32>
    %c8_i32_231 = arith.constant 8 : i32
    %703 = vector.broadcast %c8_i32_231 : i32 to vector<16x128xi32>
    %704 = arith.cmpi sge, %0, %703 : vector<16x128xi32>
    %cst_232 = arith.constant 0.000000e+00 : f32
    %705 = vector.broadcast %cst_232 : f32 to vector<16x128xf32>
    %706 = arith.select %704, %702, %705 : vector<16x128xi1>, vector<16x128xf32>
    %c120_i32_233 = arith.constant 120 : i32
    %707 = tpu.dynamic_rotate %701 by %c120_i32_233 dim 1 : vector<16x128xf32>, i32 -> vector<16x128xf32>
    %c120_i32_234 = arith.constant 120 : i32
    %708 = vector.broadcast %c120_i32_234 : i32 to vector<16x128xi32>
    %709 = arith.cmpi slt, %0, %708 : vector<16x128xi32>
    %cst_235 = arith.constant 0.000000e+00 : f32
    %710 = vector.broadcast %cst_235 : f32 to vector<16x128xf32>
    %711 = arith.select %709, %707, %710 : vector<16x128xi1>, vector<16x128xf32>
    %c6_236 = arith.constant 6 : index
    %c0_237 = arith.constant 0 : index
    %c0_238 = arith.constant 0 : index
    %712 = vector.load %arg7[%c6_236, %c0_237, %c0_238] : memref<8x9x128xf32, #tpu.memory_space<vmem>>, vector<1x9x128xf32>
    %713 = vector.shape_cast %712 : vector<1x9x128xf32> to vector<9x128xf32>
    %cst_239 = arith.constant 0.000000e+00 : f32
    %714 = vector.broadcast %cst_239 : f32 to vector<16x128xf32>
    %cst_240 = arith.constant 0.000000e+00 : f32
    %715 = vector.broadcast %cst_240 : f32 to vector<16x128xf32>
    %c1_i32_241 = arith.constant 1 : i32
    %716 = tpu.dynamic_rotate %706 by %c1_i32_241 dim 0 : vector<16x128xf32>, i32 -> vector<16x128xf32>
    %c1_i32_242 = arith.constant 1 : i32
    %717 = vector.broadcast %c1_i32_242 : i32 to vector<16x128xi32>
    %718 = arith.cmpi sge, %1, %717 : vector<16x128xi32>
    %cst_243 = arith.constant 0.000000e+00 : f32
    %719 = vector.broadcast %cst_243 : f32 to vector<16x128xf32>
    %720 = arith.select %718, %716, %719 : vector<16x128xi1>, vector<16x128xf32>
    %721 = vector.extract_strided_slice %713 {offsets = [0, 0], sizes = [1, 128], strides = [1, 1]} : vector<9x128xf32> to vector<1x128xf32>
    %722 = vector.shape_cast %721 : vector<1x128xf32> to vector<128xf32>
    %723 = vector.shape_cast %722 : vector<128xf32> to vector<1x128xf32>
    %724 = vector.broadcast %723 : vector<1x128xf32> to vector<16x128xf32>
    %725 = arith.mulf %720, %724 : vector<16x128xf32>
    %726 = arith.addf %714, %725 : vector<16x128xf32>
    %727 = vector.extract_strided_slice %713 {offsets = [3, 0], sizes = [1, 128], strides = [1, 1]} : vector<9x128xf32> to vector<1x128xf32>
    %728 = vector.shape_cast %727 : vector<1x128xf32> to vector<128xf32>
    %729 = vector.shape_cast %728 : vector<128xf32> to vector<1x128xf32>
    %730 = vector.broadcast %729 : vector<1x128xf32> to vector<16x128xf32>
    %731 = arith.mulf %706, %730 : vector<16x128xf32>
    %732 = arith.addf %715, %731 : vector<16x128xf32>
    %c15_i32_244 = arith.constant 15 : i32
    %733 = tpu.dynamic_rotate %706 by %c15_i32_244 dim 0 : vector<16x128xf32>, i32 -> vector<16x128xf32>
    %c15_i32_245 = arith.constant 15 : i32
    %734 = vector.broadcast %c15_i32_245 : i32 to vector<16x128xi32>
    %735 = arith.cmpi slt, %1, %734 : vector<16x128xi32>
    %cst_246 = arith.constant 0.000000e+00 : f32
    %736 = vector.broadcast %cst_246 : f32 to vector<16x128xf32>
    %737 = arith.select %735, %733, %736 : vector<16x128xi1>, vector<16x128xf32>
    %738 = vector.extract_strided_slice %713 {offsets = [6, 0], sizes = [1, 128], strides = [1, 1]} : vector<9x128xf32> to vector<1x128xf32>
    %739 = vector.shape_cast %738 : vector<1x128xf32> to vector<128xf32>
    %740 = vector.shape_cast %739 : vector<128xf32> to vector<1x128xf32>
    %741 = vector.broadcast %740 : vector<1x128xf32> to vector<16x128xf32>
    %742 = arith.mulf %737, %741 : vector<16x128xf32>
    %743 = arith.addf %726, %742 : vector<16x128xf32>
    %c1_i32_247 = arith.constant 1 : i32
    %744 = tpu.dynamic_rotate %701 by %c1_i32_247 dim 0 : vector<16x128xf32>, i32 -> vector<16x128xf32>
    %c1_i32_248 = arith.constant 1 : i32
    %745 = vector.broadcast %c1_i32_248 : i32 to vector<16x128xi32>
    %746 = arith.cmpi sge, %1, %745 : vector<16x128xi32>
    %cst_249 = arith.constant 0.000000e+00 : f32
    %747 = vector.broadcast %cst_249 : f32 to vector<16x128xf32>
    %748 = arith.select %746, %744, %747 : vector<16x128xi1>, vector<16x128xf32>
    %749 = vector.extract_strided_slice %713 {offsets = [1, 0], sizes = [1, 128], strides = [1, 1]} : vector<9x128xf32> to vector<1x128xf32>
    %750 = vector.shape_cast %749 : vector<1x128xf32> to vector<128xf32>
    %751 = vector.shape_cast %750 : vector<128xf32> to vector<1x128xf32>
    %752 = vector.broadcast %751 : vector<1x128xf32> to vector<16x128xf32>
    %753 = arith.mulf %748, %752 : vector<16x128xf32>
    %754 = arith.addf %732, %753 : vector<16x128xf32>
    %755 = vector.extract_strided_slice %713 {offsets = [4, 0], sizes = [1, 128], strides = [1, 1]} : vector<9x128xf32> to vector<1x128xf32>
    %756 = vector.shape_cast %755 : vector<1x128xf32> to vector<128xf32>
    %757 = vector.shape_cast %756 : vector<128xf32> to vector<1x128xf32>
    %758 = vector.broadcast %757 : vector<1x128xf32> to vector<16x128xf32>
    %759 = arith.mulf %701, %758 : vector<16x128xf32>
    %760 = arith.addf %743, %759 : vector<16x128xf32>
    %c15_i32_250 = arith.constant 15 : i32
    %761 = tpu.dynamic_rotate %701 by %c15_i32_250 dim 0 : vector<16x128xf32>, i32 -> vector<16x128xf32>
    %c15_i32_251 = arith.constant 15 : i32
    %762 = vector.broadcast %c15_i32_251 : i32 to vector<16x128xi32>
    %763 = arith.cmpi slt, %1, %762 : vector<16x128xi32>
    %cst_252 = arith.constant 0.000000e+00 : f32
    %764 = vector.broadcast %cst_252 : f32 to vector<16x128xf32>
    %765 = arith.select %763, %761, %764 : vector<16x128xi1>, vector<16x128xf32>
    %766 = vector.extract_strided_slice %713 {offsets = [7, 0], sizes = [1, 128], strides = [1, 1]} : vector<9x128xf32> to vector<1x128xf32>
    %767 = vector.shape_cast %766 : vector<1x128xf32> to vector<128xf32>
    %768 = vector.shape_cast %767 : vector<128xf32> to vector<1x128xf32>
    %769 = vector.broadcast %768 : vector<1x128xf32> to vector<16x128xf32>
    %770 = arith.mulf %765, %769 : vector<16x128xf32>
    %771 = arith.addf %754, %770 : vector<16x128xf32>
    %c1_i32_253 = arith.constant 1 : i32
    %772 = tpu.dynamic_rotate %711 by %c1_i32_253 dim 0 : vector<16x128xf32>, i32 -> vector<16x128xf32>
    %c1_i32_254 = arith.constant 1 : i32
    %773 = vector.broadcast %c1_i32_254 : i32 to vector<16x128xi32>
    %774 = arith.cmpi sge, %1, %773 : vector<16x128xi32>
    %cst_255 = arith.constant 0.000000e+00 : f32
    %775 = vector.broadcast %cst_255 : f32 to vector<16x128xf32>
    %776 = arith.select %774, %772, %775 : vector<16x128xi1>, vector<16x128xf32>
    %777 = vector.extract_strided_slice %713 {offsets = [2, 0], sizes = [1, 128], strides = [1, 1]} : vector<9x128xf32> to vector<1x128xf32>
    %778 = vector.shape_cast %777 : vector<1x128xf32> to vector<128xf32>
    %779 = vector.shape_cast %778 : vector<128xf32> to vector<1x128xf32>
    %780 = vector.broadcast %779 : vector<1x128xf32> to vector<16x128xf32>
    %781 = arith.mulf %776, %780 : vector<16x128xf32>
    %782 = arith.addf %760, %781 : vector<16x128xf32>
    %783 = vector.extract_strided_slice %713 {offsets = [5, 0], sizes = [1, 128], strides = [1, 1]} : vector<9x128xf32> to vector<1x128xf32>
    %784 = vector.shape_cast %783 : vector<1x128xf32> to vector<128xf32>
    %785 = vector.shape_cast %784 : vector<128xf32> to vector<1x128xf32>
    %786 = vector.broadcast %785 : vector<1x128xf32> to vector<16x128xf32>
    %787 = arith.mulf %711, %786 : vector<16x128xf32>
    %788 = arith.addf %771, %787 : vector<16x128xf32>
    %c15_i32_256 = arith.constant 15 : i32
    %789 = tpu.dynamic_rotate %711 by %c15_i32_256 dim 0 : vector<16x128xf32>, i32 -> vector<16x128xf32>
    %c15_i32_257 = arith.constant 15 : i32
    %790 = vector.broadcast %c15_i32_257 : i32 to vector<16x128xi32>
    %791 = arith.cmpi slt, %1, %790 : vector<16x128xi32>
    %cst_258 = arith.constant 0.000000e+00 : f32
    %792 = vector.broadcast %cst_258 : f32 to vector<16x128xf32>
    %793 = arith.select %791, %789, %792 : vector<16x128xi1>, vector<16x128xf32>
    %794 = vector.extract_strided_slice %713 {offsets = [8, 0], sizes = [1, 128], strides = [1, 1]} : vector<9x128xf32> to vector<1x128xf32>
    %795 = vector.shape_cast %794 : vector<1x128xf32> to vector<128xf32>
    %796 = vector.shape_cast %795 : vector<128xf32> to vector<1x128xf32>
    %797 = vector.broadcast %796 : vector<1x128xf32> to vector<16x128xf32>
    %798 = arith.mulf %793, %797 : vector<16x128xf32>
    %799 = arith.addf %782, %798 : vector<16x128xf32>
    %800 = arith.addf %799, %788 : vector<16x128xf32>
    %c6_259 = arith.constant 6 : index
    %c0_260 = arith.constant 0 : index
    %c0_261 = arith.constant 0 : index
    %801 = vector.load %arg5[%c6_259, %c0_260, %c0_261] : memref<10x128x128xbf16, #tpu.memory_space<vmem>>, vector<1x128x128xbf16>
    %802 = vector.shape_cast %801 : vector<1x128x128xbf16> to vector<128x128xbf16>
    %803 = arith.truncf %800 : vector<16x128xf32> to vector<16x128xbf16>
    %cst_262 = arith.constant dense<0.000000e+00> : vector<16x128xf32>
    %804 = tpu.matmul %803, %802, %cst_262 {dimension_numbers = #tpu.dot_dimension_numbers<[1], [0], [0], [1], [0, 0, 1, 1], [], []>} : vector<16x128xbf16>, vector<128x128xbf16>, vector<16x128xf32> -> vector<16x128xf32>
    %c8 = arith.constant 8 : index
    %c0_263 = arith.constant 0 : index
    %805 = vector.load %arg6[%c8, %c0_263] : memref<12x128xf32, #tpu.memory_space<vmem>>, vector<1x128xf32>
    %806 = vector.shape_cast %805 : vector<1x128xf32> to vector<128xf32>
    %807 = vector.shape_cast %806 : vector<128xf32> to vector<1x128xf32>
    %808 = vector.broadcast %807 : vector<1x128xf32> to vector<16x128xf32>
    %809 = arith.addf %804, %808 : vector<16x128xf32>
    %c0_264 = arith.constant 0 : index
    %c0_265 = arith.constant 0 : index
    %c0_266 = arith.constant 0 : index
    %810 = vector.load %arg8[%c0_264, %c0_265, %c0_266] : memref<2x25x128xf32, #tpu.memory_space<vmem>>, vector<1x25x128xf32>
    %811 = vector.shape_cast %810 : vector<1x25x128xf32> to vector<25x128xf32>
    %cst_267 = arith.constant 0.000000e+00 : f32
    %812 = vector.broadcast %cst_267 : f32 to vector<16x128xf32>
    %cst_268 = arith.constant 0.000000e+00 : f32
    %813 = vector.broadcast %cst_268 : f32 to vector<16x128xf32>
    %c2_i32_269 = arith.constant 2 : i32
    %814 = tpu.dynamic_rotate %54 by %c2_i32_269 dim 0 : vector<16x128xf32>, i32 -> vector<16x128xf32>
    %c2_i32_270 = arith.constant 2 : i32
    %815 = vector.broadcast %c2_i32_270 : i32 to vector<16x128xi32>
    %816 = arith.cmpi sge, %1, %815 : vector<16x128xi32>
    %cst_271 = arith.constant 0.000000e+00 : f32
    %817 = vector.broadcast %cst_271 : f32 to vector<16x128xf32>
    %818 = arith.select %816, %814, %817 : vector<16x128xi1>, vector<16x128xf32>
    %819 = vector.extract_strided_slice %811 {offsets = [0, 0], sizes = [1, 128], strides = [1, 1]} : vector<25x128xf32> to vector<1x128xf32>
    %820 = vector.shape_cast %819 : vector<1x128xf32> to vector<128xf32>
    %821 = vector.shape_cast %820 : vector<128xf32> to vector<1x128xf32>
    %822 = vector.broadcast %821 : vector<1x128xf32> to vector<16x128xf32>
    %823 = arith.mulf %818, %822 : vector<16x128xf32>
    %824 = arith.addf %812, %823 : vector<16x128xf32>
    %c1_i32_272 = arith.constant 1 : i32
    %825 = tpu.dynamic_rotate %54 by %c1_i32_272 dim 0 : vector<16x128xf32>, i32 -> vector<16x128xf32>
    %c1_i32_273 = arith.constant 1 : i32
    %826 = vector.broadcast %c1_i32_273 : i32 to vector<16x128xi32>
    %827 = arith.cmpi sge, %1, %826 : vector<16x128xi32>
    %cst_274 = arith.constant 0.000000e+00 : f32
    %828 = vector.broadcast %cst_274 : f32 to vector<16x128xf32>
    %829 = arith.select %827, %825, %828 : vector<16x128xi1>, vector<16x128xf32>
    %830 = vector.extract_strided_slice %811 {offsets = [5, 0], sizes = [1, 128], strides = [1, 1]} : vector<25x128xf32> to vector<1x128xf32>
    %831 = vector.shape_cast %830 : vector<1x128xf32> to vector<128xf32>
    %832 = vector.shape_cast %831 : vector<128xf32> to vector<1x128xf32>
    %833 = vector.broadcast %832 : vector<1x128xf32> to vector<16x128xf32>
    %834 = arith.mulf %829, %833 : vector<16x128xf32>
    %835 = arith.addf %813, %834 : vector<16x128xf32>
    %836 = vector.extract_strided_slice %811 {offsets = [10, 0], sizes = [1, 128], strides = [1, 1]} : vector<25x128xf32> to vector<1x128xf32>
    %837 = vector.shape_cast %836 : vector<1x128xf32> to vector<128xf32>
    %838 = vector.shape_cast %837 : vector<128xf32> to vector<1x128xf32>
    %839 = vector.broadcast %838 : vector<1x128xf32> to vector<16x128xf32>
    %840 = arith.mulf %54, %839 : vector<16x128xf32>
    %841 = arith.addf %824, %840 : vector<16x128xf32>
    %c15_i32_275 = arith.constant 15 : i32
    %842 = tpu.dynamic_rotate %54 by %c15_i32_275 dim 0 : vector<16x128xf32>, i32 -> vector<16x128xf32>
    %c15_i32_276 = arith.constant 15 : i32
    %843 = vector.broadcast %c15_i32_276 : i32 to vector<16x128xi32>
    %844 = arith.cmpi slt, %1, %843 : vector<16x128xi32>
    %cst_277 = arith.constant 0.000000e+00 : f32
    %845 = vector.broadcast %cst_277 : f32 to vector<16x128xf32>
    %846 = arith.select %844, %842, %845 : vector<16x128xi1>, vector<16x128xf32>
    %847 = vector.extract_strided_slice %811 {offsets = [15, 0], sizes = [1, 128], strides = [1, 1]} : vector<25x128xf32> to vector<1x128xf32>
    %848 = vector.shape_cast %847 : vector<1x128xf32> to vector<128xf32>
    %849 = vector.shape_cast %848 : vector<128xf32> to vector<1x128xf32>
    %850 = vector.broadcast %849 : vector<1x128xf32> to vector<16x128xf32>
    %851 = arith.mulf %846, %850 : vector<16x128xf32>
    %852 = arith.addf %835, %851 : vector<16x128xf32>
    %c14_i32_278 = arith.constant 14 : i32
    %853 = tpu.dynamic_rotate %54 by %c14_i32_278 dim 0 : vector<16x128xf32>, i32 -> vector<16x128xf32>
    %c14_i32_279 = arith.constant 14 : i32
    %854 = vector.broadcast %c14_i32_279 : i32 to vector<16x128xi32>
    %855 = arith.cmpi slt, %1, %854 : vector<16x128xi32>
    %cst_280 = arith.constant 0.000000e+00 : f32
    %856 = vector.broadcast %cst_280 : f32 to vector<16x128xf32>
    %857 = arith.select %855, %853, %856 : vector<16x128xi1>, vector<16x128xf32>
    %858 = vector.extract_strided_slice %811 {offsets = [20, 0], sizes = [1, 128], strides = [1, 1]} : vector<25x128xf32> to vector<1x128xf32>
    %859 = vector.shape_cast %858 : vector<1x128xf32> to vector<128xf32>
    %860 = vector.shape_cast %859 : vector<128xf32> to vector<1x128xf32>
    %861 = vector.broadcast %860 : vector<1x128xf32> to vector<16x128xf32>
    %862 = arith.mulf %857, %861 : vector<16x128xf32>
    %863 = arith.addf %841, %862 : vector<16x128xf32>
    %c2_i32_281 = arith.constant 2 : i32
    %864 = tpu.dynamic_rotate %59 by %c2_i32_281 dim 0 : vector<16x128xf32>, i32 -> vector<16x128xf32>
    %c2_i32_282 = arith.constant 2 : i32
    %865 = vector.broadcast %c2_i32_282 : i32 to vector<16x128xi32>
    %866 = arith.cmpi sge, %1, %865 : vector<16x128xi32>
    %cst_283 = arith.constant 0.000000e+00 : f32
    %867 = vector.broadcast %cst_283 : f32 to vector<16x128xf32>
    %868 = arith.select %866, %864, %867 : vector<16x128xi1>, vector<16x128xf32>
    %869 = vector.extract_strided_slice %811 {offsets = [1, 0], sizes = [1, 128], strides = [1, 1]} : vector<25x128xf32> to vector<1x128xf32>
    %870 = vector.shape_cast %869 : vector<1x128xf32> to vector<128xf32>
    %871 = vector.shape_cast %870 : vector<128xf32> to vector<1x128xf32>
    %872 = vector.broadcast %871 : vector<1x128xf32> to vector<16x128xf32>
    %873 = arith.mulf %868, %872 : vector<16x128xf32>
    %874 = arith.addf %852, %873 : vector<16x128xf32>
    %c1_i32_284 = arith.constant 1 : i32
    %875 = tpu.dynamic_rotate %59 by %c1_i32_284 dim 0 : vector<16x128xf32>, i32 -> vector<16x128xf32>
    %c1_i32_285 = arith.constant 1 : i32
    %876 = vector.broadcast %c1_i32_285 : i32 to vector<16x128xi32>
    %877 = arith.cmpi sge, %1, %876 : vector<16x128xi32>
    %cst_286 = arith.constant 0.000000e+00 : f32
    %878 = vector.broadcast %cst_286 : f32 to vector<16x128xf32>
    %879 = arith.select %877, %875, %878 : vector<16x128xi1>, vector<16x128xf32>
    %880 = vector.extract_strided_slice %811 {offsets = [6, 0], sizes = [1, 128], strides = [1, 1]} : vector<25x128xf32> to vector<1x128xf32>
    %881 = vector.shape_cast %880 : vector<1x128xf32> to vector<128xf32>
    %882 = vector.shape_cast %881 : vector<128xf32> to vector<1x128xf32>
    %883 = vector.broadcast %882 : vector<1x128xf32> to vector<16x128xf32>
    %884 = arith.mulf %879, %883 : vector<16x128xf32>
    %885 = arith.addf %863, %884 : vector<16x128xf32>
    %886 = vector.extract_strided_slice %811 {offsets = [11, 0], sizes = [1, 128], strides = [1, 1]} : vector<25x128xf32> to vector<1x128xf32>
    %887 = vector.shape_cast %886 : vector<1x128xf32> to vector<128xf32>
    %888 = vector.shape_cast %887 : vector<128xf32> to vector<1x128xf32>
    %889 = vector.broadcast %888 : vector<1x128xf32> to vector<16x128xf32>
    %890 = arith.mulf %59, %889 : vector<16x128xf32>
    %891 = arith.addf %874, %890 : vector<16x128xf32>
    %c15_i32_287 = arith.constant 15 : i32
    %892 = tpu.dynamic_rotate %59 by %c15_i32_287 dim 0 : vector<16x128xf32>, i32 -> vector<16x128xf32>
    %c15_i32_288 = arith.constant 15 : i32
    %893 = vector.broadcast %c15_i32_288 : i32 to vector<16x128xi32>
    %894 = arith.cmpi slt, %1, %893 : vector<16x128xi32>
    %cst_289 = arith.constant 0.000000e+00 : f32
    %895 = vector.broadcast %cst_289 : f32 to vector<16x128xf32>
    %896 = arith.select %894, %892, %895 : vector<16x128xi1>, vector<16x128xf32>
    %897 = vector.extract_strided_slice %811 {offsets = [16, 0], sizes = [1, 128], strides = [1, 1]} : vector<25x128xf32> to vector<1x128xf32>
    %898 = vector.shape_cast %897 : vector<1x128xf32> to vector<128xf32>
    %899 = vector.shape_cast %898 : vector<128xf32> to vector<1x128xf32>
    %900 = vector.broadcast %899 : vector<1x128xf32> to vector<16x128xf32>
    %901 = arith.mulf %896, %900 : vector<16x128xf32>
    %902 = arith.addf %885, %901 : vector<16x128xf32>
    %c14_i32_290 = arith.constant 14 : i32
    %903 = tpu.dynamic_rotate %59 by %c14_i32_290 dim 0 : vector<16x128xf32>, i32 -> vector<16x128xf32>
    %c14_i32_291 = arith.constant 14 : i32
    %904 = vector.broadcast %c14_i32_291 : i32 to vector<16x128xi32>
    %905 = arith.cmpi slt, %1, %904 : vector<16x128xi32>
    %cst_292 = arith.constant 0.000000e+00 : f32
    %906 = vector.broadcast %cst_292 : f32 to vector<16x128xf32>
    %907 = arith.select %905, %903, %906 : vector<16x128xi1>, vector<16x128xf32>
    %908 = vector.extract_strided_slice %811 {offsets = [21, 0], sizes = [1, 128], strides = [1, 1]} : vector<25x128xf32> to vector<1x128xf32>
    %909 = vector.shape_cast %908 : vector<1x128xf32> to vector<128xf32>
    %910 = vector.shape_cast %909 : vector<128xf32> to vector<1x128xf32>
    %911 = vector.broadcast %910 : vector<1x128xf32> to vector<16x128xf32>
    %912 = arith.mulf %907, %911 : vector<16x128xf32>
    %913 = arith.addf %891, %912 : vector<16x128xf32>
    %c2_i32_293 = arith.constant 2 : i32
    %914 = tpu.dynamic_rotate %29 by %c2_i32_293 dim 0 : vector<16x128xf32>, i32 -> vector<16x128xf32>
    %c2_i32_294 = arith.constant 2 : i32
    %915 = vector.broadcast %c2_i32_294 : i32 to vector<16x128xi32>
    %916 = arith.cmpi sge, %1, %915 : vector<16x128xi32>
    %cst_295 = arith.constant 0.000000e+00 : f32
    %917 = vector.broadcast %cst_295 : f32 to vector<16x128xf32>
    %918 = arith.select %916, %914, %917 : vector<16x128xi1>, vector<16x128xf32>
    %919 = vector.extract_strided_slice %811 {offsets = [2, 0], sizes = [1, 128], strides = [1, 1]} : vector<25x128xf32> to vector<1x128xf32>
    %920 = vector.shape_cast %919 : vector<1x128xf32> to vector<128xf32>
    %921 = vector.shape_cast %920 : vector<128xf32> to vector<1x128xf32>
    %922 = vector.broadcast %921 : vector<1x128xf32> to vector<16x128xf32>
    %923 = arith.mulf %918, %922 : vector<16x128xf32>
    %924 = arith.addf %902, %923 : vector<16x128xf32>
    %c1_i32_296 = arith.constant 1 : i32
    %925 = tpu.dynamic_rotate %29 by %c1_i32_296 dim 0 : vector<16x128xf32>, i32 -> vector<16x128xf32>
    %c1_i32_297 = arith.constant 1 : i32
    %926 = vector.broadcast %c1_i32_297 : i32 to vector<16x128xi32>
    %927 = arith.cmpi sge, %1, %926 : vector<16x128xi32>
    %cst_298 = arith.constant 0.000000e+00 : f32
    %928 = vector.broadcast %cst_298 : f32 to vector<16x128xf32>
    %929 = arith.select %927, %925, %928 : vector<16x128xi1>, vector<16x128xf32>
    %930 = vector.extract_strided_slice %811 {offsets = [7, 0], sizes = [1, 128], strides = [1, 1]} : vector<25x128xf32> to vector<1x128xf32>
    %931 = vector.shape_cast %930 : vector<1x128xf32> to vector<128xf32>
    %932 = vector.shape_cast %931 : vector<128xf32> to vector<1x128xf32>
    %933 = vector.broadcast %932 : vector<1x128xf32> to vector<16x128xf32>
    %934 = arith.mulf %929, %933 : vector<16x128xf32>
    %935 = arith.addf %913, %934 : vector<16x128xf32>
    %936 = vector.extract_strided_slice %811 {offsets = [12, 0], sizes = [1, 128], strides = [1, 1]} : vector<25x128xf32> to vector<1x128xf32>
    %937 = vector.shape_cast %936 : vector<1x128xf32> to vector<128xf32>
    %938 = vector.shape_cast %937 : vector<128xf32> to vector<1x128xf32>
    %939 = vector.broadcast %938 : vector<1x128xf32> to vector<16x128xf32>
    %940 = arith.mulf %29, %939 : vector<16x128xf32>
    %941 = arith.addf %924, %940 : vector<16x128xf32>
    %c15_i32_299 = arith.constant 15 : i32
    %942 = tpu.dynamic_rotate %29 by %c15_i32_299 dim 0 : vector<16x128xf32>, i32 -> vector<16x128xf32>
    %c15_i32_300 = arith.constant 15 : i32
    %943 = vector.broadcast %c15_i32_300 : i32 to vector<16x128xi32>
    %944 = arith.cmpi slt, %1, %943 : vector<16x128xi32>
    %cst_301 = arith.constant 0.000000e+00 : f32
    %945 = vector.broadcast %cst_301 : f32 to vector<16x128xf32>
    %946 = arith.select %944, %942, %945 : vector<16x128xi1>, vector<16x128xf32>
    %947 = vector.extract_strided_slice %811 {offsets = [17, 0], sizes = [1, 128], strides = [1, 1]} : vector<25x128xf32> to vector<1x128xf32>
    %948 = vector.shape_cast %947 : vector<1x128xf32> to vector<128xf32>
    %949 = vector.shape_cast %948 : vector<128xf32> to vector<1x128xf32>
    %950 = vector.broadcast %949 : vector<1x128xf32> to vector<16x128xf32>
    %951 = arith.mulf %946, %950 : vector<16x128xf32>
    %952 = arith.addf %935, %951 : vector<16x128xf32>
    %c14_i32_302 = arith.constant 14 : i32
    %953 = tpu.dynamic_rotate %29 by %c14_i32_302 dim 0 : vector<16x128xf32>, i32 -> vector<16x128xf32>
    %c14_i32_303 = arith.constant 14 : i32
    %954 = vector.broadcast %c14_i32_303 : i32 to vector<16x128xi32>
    %955 = arith.cmpi slt, %1, %954 : vector<16x128xi32>
    %cst_304 = arith.constant 0.000000e+00 : f32
    %956 = vector.broadcast %cst_304 : f32 to vector<16x128xf32>
    %957 = arith.select %955, %953, %956 : vector<16x128xi1>, vector<16x128xf32>
    %958 = vector.extract_strided_slice %811 {offsets = [22, 0], sizes = [1, 128], strides = [1, 1]} : vector<25x128xf32> to vector<1x128xf32>
    %959 = vector.shape_cast %958 : vector<1x128xf32> to vector<128xf32>
    %960 = vector.shape_cast %959 : vector<128xf32> to vector<1x128xf32>
    %961 = vector.broadcast %960 : vector<1x128xf32> to vector<16x128xf32>
    %962 = arith.mulf %957, %961 : vector<16x128xf32>
    %963 = arith.addf %941, %962 : vector<16x128xf32>
    %c2_i32_305 = arith.constant 2 : i32
    %964 = tpu.dynamic_rotate %64 by %c2_i32_305 dim 0 : vector<16x128xf32>, i32 -> vector<16x128xf32>
    %c2_i32_306 = arith.constant 2 : i32
    %965 = vector.broadcast %c2_i32_306 : i32 to vector<16x128xi32>
    %966 = arith.cmpi sge, %1, %965 : vector<16x128xi32>
    %cst_307 = arith.constant 0.000000e+00 : f32
    %967 = vector.broadcast %cst_307 : f32 to vector<16x128xf32>
    %968 = arith.select %966, %964, %967 : vector<16x128xi1>, vector<16x128xf32>
    %969 = vector.extract_strided_slice %811 {offsets = [3, 0], sizes = [1, 128], strides = [1, 1]} : vector<25x128xf32> to vector<1x128xf32>
    %970 = vector.shape_cast %969 : vector<1x128xf32> to vector<128xf32>
    %971 = vector.shape_cast %970 : vector<128xf32> to vector<1x128xf32>
    %972 = vector.broadcast %971 : vector<1x128xf32> to vector<16x128xf32>
    %973 = arith.mulf %968, %972 : vector<16x128xf32>
    %974 = arith.addf %952, %973 : vector<16x128xf32>
    %c1_i32_308 = arith.constant 1 : i32
    %975 = tpu.dynamic_rotate %64 by %c1_i32_308 dim 0 : vector<16x128xf32>, i32 -> vector<16x128xf32>
    %c1_i32_309 = arith.constant 1 : i32
    %976 = vector.broadcast %c1_i32_309 : i32 to vector<16x128xi32>
    %977 = arith.cmpi sge, %1, %976 : vector<16x128xi32>
    %cst_310 = arith.constant 0.000000e+00 : f32
    %978 = vector.broadcast %cst_310 : f32 to vector<16x128xf32>
    %979 = arith.select %977, %975, %978 : vector<16x128xi1>, vector<16x128xf32>
    %980 = vector.extract_strided_slice %811 {offsets = [8, 0], sizes = [1, 128], strides = [1, 1]} : vector<25x128xf32> to vector<1x128xf32>
    %981 = vector.shape_cast %980 : vector<1x128xf32> to vector<128xf32>
    %982 = vector.shape_cast %981 : vector<128xf32> to vector<1x128xf32>
    %983 = vector.broadcast %982 : vector<1x128xf32> to vector<16x128xf32>
    %984 = arith.mulf %979, %983 : vector<16x128xf32>
    %985 = arith.addf %963, %984 : vector<16x128xf32>
    %986 = vector.extract_strided_slice %811 {offsets = [13, 0], sizes = [1, 128], strides = [1, 1]} : vector<25x128xf32> to vector<1x128xf32>
    %987 = vector.shape_cast %986 : vector<1x128xf32> to vector<128xf32>
    %988 = vector.shape_cast %987 : vector<128xf32> to vector<1x128xf32>
    %989 = vector.broadcast %988 : vector<1x128xf32> to vector<16x128xf32>
    %990 = arith.mulf %64, %989 : vector<16x128xf32>
    %991 = arith.addf %974, %990 : vector<16x128xf32>
    %c15_i32_311 = arith.constant 15 : i32
    %992 = tpu.dynamic_rotate %64 by %c15_i32_311 dim 0 : vector<16x128xf32>, i32 -> vector<16x128xf32>
    %c15_i32_312 = arith.constant 15 : i32
    %993 = vector.broadcast %c15_i32_312 : i32 to vector<16x128xi32>
    %994 = arith.cmpi slt, %1, %993 : vector<16x128xi32>
    %cst_313 = arith.constant 0.000000e+00 : f32
    %995 = vector.broadcast %cst_313 : f32 to vector<16x128xf32>
    %996 = arith.select %994, %992, %995 : vector<16x128xi1>, vector<16x128xf32>
    %997 = vector.extract_strided_slice %811 {offsets = [18, 0], sizes = [1, 128], strides = [1, 1]} : vector<25x128xf32> to vector<1x128xf32>
    %998 = vector.shape_cast %997 : vector<1x128xf32> to vector<128xf32>
    %999 = vector.shape_cast %998 : vector<128xf32> to vector<1x128xf32>
    %1000 = vector.broadcast %999 : vector<1x128xf32> to vector<16x128xf32>
    %1001 = arith.mulf %996, %1000 : vector<16x128xf32>
    %1002 = arith.addf %985, %1001 : vector<16x128xf32>
    %c14_i32_314 = arith.constant 14 : i32
    %1003 = tpu.dynamic_rotate %64 by %c14_i32_314 dim 0 : vector<16x128xf32>, i32 -> vector<16x128xf32>
    %c14_i32_315 = arith.constant 14 : i32
    %1004 = vector.broadcast %c14_i32_315 : i32 to vector<16x128xi32>
    %1005 = arith.cmpi slt, %1, %1004 : vector<16x128xi32>
    %cst_316 = arith.constant 0.000000e+00 : f32
    %1006 = vector.broadcast %cst_316 : f32 to vector<16x128xf32>
    %1007 = arith.select %1005, %1003, %1006 : vector<16x128xi1>, vector<16x128xf32>
    %1008 = vector.extract_strided_slice %811 {offsets = [23, 0], sizes = [1, 128], strides = [1, 1]} : vector<25x128xf32> to vector<1x128xf32>
    %1009 = vector.shape_cast %1008 : vector<1x128xf32> to vector<128xf32>
    %1010 = vector.shape_cast %1009 : vector<128xf32> to vector<1x128xf32>
    %1011 = vector.broadcast %1010 : vector<1x128xf32> to vector<16x128xf32>
    %1012 = arith.mulf %1007, %1011 : vector<16x128xf32>
    %1013 = arith.addf %991, %1012 : vector<16x128xf32>
    %c2_i32_317 = arith.constant 2 : i32
    %1014 = tpu.dynamic_rotate %69 by %c2_i32_317 dim 0 : vector<16x128xf32>, i32 -> vector<16x128xf32>
    %c2_i32_318 = arith.constant 2 : i32
    %1015 = vector.broadcast %c2_i32_318 : i32 to vector<16x128xi32>
    %1016 = arith.cmpi sge, %1, %1015 : vector<16x128xi32>
    %cst_319 = arith.constant 0.000000e+00 : f32
    %1017 = vector.broadcast %cst_319 : f32 to vector<16x128xf32>
    %1018 = arith.select %1016, %1014, %1017 : vector<16x128xi1>, vector<16x128xf32>
    %1019 = vector.extract_strided_slice %811 {offsets = [4, 0], sizes = [1, 128], strides = [1, 1]} : vector<25x128xf32> to vector<1x128xf32>
    %1020 = vector.shape_cast %1019 : vector<1x128xf32> to vector<128xf32>
    %1021 = vector.shape_cast %1020 : vector<128xf32> to vector<1x128xf32>
    %1022 = vector.broadcast %1021 : vector<1x128xf32> to vector<16x128xf32>
    %1023 = arith.mulf %1018, %1022 : vector<16x128xf32>
    %1024 = arith.addf %1002, %1023 : vector<16x128xf32>
    %c1_i32_320 = arith.constant 1 : i32
    %1025 = tpu.dynamic_rotate %69 by %c1_i32_320 dim 0 : vector<16x128xf32>, i32 -> vector<16x128xf32>
    %c1_i32_321 = arith.constant 1 : i32
    %1026 = vector.broadcast %c1_i32_321 : i32 to vector<16x128xi32>
    %1027 = arith.cmpi sge, %1, %1026 : vector<16x128xi32>
    %cst_322 = arith.constant 0.000000e+00 : f32
    %1028 = vector.broadcast %cst_322 : f32 to vector<16x128xf32>
    %1029 = arith.select %1027, %1025, %1028 : vector<16x128xi1>, vector<16x128xf32>
    %1030 = vector.extract_strided_slice %811 {offsets = [9, 0], sizes = [1, 128], strides = [1, 1]} : vector<25x128xf32> to vector<1x128xf32>
    %1031 = vector.shape_cast %1030 : vector<1x128xf32> to vector<128xf32>
    %1032 = vector.shape_cast %1031 : vector<128xf32> to vector<1x128xf32>
    %1033 = vector.broadcast %1032 : vector<1x128xf32> to vector<16x128xf32>
    %1034 = arith.mulf %1029, %1033 : vector<16x128xf32>
    %1035 = arith.addf %1013, %1034 : vector<16x128xf32>
    %1036 = vector.extract_strided_slice %811 {offsets = [14, 0], sizes = [1, 128], strides = [1, 1]} : vector<25x128xf32> to vector<1x128xf32>
    %1037 = vector.shape_cast %1036 : vector<1x128xf32> to vector<128xf32>
    %1038 = vector.shape_cast %1037 : vector<128xf32> to vector<1x128xf32>
    %1039 = vector.broadcast %1038 : vector<1x128xf32> to vector<16x128xf32>
    %1040 = arith.mulf %69, %1039 : vector<16x128xf32>
    %1041 = arith.addf %1024, %1040 : vector<16x128xf32>
    %c15_i32_323 = arith.constant 15 : i32
    %1042 = tpu.dynamic_rotate %69 by %c15_i32_323 dim 0 : vector<16x128xf32>, i32 -> vector<16x128xf32>
    %c15_i32_324 = arith.constant 15 : i32
    %1043 = vector.broadcast %c15_i32_324 : i32 to vector<16x128xi32>
    %1044 = arith.cmpi slt, %1, %1043 : vector<16x128xi32>
    %cst_325 = arith.constant 0.000000e+00 : f32
    %1045 = vector.broadcast %cst_325 : f32 to vector<16x128xf32>
    %1046 = arith.select %1044, %1042, %1045 : vector<16x128xi1>, vector<16x128xf32>
    %1047 = vector.extract_strided_slice %811 {offsets = [19, 0], sizes = [1, 128], strides = [1, 1]} : vector<25x128xf32> to vector<1x128xf32>
    %1048 = vector.shape_cast %1047 : vector<1x128xf32> to vector<128xf32>
    %1049 = vector.shape_cast %1048 : vector<128xf32> to vector<1x128xf32>
    %1050 = vector.broadcast %1049 : vector<1x128xf32> to vector<16x128xf32>
    %1051 = arith.mulf %1046, %1050 : vector<16x128xf32>
    %1052 = arith.addf %1035, %1051 : vector<16x128xf32>
    %c14_i32_326 = arith.constant 14 : i32
    %1053 = tpu.dynamic_rotate %69 by %c14_i32_326 dim 0 : vector<16x128xf32>, i32 -> vector<16x128xf32>
    %c14_i32_327 = arith.constant 14 : i32
    %1054 = vector.broadcast %c14_i32_327 : i32 to vector<16x128xi32>
    %1055 = arith.cmpi slt, %1, %1054 : vector<16x128xi32>
    %cst_328 = arith.constant 0.000000e+00 : f32
    %1056 = vector.broadcast %cst_328 : f32 to vector<16x128xf32>
    %1057 = arith.select %1055, %1053, %1056 : vector<16x128xi1>, vector<16x128xf32>
    %1058 = vector.extract_strided_slice %811 {offsets = [24, 0], sizes = [1, 128], strides = [1, 1]} : vector<25x128xf32> to vector<1x128xf32>
    %1059 = vector.shape_cast %1058 : vector<1x128xf32> to vector<128xf32>
    %1060 = vector.shape_cast %1059 : vector<128xf32> to vector<1x128xf32>
    %1061 = vector.broadcast %1060 : vector<1x128xf32> to vector<16x128xf32>
    %1062 = arith.mulf %1057, %1061 : vector<16x128xf32>
    %1063 = arith.addf %1041, %1062 : vector<16x128xf32>
    %1064 = arith.addf %1063, %1052 : vector<16x128xf32>
    %c7_329 = arith.constant 7 : index
    %c0_330 = arith.constant 0 : index
    %c0_331 = arith.constant 0 : index
    %1065 = vector.load %arg5[%c7_329, %c0_330, %c0_331] : memref<10x128x128xbf16, #tpu.memory_space<vmem>>, vector<1x128x128xbf16>
    %1066 = vector.shape_cast %1065 : vector<1x128x128xbf16> to vector<128x128xbf16>
    %1067 = arith.truncf %1064 : vector<16x128xf32> to vector<16x128xbf16>
    %cst_332 = arith.constant dense<0.000000e+00> : vector<16x128xf32>
    %1068 = tpu.matmul %1067, %1066, %cst_332 {dimension_numbers = #tpu.dot_dimension_numbers<[1], [0], [0], [1], [0, 0, 1, 1], [], []>} : vector<16x128xbf16>, vector<128x128xbf16>, vector<16x128xf32> -> vector<16x128xf32>
    %c9 = arith.constant 9 : index
    %c0_333 = arith.constant 0 : index
    %1069 = vector.load %arg6[%c9, %c0_333] : memref<12x128xf32, #tpu.memory_space<vmem>>, vector<1x128xf32>
    %1070 = vector.shape_cast %1069 : vector<1x128xf32> to vector<128xf32>
    %1071 = vector.shape_cast %1070 : vector<128xf32> to vector<1x128xf32>
    %1072 = vector.broadcast %1071 : vector<1x128xf32> to vector<16x128xf32>
    %1073 = arith.addf %1068, %1072 : vector<16x128xf32>
    %cst_334 = arith.constant 0.000000e+00 : f32
    %1074 = vector.broadcast %cst_334 : f32 to vector<16x128xf32>
    %1075 = arith.maximumf %1073, %1074 : vector<16x128xf32>
    %c16_i32_335 = arith.constant 16 : i32
    %1076 = tpu.dynamic_rotate %1075 by %c16_i32_335 dim 1 : vector<16x128xf32>, i32 -> vector<16x128xf32>
    %c16_i32_336 = arith.constant 16 : i32
    %1077 = vector.broadcast %c16_i32_336 : i32 to vector<16x128xi32>
    %1078 = arith.cmpi sge, %0, %1077 : vector<16x128xi32>
    %cst_337 = arith.constant 0.000000e+00 : f32
    %1079 = vector.broadcast %cst_337 : f32 to vector<16x128xf32>
    %1080 = arith.select %1078, %1076, %1079 : vector<16x128xi1>, vector<16x128xf32>
    %c8_i32_338 = arith.constant 8 : i32
    %1081 = tpu.dynamic_rotate %1075 by %c8_i32_338 dim 1 : vector<16x128xf32>, i32 -> vector<16x128xf32>
    %c8_i32_339 = arith.constant 8 : i32
    %1082 = vector.broadcast %c8_i32_339 : i32 to vector<16x128xi32>
    %1083 = arith.cmpi sge, %0, %1082 : vector<16x128xi32>
    %cst_340 = arith.constant 0.000000e+00 : f32
    %1084 = vector.broadcast %cst_340 : f32 to vector<16x128xf32>
    %1085 = arith.select %1083, %1081, %1084 : vector<16x128xi1>, vector<16x128xf32>
    %c120_i32_341 = arith.constant 120 : i32
    %1086 = tpu.dynamic_rotate %1075 by %c120_i32_341 dim 1 : vector<16x128xf32>, i32 -> vector<16x128xf32>
    %c120_i32_342 = arith.constant 120 : i32
    %1087 = vector.broadcast %c120_i32_342 : i32 to vector<16x128xi32>
    %1088 = arith.cmpi slt, %0, %1087 : vector<16x128xi32>
    %cst_343 = arith.constant 0.000000e+00 : f32
    %1089 = vector.broadcast %cst_343 : f32 to vector<16x128xf32>
    %1090 = arith.select %1088, %1086, %1089 : vector<16x128xi1>, vector<16x128xf32>
    %c112_i32_344 = arith.constant 112 : i32
    %1091 = tpu.dynamic_rotate %1075 by %c112_i32_344 dim 1 : vector<16x128xf32>, i32 -> vector<16x128xf32>
    %c112_i32_345 = arith.constant 112 : i32
    %1092 = vector.broadcast %c112_i32_345 : i32 to vector<16x128xi32>
    %1093 = arith.cmpi slt, %0, %1092 : vector<16x128xi32>
    %cst_346 = arith.constant 0.000000e+00 : f32
    %1094 = vector.broadcast %cst_346 : f32 to vector<16x128xf32>
    %1095 = arith.select %1093, %1091, %1094 : vector<16x128xi1>, vector<16x128xf32>
    %c1_347 = arith.constant 1 : index
    %c0_348 = arith.constant 0 : index
    %c0_349 = arith.constant 0 : index
    %1096 = vector.load %arg8[%c1_347, %c0_348, %c0_349] : memref<2x25x128xf32, #tpu.memory_space<vmem>>, vector<1x25x128xf32>
    %1097 = vector.shape_cast %1096 : vector<1x25x128xf32> to vector<25x128xf32>
    %cst_350 = arith.constant 0.000000e+00 : f32
    %1098 = vector.broadcast %cst_350 : f32 to vector<16x128xf32>
    %cst_351 = arith.constant 0.000000e+00 : f32
    %1099 = vector.broadcast %cst_351 : f32 to vector<16x128xf32>
    %c2_i32_352 = arith.constant 2 : i32
    %1100 = tpu.dynamic_rotate %1080 by %c2_i32_352 dim 0 : vector<16x128xf32>, i32 -> vector<16x128xf32>
    %c2_i32_353 = arith.constant 2 : i32
    %1101 = vector.broadcast %c2_i32_353 : i32 to vector<16x128xi32>
    %1102 = arith.cmpi sge, %1, %1101 : vector<16x128xi32>
    %cst_354 = arith.constant 0.000000e+00 : f32
    %1103 = vector.broadcast %cst_354 : f32 to vector<16x128xf32>
    %1104 = arith.select %1102, %1100, %1103 : vector<16x128xi1>, vector<16x128xf32>
    %1105 = vector.extract_strided_slice %1097 {offsets = [0, 0], sizes = [1, 128], strides = [1, 1]} : vector<25x128xf32> to vector<1x128xf32>
    %1106 = vector.shape_cast %1105 : vector<1x128xf32> to vector<128xf32>
    %1107 = vector.shape_cast %1106 : vector<128xf32> to vector<1x128xf32>
    %1108 = vector.broadcast %1107 : vector<1x128xf32> to vector<16x128xf32>
    %1109 = arith.mulf %1104, %1108 : vector<16x128xf32>
    %1110 = arith.addf %1098, %1109 : vector<16x128xf32>
    %c1_i32_355 = arith.constant 1 : i32
    %1111 = tpu.dynamic_rotate %1080 by %c1_i32_355 dim 0 : vector<16x128xf32>, i32 -> vector<16x128xf32>
    %c1_i32_356 = arith.constant 1 : i32
    %1112 = vector.broadcast %c1_i32_356 : i32 to vector<16x128xi32>
    %1113 = arith.cmpi sge, %1, %1112 : vector<16x128xi32>
    %cst_357 = arith.constant 0.000000e+00 : f32
    %1114 = vector.broadcast %cst_357 : f32 to vector<16x128xf32>
    %1115 = arith.select %1113, %1111, %1114 : vector<16x128xi1>, vector<16x128xf32>
    %1116 = vector.extract_strided_slice %1097 {offsets = [5, 0], sizes = [1, 128], strides = [1, 1]} : vector<25x128xf32> to vector<1x128xf32>
    %1117 = vector.shape_cast %1116 : vector<1x128xf32> to vector<128xf32>
    %1118 = vector.shape_cast %1117 : vector<128xf32> to vector<1x128xf32>
    %1119 = vector.broadcast %1118 : vector<1x128xf32> to vector<16x128xf32>
    %1120 = arith.mulf %1115, %1119 : vector<16x128xf32>
    %1121 = arith.addf %1099, %1120 : vector<16x128xf32>
    %1122 = vector.extract_strided_slice %1097 {offsets = [10, 0], sizes = [1, 128], strides = [1, 1]} : vector<25x128xf32> to vector<1x128xf32>
    %1123 = vector.shape_cast %1122 : vector<1x128xf32> to vector<128xf32>
    %1124 = vector.shape_cast %1123 : vector<128xf32> to vector<1x128xf32>
    %1125 = vector.broadcast %1124 : vector<1x128xf32> to vector<16x128xf32>
    %1126 = arith.mulf %1080, %1125 : vector<16x128xf32>
    %1127 = arith.addf %1110, %1126 : vector<16x128xf32>
    %c15_i32_358 = arith.constant 15 : i32
    %1128 = tpu.dynamic_rotate %1080 by %c15_i32_358 dim 0 : vector<16x128xf32>, i32 -> vector<16x128xf32>
    %c15_i32_359 = arith.constant 15 : i32
    %1129 = vector.broadcast %c15_i32_359 : i32 to vector<16x128xi32>
    %1130 = arith.cmpi slt, %1, %1129 : vector<16x128xi32>
    %cst_360 = arith.constant 0.000000e+00 : f32
    %1131 = vector.broadcast %cst_360 : f32 to vector<16x128xf32>
    %1132 = arith.select %1130, %1128, %1131 : vector<16x128xi1>, vector<16x128xf32>
    %1133 = vector.extract_strided_slice %1097 {offsets = [15, 0], sizes = [1, 128], strides = [1, 1]} : vector<25x128xf32> to vector<1x128xf32>
    %1134 = vector.shape_cast %1133 : vector<1x128xf32> to vector<128xf32>
    %1135 = vector.shape_cast %1134 : vector<128xf32> to vector<1x128xf32>
    %1136 = vector.broadcast %1135 : vector<1x128xf32> to vector<16x128xf32>
    %1137 = arith.mulf %1132, %1136 : vector<16x128xf32>
    %1138 = arith.addf %1121, %1137 : vector<16x128xf32>
    %c14_i32_361 = arith.constant 14 : i32
    %1139 = tpu.dynamic_rotate %1080 by %c14_i32_361 dim 0 : vector<16x128xf32>, i32 -> vector<16x128xf32>
    %c14_i32_362 = arith.constant 14 : i32
    %1140 = vector.broadcast %c14_i32_362 : i32 to vector<16x128xi32>
    %1141 = arith.cmpi slt, %1, %1140 : vector<16x128xi32>
    %cst_363 = arith.constant 0.000000e+00 : f32
    %1142 = vector.broadcast %cst_363 : f32 to vector<16x128xf32>
    %1143 = arith.select %1141, %1139, %1142 : vector<16x128xi1>, vector<16x128xf32>
    %1144 = vector.extract_strided_slice %1097 {offsets = [20, 0], sizes = [1, 128], strides = [1, 1]} : vector<25x128xf32> to vector<1x128xf32>
    %1145 = vector.shape_cast %1144 : vector<1x128xf32> to vector<128xf32>
    %1146 = vector.shape_cast %1145 : vector<128xf32> to vector<1x128xf32>
    %1147 = vector.broadcast %1146 : vector<1x128xf32> to vector<16x128xf32>
    %1148 = arith.mulf %1143, %1147 : vector<16x128xf32>
    %1149 = arith.addf %1127, %1148 : vector<16x128xf32>
    %c2_i32_364 = arith.constant 2 : i32
    %1150 = tpu.dynamic_rotate %1085 by %c2_i32_364 dim 0 : vector<16x128xf32>, i32 -> vector<16x128xf32>
    %c2_i32_365 = arith.constant 2 : i32
    %1151 = vector.broadcast %c2_i32_365 : i32 to vector<16x128xi32>
    %1152 = arith.cmpi sge, %1, %1151 : vector<16x128xi32>
    %cst_366 = arith.constant 0.000000e+00 : f32
    %1153 = vector.broadcast %cst_366 : f32 to vector<16x128xf32>
    %1154 = arith.select %1152, %1150, %1153 : vector<16x128xi1>, vector<16x128xf32>
    %1155 = vector.extract_strided_slice %1097 {offsets = [1, 0], sizes = [1, 128], strides = [1, 1]} : vector<25x128xf32> to vector<1x128xf32>
    %1156 = vector.shape_cast %1155 : vector<1x128xf32> to vector<128xf32>
    %1157 = vector.shape_cast %1156 : vector<128xf32> to vector<1x128xf32>
    %1158 = vector.broadcast %1157 : vector<1x128xf32> to vector<16x128xf32>
    %1159 = arith.mulf %1154, %1158 : vector<16x128xf32>
    %1160 = arith.addf %1138, %1159 : vector<16x128xf32>
    %c1_i32_367 = arith.constant 1 : i32
    %1161 = tpu.dynamic_rotate %1085 by %c1_i32_367 dim 0 : vector<16x128xf32>, i32 -> vector<16x128xf32>
    %c1_i32_368 = arith.constant 1 : i32
    %1162 = vector.broadcast %c1_i32_368 : i32 to vector<16x128xi32>
    %1163 = arith.cmpi sge, %1, %1162 : vector<16x128xi32>
    %cst_369 = arith.constant 0.000000e+00 : f32
    %1164 = vector.broadcast %cst_369 : f32 to vector<16x128xf32>
    %1165 = arith.select %1163, %1161, %1164 : vector<16x128xi1>, vector<16x128xf32>
    %1166 = vector.extract_strided_slice %1097 {offsets = [6, 0], sizes = [1, 128], strides = [1, 1]} : vector<25x128xf32> to vector<1x128xf32>
    %1167 = vector.shape_cast %1166 : vector<1x128xf32> to vector<128xf32>
    %1168 = vector.shape_cast %1167 : vector<128xf32> to vector<1x128xf32>
    %1169 = vector.broadcast %1168 : vector<1x128xf32> to vector<16x128xf32>
    %1170 = arith.mulf %1165, %1169 : vector<16x128xf32>
    %1171 = arith.addf %1149, %1170 : vector<16x128xf32>
    %1172 = vector.extract_strided_slice %1097 {offsets = [11, 0], sizes = [1, 128], strides = [1, 1]} : vector<25x128xf32> to vector<1x128xf32>
    %1173 = vector.shape_cast %1172 : vector<1x128xf32> to vector<128xf32>
    %1174 = vector.shape_cast %1173 : vector<128xf32> to vector<1x128xf32>
    %1175 = vector.broadcast %1174 : vector<1x128xf32> to vector<16x128xf32>
    %1176 = arith.mulf %1085, %1175 : vector<16x128xf32>
    %1177 = arith.addf %1160, %1176 : vector<16x128xf32>
    %c15_i32_370 = arith.constant 15 : i32
    %1178 = tpu.dynamic_rotate %1085 by %c15_i32_370 dim 0 : vector<16x128xf32>, i32 -> vector<16x128xf32>
    %c15_i32_371 = arith.constant 15 : i32
    %1179 = vector.broadcast %c15_i32_371 : i32 to vector<16x128xi32>
    %1180 = arith.cmpi slt, %1, %1179 : vector<16x128xi32>
    %cst_372 = arith.constant 0.000000e+00 : f32
    %1181 = vector.broadcast %cst_372 : f32 to vector<16x128xf32>
    %1182 = arith.select %1180, %1178, %1181 : vector<16x128xi1>, vector<16x128xf32>
    %1183 = vector.extract_strided_slice %1097 {offsets = [16, 0], sizes = [1, 128], strides = [1, 1]} : vector<25x128xf32> to vector<1x128xf32>
    %1184 = vector.shape_cast %1183 : vector<1x128xf32> to vector<128xf32>
    %1185 = vector.shape_cast %1184 : vector<128xf32> to vector<1x128xf32>
    %1186 = vector.broadcast %1185 : vector<1x128xf32> to vector<16x128xf32>
    %1187 = arith.mulf %1182, %1186 : vector<16x128xf32>
    %1188 = arith.addf %1171, %1187 : vector<16x128xf32>
    %c14_i32_373 = arith.constant 14 : i32
    %1189 = tpu.dynamic_rotate %1085 by %c14_i32_373 dim 0 : vector<16x128xf32>, i32 -> vector<16x128xf32>
    %c14_i32_374 = arith.constant 14 : i32
    %1190 = vector.broadcast %c14_i32_374 : i32 to vector<16x128xi32>
    %1191 = arith.cmpi slt, %1, %1190 : vector<16x128xi32>
    %cst_375 = arith.constant 0.000000e+00 : f32
    %1192 = vector.broadcast %cst_375 : f32 to vector<16x128xf32>
    %1193 = arith.select %1191, %1189, %1192 : vector<16x128xi1>, vector<16x128xf32>
    %1194 = vector.extract_strided_slice %1097 {offsets = [21, 0], sizes = [1, 128], strides = [1, 1]} : vector<25x128xf32> to vector<1x128xf32>
    %1195 = vector.shape_cast %1194 : vector<1x128xf32> to vector<128xf32>
    %1196 = vector.shape_cast %1195 : vector<128xf32> to vector<1x128xf32>
    %1197 = vector.broadcast %1196 : vector<1x128xf32> to vector<16x128xf32>
    %1198 = arith.mulf %1193, %1197 : vector<16x128xf32>
    %1199 = arith.addf %1177, %1198 : vector<16x128xf32>
    %c2_i32_376 = arith.constant 2 : i32
    %1200 = tpu.dynamic_rotate %1075 by %c2_i32_376 dim 0 : vector<16x128xf32>, i32 -> vector<16x128xf32>
    %c2_i32_377 = arith.constant 2 : i32
    %1201 = vector.broadcast %c2_i32_377 : i32 to vector<16x128xi32>
    %1202 = arith.cmpi sge, %1, %1201 : vector<16x128xi32>
    %cst_378 = arith.constant 0.000000e+00 : f32
    %1203 = vector.broadcast %cst_378 : f32 to vector<16x128xf32>
    %1204 = arith.select %1202, %1200, %1203 : vector<16x128xi1>, vector<16x128xf32>
    %1205 = vector.extract_strided_slice %1097 {offsets = [2, 0], sizes = [1, 128], strides = [1, 1]} : vector<25x128xf32> to vector<1x128xf32>
    %1206 = vector.shape_cast %1205 : vector<1x128xf32> to vector<128xf32>
    %1207 = vector.shape_cast %1206 : vector<128xf32> to vector<1x128xf32>
    %1208 = vector.broadcast %1207 : vector<1x128xf32> to vector<16x128xf32>
    %1209 = arith.mulf %1204, %1208 : vector<16x128xf32>
    %1210 = arith.addf %1188, %1209 : vector<16x128xf32>
    %c1_i32_379 = arith.constant 1 : i32
    %1211 = tpu.dynamic_rotate %1075 by %c1_i32_379 dim 0 : vector<16x128xf32>, i32 -> vector<16x128xf32>
    %c1_i32_380 = arith.constant 1 : i32
    %1212 = vector.broadcast %c1_i32_380 : i32 to vector<16x128xi32>
    %1213 = arith.cmpi sge, %1, %1212 : vector<16x128xi32>
    %cst_381 = arith.constant 0.000000e+00 : f32
    %1214 = vector.broadcast %cst_381 : f32 to vector<16x128xf32>
    %1215 = arith.select %1213, %1211, %1214 : vector<16x128xi1>, vector<16x128xf32>
    %1216 = vector.extract_strided_slice %1097 {offsets = [7, 0], sizes = [1, 128], strides = [1, 1]} : vector<25x128xf32> to vector<1x128xf32>
    %1217 = vector.shape_cast %1216 : vector<1x128xf32> to vector<128xf32>
    %1218 = vector.shape_cast %1217 : vector<128xf32> to vector<1x128xf32>
    %1219 = vector.broadcast %1218 : vector<1x128xf32> to vector<16x128xf32>
    %1220 = arith.mulf %1215, %1219 : vector<16x128xf32>
    %1221 = arith.addf %1199, %1220 : vector<16x128xf32>
    %1222 = vector.extract_strided_slice %1097 {offsets = [12, 0], sizes = [1, 128], strides = [1, 1]} : vector<25x128xf32> to vector<1x128xf32>
    %1223 = vector.shape_cast %1222 : vector<1x128xf32> to vector<128xf32>
    %1224 = vector.shape_cast %1223 : vector<128xf32> to vector<1x128xf32>
    %1225 = vector.broadcast %1224 : vector<1x128xf32> to vector<16x128xf32>
    %1226 = arith.mulf %1075, %1225 : vector<16x128xf32>
    %1227 = arith.addf %1210, %1226 : vector<16x128xf32>
    %c15_i32_382 = arith.constant 15 : i32
    %1228 = tpu.dynamic_rotate %1075 by %c15_i32_382 dim 0 : vector<16x128xf32>, i32 -> vector<16x128xf32>
    %c15_i32_383 = arith.constant 15 : i32
    %1229 = vector.broadcast %c15_i32_383 : i32 to vector<16x128xi32>
    %1230 = arith.cmpi slt, %1, %1229 : vector<16x128xi32>
    %cst_384 = arith.constant 0.000000e+00 : f32
    %1231 = vector.broadcast %cst_384 : f32 to vector<16x128xf32>
    %1232 = arith.select %1230, %1228, %1231 : vector<16x128xi1>, vector<16x128xf32>
    %1233 = vector.extract_strided_slice %1097 {offsets = [17, 0], sizes = [1, 128], strides = [1, 1]} : vector<25x128xf32> to vector<1x128xf32>
    %1234 = vector.shape_cast %1233 : vector<1x128xf32> to vector<128xf32>
    %1235 = vector.shape_cast %1234 : vector<128xf32> to vector<1x128xf32>
    %1236 = vector.broadcast %1235 : vector<1x128xf32> to vector<16x128xf32>
    %1237 = arith.mulf %1232, %1236 : vector<16x128xf32>
    %1238 = arith.addf %1221, %1237 : vector<16x128xf32>
    %c14_i32_385 = arith.constant 14 : i32
    %1239 = tpu.dynamic_rotate %1075 by %c14_i32_385 dim 0 : vector<16x128xf32>, i32 -> vector<16x128xf32>
    %c14_i32_386 = arith.constant 14 : i32
    %1240 = vector.broadcast %c14_i32_386 : i32 to vector<16x128xi32>
    %1241 = arith.cmpi slt, %1, %1240 : vector<16x128xi32>
    %cst_387 = arith.constant 0.000000e+00 : f32
    %1242 = vector.broadcast %cst_387 : f32 to vector<16x128xf32>
    %1243 = arith.select %1241, %1239, %1242 : vector<16x128xi1>, vector<16x128xf32>
    %1244 = vector.extract_strided_slice %1097 {offsets = [22, 0], sizes = [1, 128], strides = [1, 1]} : vector<25x128xf32> to vector<1x128xf32>
    %1245 = vector.shape_cast %1244 : vector<1x128xf32> to vector<128xf32>
    %1246 = vector.shape_cast %1245 : vector<128xf32> to vector<1x128xf32>
    %1247 = vector.broadcast %1246 : vector<1x128xf32> to vector<16x128xf32>
    %1248 = arith.mulf %1243, %1247 : vector<16x128xf32>
    %1249 = arith.addf %1227, %1248 : vector<16x128xf32>
    %c2_i32_388 = arith.constant 2 : i32
    %1250 = tpu.dynamic_rotate %1090 by %c2_i32_388 dim 0 : vector<16x128xf32>, i32 -> vector<16x128xf32>
    %c2_i32_389 = arith.constant 2 : i32
    %1251 = vector.broadcast %c2_i32_389 : i32 to vector<16x128xi32>
    %1252 = arith.cmpi sge, %1, %1251 : vector<16x128xi32>
    %cst_390 = arith.constant 0.000000e+00 : f32
    %1253 = vector.broadcast %cst_390 : f32 to vector<16x128xf32>
    %1254 = arith.select %1252, %1250, %1253 : vector<16x128xi1>, vector<16x128xf32>
    %1255 = vector.extract_strided_slice %1097 {offsets = [3, 0], sizes = [1, 128], strides = [1, 1]} : vector<25x128xf32> to vector<1x128xf32>
    %1256 = vector.shape_cast %1255 : vector<1x128xf32> to vector<128xf32>
    %1257 = vector.shape_cast %1256 : vector<128xf32> to vector<1x128xf32>
    %1258 = vector.broadcast %1257 : vector<1x128xf32> to vector<16x128xf32>
    %1259 = arith.mulf %1254, %1258 : vector<16x128xf32>
    %1260 = arith.addf %1238, %1259 : vector<16x128xf32>
    %c1_i32_391 = arith.constant 1 : i32
    %1261 = tpu.dynamic_rotate %1090 by %c1_i32_391 dim 0 : vector<16x128xf32>, i32 -> vector<16x128xf32>
    %c1_i32_392 = arith.constant 1 : i32
    %1262 = vector.broadcast %c1_i32_392 : i32 to vector<16x128xi32>
    %1263 = arith.cmpi sge, %1, %1262 : vector<16x128xi32>
    %cst_393 = arith.constant 0.000000e+00 : f32
    %1264 = vector.broadcast %cst_393 : f32 to vector<16x128xf32>
    %1265 = arith.select %1263, %1261, %1264 : vector<16x128xi1>, vector<16x128xf32>
    %1266 = vector.extract_strided_slice %1097 {offsets = [8, 0], sizes = [1, 128], strides = [1, 1]} : vector<25x128xf32> to vector<1x128xf32>
    %1267 = vector.shape_cast %1266 : vector<1x128xf32> to vector<128xf32>
    %1268 = vector.shape_cast %1267 : vector<128xf32> to vector<1x128xf32>
    %1269 = vector.broadcast %1268 : vector<1x128xf32> to vector<16x128xf32>
    %1270 = arith.mulf %1265, %1269 : vector<16x128xf32>
    %1271 = arith.addf %1249, %1270 : vector<16x128xf32>
    %1272 = vector.extract_strided_slice %1097 {offsets = [13, 0], sizes = [1, 128], strides = [1, 1]} : vector<25x128xf32> to vector<1x128xf32>
    %1273 = vector.shape_cast %1272 : vector<1x128xf32> to vector<128xf32>
    %1274 = vector.shape_cast %1273 : vector<128xf32> to vector<1x128xf32>
    %1275 = vector.broadcast %1274 : vector<1x128xf32> to vector<16x128xf32>
    %1276 = arith.mulf %1090, %1275 : vector<16x128xf32>
    %1277 = arith.addf %1260, %1276 : vector<16x128xf32>
    %c15_i32_394 = arith.constant 15 : i32
    %1278 = tpu.dynamic_rotate %1090 by %c15_i32_394 dim 0 : vector<16x128xf32>, i32 -> vector<16x128xf32>
    %c15_i32_395 = arith.constant 15 : i32
    %1279 = vector.broadcast %c15_i32_395 : i32 to vector<16x128xi32>
    %1280 = arith.cmpi slt, %1, %1279 : vector<16x128xi32>
    %cst_396 = arith.constant 0.000000e+00 : f32
    %1281 = vector.broadcast %cst_396 : f32 to vector<16x128xf32>
    %1282 = arith.select %1280, %1278, %1281 : vector<16x128xi1>, vector<16x128xf32>
    %1283 = vector.extract_strided_slice %1097 {offsets = [18, 0], sizes = [1, 128], strides = [1, 1]} : vector<25x128xf32> to vector<1x128xf32>
    %1284 = vector.shape_cast %1283 : vector<1x128xf32> to vector<128xf32>
    %1285 = vector.shape_cast %1284 : vector<128xf32> to vector<1x128xf32>
    %1286 = vector.broadcast %1285 : vector<1x128xf32> to vector<16x128xf32>
    %1287 = arith.mulf %1282, %1286 : vector<16x128xf32>
    %1288 = arith.addf %1271, %1287 : vector<16x128xf32>
    %c14_i32_397 = arith.constant 14 : i32
    %1289 = tpu.dynamic_rotate %1090 by %c14_i32_397 dim 0 : vector<16x128xf32>, i32 -> vector<16x128xf32>
    %c14_i32_398 = arith.constant 14 : i32
    %1290 = vector.broadcast %c14_i32_398 : i32 to vector<16x128xi32>
    %1291 = arith.cmpi slt, %1, %1290 : vector<16x128xi32>
    %cst_399 = arith.constant 0.000000e+00 : f32
    %1292 = vector.broadcast %cst_399 : f32 to vector<16x128xf32>
    %1293 = arith.select %1291, %1289, %1292 : vector<16x128xi1>, vector<16x128xf32>
    %1294 = vector.extract_strided_slice %1097 {offsets = [23, 0], sizes = [1, 128], strides = [1, 1]} : vector<25x128xf32> to vector<1x128xf32>
    %1295 = vector.shape_cast %1294 : vector<1x128xf32> to vector<128xf32>
    %1296 = vector.shape_cast %1295 : vector<128xf32> to vector<1x128xf32>
    %1297 = vector.broadcast %1296 : vector<1x128xf32> to vector<16x128xf32>
    %1298 = arith.mulf %1293, %1297 : vector<16x128xf32>
    %1299 = arith.addf %1277, %1298 : vector<16x128xf32>
    %c2_i32_400 = arith.constant 2 : i32
    %1300 = tpu.dynamic_rotate %1095 by %c2_i32_400 dim 0 : vector<16x128xf32>, i32 -> vector<16x128xf32>
    %c2_i32_401 = arith.constant 2 : i32
    %1301 = vector.broadcast %c2_i32_401 : i32 to vector<16x128xi32>
    %1302 = arith.cmpi sge, %1, %1301 : vector<16x128xi32>
    %cst_402 = arith.constant 0.000000e+00 : f32
    %1303 = vector.broadcast %cst_402 : f32 to vector<16x128xf32>
    %1304 = arith.select %1302, %1300, %1303 : vector<16x128xi1>, vector<16x128xf32>
    %1305 = vector.extract_strided_slice %1097 {offsets = [4, 0], sizes = [1, 128], strides = [1, 1]} : vector<25x128xf32> to vector<1x128xf32>
    %1306 = vector.shape_cast %1305 : vector<1x128xf32> to vector<128xf32>
    %1307 = vector.shape_cast %1306 : vector<128xf32> to vector<1x128xf32>
    %1308 = vector.broadcast %1307 : vector<1x128xf32> to vector<16x128xf32>
    %1309 = arith.mulf %1304, %1308 : vector<16x128xf32>
    %1310 = arith.addf %1288, %1309 : vector<16x128xf32>
    %c1_i32_403 = arith.constant 1 : i32
    %1311 = tpu.dynamic_rotate %1095 by %c1_i32_403 dim 0 : vector<16x128xf32>, i32 -> vector<16x128xf32>
    %c1_i32_404 = arith.constant 1 : i32
    %1312 = vector.broadcast %c1_i32_404 : i32 to vector<16x128xi32>
    %1313 = arith.cmpi sge, %1, %1312 : vector<16x128xi32>
    %cst_405 = arith.constant 0.000000e+00 : f32
    %1314 = vector.broadcast %cst_405 : f32 to vector<16x128xf32>
    %1315 = arith.select %1313, %1311, %1314 : vector<16x128xi1>, vector<16x128xf32>
    %1316 = vector.extract_strided_slice %1097 {offsets = [9, 0], sizes = [1, 128], strides = [1, 1]} : vector<25x128xf32> to vector<1x128xf32>
    %1317 = vector.shape_cast %1316 : vector<1x128xf32> to vector<128xf32>
    %1318 = vector.shape_cast %1317 : vector<128xf32> to vector<1x128xf32>
    %1319 = vector.broadcast %1318 : vector<1x128xf32> to vector<16x128xf32>
    %1320 = arith.mulf %1315, %1319 : vector<16x128xf32>
    %1321 = arith.addf %1299, %1320 : vector<16x128xf32>
    %1322 = vector.extract_strided_slice %1097 {offsets = [14, 0], sizes = [1, 128], strides = [1, 1]} : vector<25x128xf32> to vector<1x128xf32>
    %1323 = vector.shape_cast %1322 : vector<1x128xf32> to vector<128xf32>
    %1324 = vector.shape_cast %1323 : vector<128xf32> to vector<1x128xf32>
    %1325 = vector.broadcast %1324 : vector<1x128xf32> to vector<16x128xf32>
    %1326 = arith.mulf %1095, %1325 : vector<16x128xf32>
    %1327 = arith.addf %1310, %1326 : vector<16x128xf32>
    %c15_i32_406 = arith.constant 15 : i32
    %1328 = tpu.dynamic_rotate %1095 by %c15_i32_406 dim 0 : vector<16x128xf32>, i32 -> vector<16x128xf32>
    %c15_i32_407 = arith.constant 15 : i32
    %1329 = vector.broadcast %c15_i32_407 : i32 to vector<16x128xi32>
    %1330 = arith.cmpi slt, %1, %1329 : vector<16x128xi32>
    %cst_408 = arith.constant 0.000000e+00 : f32
    %1331 = vector.broadcast %cst_408 : f32 to vector<16x128xf32>
    %1332 = arith.select %1330, %1328, %1331 : vector<16x128xi1>, vector<16x128xf32>
    %1333 = vector.extract_strided_slice %1097 {offsets = [19, 0], sizes = [1, 128], strides = [1, 1]} : vector<25x128xf32> to vector<1x128xf32>
    %1334 = vector.shape_cast %1333 : vector<1x128xf32> to vector<128xf32>
    %1335 = vector.shape_cast %1334 : vector<128xf32> to vector<1x128xf32>
    %1336 = vector.broadcast %1335 : vector<1x128xf32> to vector<16x128xf32>
    %1337 = arith.mulf %1332, %1336 : vector<16x128xf32>
    %1338 = arith.addf %1321, %1337 : vector<16x128xf32>
    %c14_i32_409 = arith.constant 14 : i32
    %1339 = tpu.dynamic_rotate %1095 by %c14_i32_409 dim 0 : vector<16x128xf32>, i32 -> vector<16x128xf32>
    %c14_i32_410 = arith.constant 14 : i32
    %1340 = vector.broadcast %c14_i32_410 : i32 to vector<16x128xi32>
    %1341 = arith.cmpi slt, %1, %1340 : vector<16x128xi32>
    %cst_411 = arith.constant 0.000000e+00 : f32
    %1342 = vector.broadcast %cst_411 : f32 to vector<16x128xf32>
    %1343 = arith.select %1341, %1339, %1342 : vector<16x128xi1>, vector<16x128xf32>
    %1344 = vector.extract_strided_slice %1097 {offsets = [24, 0], sizes = [1, 128], strides = [1, 1]} : vector<25x128xf32> to vector<1x128xf32>
    %1345 = vector.shape_cast %1344 : vector<1x128xf32> to vector<128xf32>
    %1346 = vector.shape_cast %1345 : vector<128xf32> to vector<1x128xf32>
    %1347 = vector.broadcast %1346 : vector<1x128xf32> to vector<16x128xf32>
    %1348 = arith.mulf %1343, %1347 : vector<16x128xf32>
    %1349 = arith.addf %1327, %1348 : vector<16x128xf32>
    %1350 = arith.addf %1349, %1338 : vector<16x128xf32>
    %c8_412 = arith.constant 8 : index
    %c0_413 = arith.constant 0 : index
    %c0_414 = arith.constant 0 : index
    %1351 = vector.load %arg5[%c8_412, %c0_413, %c0_414] : memref<10x128x128xbf16, #tpu.memory_space<vmem>>, vector<1x128x128xbf16>
    %1352 = vector.shape_cast %1351 : vector<1x128x128xbf16> to vector<128x128xbf16>
    %1353 = arith.truncf %1350 : vector<16x128xf32> to vector<16x128xbf16>
    %cst_415 = arith.constant dense<0.000000e+00> : vector<16x128xf32>
    %1354 = tpu.matmul %1353, %1352, %cst_415 {dimension_numbers = #tpu.dot_dimension_numbers<[1], [0], [0], [1], [0, 0, 1, 1], [], []>} : vector<16x128xbf16>, vector<128x128xbf16>, vector<16x128xf32> -> vector<16x128xf32>
    %c10 = arith.constant 10 : index
    %c0_416 = arith.constant 0 : index
    %1355 = vector.load %arg6[%c10, %c0_416] : memref<12x128xf32, #tpu.memory_space<vmem>>, vector<1x128xf32>
    %1356 = vector.shape_cast %1355 : vector<1x128xf32> to vector<128xf32>
    %1357 = vector.shape_cast %1356 : vector<128xf32> to vector<1x128xf32>
    %1358 = vector.broadcast %1357 : vector<1x128xf32> to vector<16x128xf32>
    %1359 = arith.addf %1354, %1358 : vector<16x128xf32>
    %1360 = arith.addf %809, %1359 : vector<16x128xf32>
    %c2_417 = arith.constant 2 : index
    %c0_418 = arith.constant 0 : index
    %c0_419 = arith.constant 0 : index
    %c0_420 = arith.constant 0 : index
    %1361 = vector.load %arg10[%c2_417, %c0_418, %c0_419, %c0_420] : memref<4x1x16x128xf32, #tpu.memory_space<vmem>>, vector<1x1x16x128xf32>
    %1362 = vector.shape_cast %1361 : vector<1x1x16x128xf32> to vector<16x128xf32>
    %1363 = vector.shape_cast %1360 : vector<16x128xf32> to vector<1x1x16x128xf32>
    tpu.vector_store %arg10[%c2_417, %c0_418, %c0_419, %c0_420], %1363 {strides = array<i32>} : memref<4x1x16x128xf32, #tpu.memory_space<vmem>>, vector<1x1x16x128xf32>,
    %c7_421 = arith.constant 7 : index
    %c0_422 = arith.constant 0 : index
    %c0_423 = arith.constant 0 : index
    %1364 = vector.load %arg7[%c7_421, %c0_422, %c0_423] : memref<8x9x128xf32, #tpu.memory_space<vmem>>, vector<1x9x128xf32>
    %1365 = vector.shape_cast %1364 : vector<1x9x128xf32> to vector<9x128xf32>
    %cst_424 = arith.constant 0.000000e+00 : f32
    %1366 = vector.broadcast %cst_424 : f32 to vector<16x128xf32>
    %cst_425 = arith.constant 0.000000e+00 : f32
    %1367 = vector.broadcast %cst_425 : f32 to vector<16x128xf32>
    %c2_i32_426 = arith.constant 2 : i32
    %1368 = tpu.dynamic_rotate %34 by %c2_i32_426 dim 0 : vector<16x128xf32>, i32 -> vector<16x128xf32>
    %c2_i32_427 = arith.constant 2 : i32
    %1369 = vector.broadcast %c2_i32_427 : i32 to vector<16x128xi32>
    %1370 = arith.cmpi sge, %1, %1369 : vector<16x128xi32>
    %cst_428 = arith.constant 0.000000e+00 : f32
    %1371 = vector.broadcast %cst_428 : f32 to vector<16x128xf32>
    %1372 = arith.select %1370, %1368, %1371 : vector<16x128xi1>, vector<16x128xf32>
    %1373 = vector.extract_strided_slice %1365 {offsets = [0, 0], sizes = [1, 128], strides = [1, 1]} : vector<9x128xf32> to vector<1x128xf32>
    %1374 = vector.shape_cast %1373 : vector<1x128xf32> to vector<128xf32>
    %1375 = vector.shape_cast %1374 : vector<128xf32> to vector<1x128xf32>
    %1376 = vector.broadcast %1375 : vector<1x128xf32> to vector<16x128xf32>
    %1377 = arith.mulf %1372, %1376 : vector<16x128xf32>
    %1378 = arith.addf %1366, %1377 : vector<16x128xf32>
    %1379 = vector.extract_strided_slice %1365 {offsets = [3, 0], sizes = [1, 128], strides = [1, 1]} : vector<9x128xf32> to vector<1x128xf32>
    %1380 = vector.shape_cast %1379 : vector<1x128xf32> to vector<128xf32>
    %1381 = vector.shape_cast %1380 : vector<128xf32> to vector<1x128xf32>
    %1382 = vector.broadcast %1381 : vector<1x128xf32> to vector<16x128xf32>
    %1383 = arith.mulf %34, %1382 : vector<16x128xf32>
    %1384 = arith.addf %1367, %1383 : vector<16x128xf32>
    %c14_i32_429 = arith.constant 14 : i32
    %1385 = tpu.dynamic_rotate %34 by %c14_i32_429 dim 0 : vector<16x128xf32>, i32 -> vector<16x128xf32>
    %c14_i32_430 = arith.constant 14 : i32
    %1386 = vector.broadcast %c14_i32_430 : i32 to vector<16x128xi32>
    %1387 = arith.cmpi slt, %1, %1386 : vector<16x128xi32>
    %cst_431 = arith.constant 0.000000e+00 : f32
    %1388 = vector.broadcast %cst_431 : f32 to vector<16x128xf32>
    %1389 = arith.select %1387, %1385, %1388 : vector<16x128xi1>, vector<16x128xf32>
    %1390 = vector.extract_strided_slice %1365 {offsets = [6, 0], sizes = [1, 128], strides = [1, 1]} : vector<9x128xf32> to vector<1x128xf32>
    %1391 = vector.shape_cast %1390 : vector<1x128xf32> to vector<128xf32>
    %1392 = vector.shape_cast %1391 : vector<128xf32> to vector<1x128xf32>
    %1393 = vector.broadcast %1392 : vector<1x128xf32> to vector<16x128xf32>
    %1394 = arith.mulf %1389, %1393 : vector<16x128xf32>
    %1395 = arith.addf %1378, %1394 : vector<16x128xf32>
    %c2_i32_432 = arith.constant 2 : i32
    %1396 = tpu.dynamic_rotate %27 by %c2_i32_432 dim 0 : vector<16x128xf32>, i32 -> vector<16x128xf32>
    %c2_i32_433 = arith.constant 2 : i32
    %1397 = vector.broadcast %c2_i32_433 : i32 to vector<16x128xi32>
    %1398 = arith.cmpi sge, %1, %1397 : vector<16x128xi32>
    %cst_434 = arith.constant 0.000000e+00 : f32
    %1399 = vector.broadcast %cst_434 : f32 to vector<16x128xf32>
    %1400 = arith.select %1398, %1396, %1399 : vector<16x128xi1>, vector<16x128xf32>
    %1401 = vector.extract_strided_slice %1365 {offsets = [1, 0], sizes = [1, 128], strides = [1, 1]} : vector<9x128xf32> to vector<1x128xf32>
    %1402 = vector.shape_cast %1401 : vector<1x128xf32> to vector<128xf32>
    %1403 = vector.shape_cast %1402 : vector<128xf32> to vector<1x128xf32>
    %1404 = vector.broadcast %1403 : vector<1x128xf32> to vector<16x128xf32>
    %1405 = arith.mulf %1400, %1404 : vector<16x128xf32>
    %1406 = arith.addf %1384, %1405 : vector<16x128xf32>
    %1407 = vector.extract_strided_slice %1365 {offsets = [4, 0], sizes = [1, 128], strides = [1, 1]} : vector<9x128xf32> to vector<1x128xf32>
    %1408 = vector.shape_cast %1407 : vector<1x128xf32> to vector<128xf32>
    %1409 = vector.shape_cast %1408 : vector<128xf32> to vector<1x128xf32>
    %1410 = vector.broadcast %1409 : vector<1x128xf32> to vector<16x128xf32>
    %1411 = arith.mulf %27, %1410 : vector<16x128xf32>
    %1412 = arith.addf %1395, %1411 : vector<16x128xf32>
    %c14_i32_435 = arith.constant 14 : i32
    %1413 = tpu.dynamic_rotate %27 by %c14_i32_435 dim 0 : vector<16x128xf32>, i32 -> vector<16x128xf32>
    %c14_i32_436 = arith.constant 14 : i32
    %1414 = vector.broadcast %c14_i32_436 : i32 to vector<16x128xi32>
    %1415 = arith.cmpi slt, %1, %1414 : vector<16x128xi32>
    %cst_437 = arith.constant 0.000000e+00 : f32
    %1416 = vector.broadcast %cst_437 : f32 to vector<16x128xf32>
    %1417 = arith.select %1415, %1413, %1416 : vector<16x128xi1>, vector<16x128xf32>
    %1418 = vector.extract_strided_slice %1365 {offsets = [7, 0], sizes = [1, 128], strides = [1, 1]} : vector<9x128xf32> to vector<1x128xf32>
    %1419 = vector.shape_cast %1418 : vector<1x128xf32> to vector<128xf32>
    %1420 = vector.shape_cast %1419 : vector<128xf32> to vector<1x128xf32>
    %1421 = vector.broadcast %1420 : vector<1x128xf32> to vector<16x128xf32>
    %1422 = arith.mulf %1417, %1421 : vector<16x128xf32>
    %1423 = arith.addf %1406, %1422 : vector<16x128xf32>
    %c2_i32_438 = arith.constant 2 : i32
    %1424 = tpu.dynamic_rotate %49 by %c2_i32_438 dim 0 : vector<16x128xf32>, i32 -> vector<16x128xf32>
    %c2_i32_439 = arith.constant 2 : i32
    %1425 = vector.broadcast %c2_i32_439 : i32 to vector<16x128xi32>
    %1426 = arith.cmpi sge, %1, %1425 : vector<16x128xi32>
    %cst_440 = arith.constant 0.000000e+00 : f32
    %1427 = vector.broadcast %cst_440 : f32 to vector<16x128xf32>
    %1428 = arith.select %1426, %1424, %1427 : vector<16x128xi1>, vector<16x128xf32>
    %1429 = vector.extract_strided_slice %1365 {offsets = [2, 0], sizes = [1, 128], strides = [1, 1]} : vector<9x128xf32> to vector<1x128xf32>
    %1430 = vector.shape_cast %1429 : vector<1x128xf32> to vector<128xf32>
    %1431 = vector.shape_cast %1430 : vector<128xf32> to vector<1x128xf32>
    %1432 = vector.broadcast %1431 : vector<1x128xf32> to vector<16x128xf32>
    %1433 = arith.mulf %1428, %1432 : vector<16x128xf32>
    %1434 = arith.addf %1412, %1433 : vector<16x128xf32>
    %1435 = vector.extract_strided_slice %1365 {offsets = [5, 0], sizes = [1, 128], strides = [1, 1]} : vector<9x128xf32> to vector<1x128xf32>
    %1436 = vector.shape_cast %1435 : vector<1x128xf32> to vector<128xf32>
    %1437 = vector.shape_cast %1436 : vector<128xf32> to vector<1x128xf32>
    %1438 = vector.broadcast %1437 : vector<1x128xf32> to vector<16x128xf32>
    %1439 = arith.mulf %49, %1438 : vector<16x128xf32>
    %1440 = arith.addf %1423, %1439 : vector<16x128xf32>
    %c14_i32_441 = arith.constant 14 : i32
    %1441 = tpu.dynamic_rotate %49 by %c14_i32_441 dim 0 : vector<16x128xf32>, i32 -> vector<16x128xf32>
    %c14_i32_442 = arith.constant 14 : i32
    %1442 = vector.broadcast %c14_i32_442 : i32 to vector<16x128xi32>
    %1443 = arith.cmpi slt, %1, %1442 : vector<16x128xi32>
    %cst_443 = arith.constant 0.000000e+00 : f32
    %1444 = vector.broadcast %cst_443 : f32 to vector<16x128xf32>
    %1445 = arith.select %1443, %1441, %1444 : vector<16x128xi1>, vector<16x128xf32>
    %1446 = vector.extract_strided_slice %1365 {offsets = [8, 0], sizes = [1, 128], strides = [1, 1]} : vector<9x128xf32> to vector<1x128xf32>
    %1447 = vector.shape_cast %1446 : vector<1x128xf32> to vector<128xf32>
    %1448 = vector.shape_cast %1447 : vector<128xf32> to vector<1x128xf32>
    %1449 = vector.broadcast %1448 : vector<1x128xf32> to vector<16x128xf32>
    %1450 = arith.mulf %1445, %1449 : vector<16x128xf32>
    %1451 = arith.addf %1434, %1450 : vector<16x128xf32>
    %1452 = arith.addf %1451, %1440 : vector<16x128xf32>
    %c9_444 = arith.constant 9 : index
    %c0_445 = arith.constant 0 : index
    %c0_446 = arith.constant 0 : index
    %1453 = vector.load %arg5[%c9_444, %c0_445, %c0_446] : memref<10x128x128xbf16, #tpu.memory_space<vmem>>, vector<1x128x128xbf16>
    %1454 = vector.shape_cast %1453 : vector<1x128x128xbf16> to vector<128x128xbf16>
    %1455 = arith.truncf %1452 : vector<16x128xf32> to vector<16x128xbf16>
    %cst_447 = arith.constant dense<0.000000e+00> : vector<16x128xf32>
    %1456 = tpu.matmul %1455, %1454, %cst_447 {dimension_numbers = #tpu.dot_dimension_numbers<[1], [0], [0], [1], [0, 0, 1, 1], [], []>} : vector<16x128xbf16>, vector<128x128xbf16>, vector<16x128xf32> -> vector<16x128xf32>
    %c11 = arith.constant 11 : index
    %c0_448 = arith.constant 0 : index
    %1457 = vector.load %arg6[%c11, %c0_448] : memref<12x128xf32, #tpu.memory_space<vmem>>, vector<1x128xf32>
    %1458 = vector.shape_cast %1457 : vector<1x128xf32> to vector<128xf32>
    %1459 = vector.shape_cast %1458 : vector<128xf32> to vector<1x128xf32>
    %1460 = vector.broadcast %1459 : vector<1x128xf32> to vector<16x128xf32>
    %1461 = arith.addf %1456, %1460 : vector<16x128xf32>
    %cst_449 = arith.constant 0.000000e+00 : f32
    %1462 = vector.broadcast %cst_449 : f32 to vector<16x128xf32>
    %cst_450 = arith.constant 0.000000e+00 : f32
    %1463 = vector.broadcast %cst_450 : f32 to vector<16x128xf32>
    %c1_i32_451 = arith.constant 1 : i32
    %1464 = tpu.dynamic_rotate %74 by %c1_i32_451 dim 0 : vector<16x128xf32>, i32 -> vector<16x128xf32>
    %c1_i32_452 = arith.constant 1 : i32
    %1465 = vector.broadcast %c1_i32_452 : i32 to vector<16x128xi32>
    %1466 = arith.cmpi sge, %1, %1465 : vector<16x128xi32>
    %cst_453 = arith.constant 0.000000e+00 : f32
    %1467 = vector.broadcast %cst_453 : f32 to vector<16x128xf32>
    %1468 = arith.select %1466, %1464, %1467 : vector<16x128xi1>, vector<16x128xf32>
    %1469 = arith.addf %1462, %1468 : vector<16x128xf32>
    %1470 = arith.addf %1463, %74 : vector<16x128xf32>
    %c15_i32_454 = arith.constant 15 : i32
    %1471 = tpu.dynamic_rotate %74 by %c15_i32_454 dim 0 : vector<16x128xf32>, i32 -> vector<16x128xf32>
    %c15_i32_455 = arith.constant 15 : i32
    %1472 = vector.broadcast %c15_i32_455 : i32 to vector<16x128xi32>
    %1473 = arith.cmpi slt, %1, %1472 : vector<16x128xi32>
    %cst_456 = arith.constant 0.000000e+00 : f32
    %1474 = vector.broadcast %cst_456 : f32 to vector<16x128xf32>
    %1475 = arith.select %1473, %1471, %1474 : vector<16x128xi1>, vector<16x128xf32>
    %1476 = arith.addf %1469, %1475 : vector<16x128xf32>
    %c1_i32_457 = arith.constant 1 : i32
    %1477 = tpu.dynamic_rotate %25 by %c1_i32_457 dim 0 : vector<16x128xf32>, i32 -> vector<16x128xf32>
    %c1_i32_458 = arith.constant 1 : i32
    %1478 = vector.broadcast %c1_i32_458 : i32 to vector<16x128xi32>
    %1479 = arith.cmpi sge, %1, %1478 : vector<16x128xi32>
    %cst_459 = arith.constant 0.000000e+00 : f32
    %1480 = vector.broadcast %cst_459 : f32 to vector<16x128xf32>
    %1481 = arith.select %1479, %1477, %1480 : vector<16x128xi1>, vector<16x128xf32>
    %1482 = arith.addf %1470, %1481 : vector<16x128xf32>
    %1483 = arith.addf %1476, %25 : vector<16x128xf32>
    %c15_i32_460 = arith.constant 15 : i32
    %1484 = tpu.dynamic_rotate %25 by %c15_i32_460 dim 0 : vector<16x128xf32>, i32 -> vector<16x128xf32>
    %c15_i32_461 = arith.constant 15 : i32
    %1485 = vector.broadcast %c15_i32_461 : i32 to vector<16x128xi32>
    %1486 = arith.cmpi slt, %1, %1485 : vector<16x128xi32>
    %cst_462 = arith.constant 0.000000e+00 : f32
    %1487 = vector.broadcast %cst_462 : f32 to vector<16x128xf32>
    %1488 = arith.select %1486, %1484, %1487 : vector<16x128xi1>, vector<16x128xf32>
    %1489 = arith.addf %1482, %1488 : vector<16x128xf32>
    %c1_i32_463 = arith.constant 1 : i32
    %1490 = tpu.dynamic_rotate %79 by %c1_i32_463 dim 0 : vector<16x128xf32>, i32 -> vector<16x128xf32>
    %c1_i32_464 = arith.constant 1 : i32
    %1491 = vector.broadcast %c1_i32_464 : i32 to vector<16x128xi32>
    %1492 = arith.cmpi sge, %1, %1491 : vector<16x128xi32>
    %cst_465 = arith.constant 0.000000e+00 : f32
    %1493 = vector.broadcast %cst_465 : f32 to vector<16x128xf32>
    %1494 = arith.select %1492, %1490, %1493 : vector<16x128xi1>, vector<16x128xf32>
    %1495 = arith.addf %1483, %1494 : vector<16x128xf32>
    %1496 = arith.addf %1489, %79 : vector<16x128xf32>
    %c15_i32_466 = arith.constant 15 : i32
    %1497 = tpu.dynamic_rotate %79 by %c15_i32_466 dim 0 : vector<16x128xf32>, i32 -> vector<16x128xf32>
    %c15_i32_467 = arith.constant 15 : i32
    %1498 = vector.broadcast %c15_i32_467 : i32 to vector<16x128xi32>
    %1499 = arith.cmpi slt, %1, %1498 : vector<16x128xi32>
    %cst_468 = arith.constant 0.000000e+00 : f32
    %1500 = vector.broadcast %cst_468 : f32 to vector<16x128xf32>
    %1501 = arith.select %1499, %1497, %1500 : vector<16x128xi1>, vector<16x128xf32>
    %1502 = arith.addf %1495, %1501 : vector<16x128xf32>
    %1503 = arith.addf %1502, %1496 : vector<16x128xf32>
    %c0_469 = arith.constant 0 : index
    %c0_470 = arith.constant 0 : index
    %1504 = vector.load %arg9[%c0_469, %c0_470] : memref<16x128xf32, #tpu.memory_space<vmem>>, vector<16x128xf32>
    %1505 = arith.mulf %1503, %1504 : vector<16x128xf32>
    %1506 = arith.addf %1461, %1505 : vector<16x128xf32>
    %c3_471 = arith.constant 3 : index
    %c0_472 = arith.constant 0 : index
    %c0_473 = arith.constant 0 : index
    %c0_474 = arith.constant 0 : index
    %1507 = vector.load %arg10[%c3_471, %c0_472, %c0_473, %c0_474] : memref<4x1x16x128xf32, #tpu.memory_space<vmem>>, vector<1x1x16x128xf32>
    %1508 = vector.shape_cast %1507 : vector<1x1x16x128xf32> to vector<16x128xf32>
    %1509 = vector.shape_cast %1506 : vector<16x128xf32> to vector<1x1x16x128xf32>
    tpu.vector_store %arg10[%c3_471, %c0_472, %c0_473, %c0_474], %1509 {strides = array<i32>} : memref<4x1x16x128xf32, #tpu.memory_space<vmem>>, vector<1x1x16x128xf32>,
    return
  }
  func.func @transform_0(%arg0: i32) -> (i32, i32, i32) {
    %c0_i32 = arith.constant 0 : i32
    %c0_i32_0 = arith.constant 0 : i32
    %c0_i32_1 = arith.constant 0 : i32
    return %arg0, %c0_i32, %c0_i32_0 : i32, i32, i32
  }
  func.func @transform_1(%arg0: i32) -> (i32, i32, i32) {
    %c0_i32 = arith.constant 0 : i32
    %c0_i32_0 = arith.constant 0 : i32
    %c0_i32_1 = arith.constant 0 : i32
    return %arg0, %c0_i32, %c0_i32_0 : i32, i32, i32
  }
  func.func @transform_2(%arg0: i32) -> (i32, i32) {
    %c0_i32 = arith.constant 0 : i32
    %c0_i32_0 = arith.constant 0 : i32
    %c0_i32_1 = arith.constant 0 : i32
    return %c0_i32, %c0_i32_0 : i32, i32
  }
  func.func @transform_3(%arg0: i32) -> (i32, i32) {
    %c0_i32 = arith.constant 0 : i32
    %c0_i32_0 = arith.constant 0 : i32
    %c0_i32_1 = arith.constant 0 : i32
    return %c0_i32, %c0_i32_0 : i32, i32
  }
  func.func @transform_4(%arg0: i32) -> (i32, i32, i32) {
    %c0_i32 = arith.constant 0 : i32
    %c0_i32_0 = arith.constant 0 : i32
    %c0_i32_1 = arith.constant 0 : i32
    %c0_i32_2 = arith.constant 0 : i32
    return %c0_i32, %c0_i32_0, %c0_i32_1 : i32, i32, i32
  }
  func.func @transform_5(%arg0: i32) -> (i32, i32) {
    %c0_i32 = arith.constant 0 : i32
    %c0_i32_0 = arith.constant 0 : i32
    %c0_i32_1 = arith.constant 0 : i32
    return %c0_i32, %c0_i32_0 : i32, i32
  }
  func.func @transform_6(%arg0: i32) -> (i32, i32, i32) {
    %c0_i32 = arith.constant 0 : i32
    %c0_i32_0 = arith.constant 0 : i32
    %c0_i32_1 = arith.constant 0 : i32
    %c0_i32_2 = arith.constant 0 : i32
    return %c0_i32, %c0_i32_0, %c0_i32_1 : i32, i32, i32
  }
  func.func @transform_7(%arg0: i32) -> (i32, i32, i32) {
    %c0_i32 = arith.constant 0 : i32
    %c0_i32_0 = arith.constant 0 : i32
    %c0_i32_1 = arith.constant 0 : i32
    %c0_i32_2 = arith.constant 0 : i32
    return %c0_i32, %c0_i32_0, %c0_i32_1 : i32, i32, i32
  }
  func.func @transform_8(%arg0: i32) -> (i32, i32) {
    %c0_i32 = arith.constant 0 : i32
    %c0_i32_0 = arith.constant 0 : i32
    %c0_i32_1 = arith.constant 0 : i32
    return %c0_i32, %c0_i32_0 : i32, i32
  }
  func.func @transform_9(%arg0: i32) -> (i32, i32, i32, i32) {
    %c0_i32 = arith.constant 0 : i32
    %c0_i32_0 = arith.constant 0 : i32
    %c0_i32_1 = arith.constant 0 : i32
    %c0_i32_2 = arith.constant 0 : i32
    return %c0_i32, %arg0, %c0_i32_0, %c0_i32_1 : i32, i32, i32, i32
  }
}

</mosaic_0001>

<bundles_post_ra>
// kernel: normal_cell_forward.1
= control target key start
LH: loop header
LB: loop body
LE: loop exit
PB: predicated region body
PF: predicated region fallthrough
CT: control target
= control target key end

     0   :  { %s4368_s30 = smov 0   ;;  %s4370_s10 = smov 0   ;;  %s6655_s0 = inlined_call_operand.vmem [shape: f32[2,16,128], index: 0, kind: input, shape index: {}]   ;;  %s6656_s1 = inlined_call_operand.vmem [shape: f32[2,16,128], index: 1, kind: input, shape index: {}]   ;;  %s6657_s2 = inlined_call_operand.vmem [shape: bf16[128,128], index: 2, kind: input, shape index: {}]   ;;  %s6658_s3 = inlined_call_operand.vmem [shape: bf16[128,128], index: 3, kind: input, shape index: {}]   ;;  %s6659_s4 = inlined_call_operand.vmem [shape: bf16[10,128,128], index: 4, kind: input, shape index: {}]   ;;  %s6660_s5 = inlined_call_operand.vmem [shape: f32[12,128], index: 5, kind: input, shape index: {}]   ;;  %s6661_s6 = inlined_call_operand.vmem [shape: f32[8,9,128], index: 6, kind: input, shape index: {}]   ;;  %s6662_s7 = inlined_call_operand.vmem [shape: f32[2,25,128], index: 7, kind: input, shape index: {}]   ;;  %s6663_s8 = inlined_call_operand.vmem [shape: f32[16,128], index: 8, kind: input, shape index: {}]   ;;  %s6664_s9 = inlined_call_operand.vmem [shape: f32[4,2,16,128], index: 9, kind: output, shape index: {}]  }
   0x1   :  { %s4372_s11 = smov 0  }
   0x2 LB: > { %s4381_s12 = sadd.s32 4294967295, %s4310_s11   ;;  %s4383_s13 = sadd.s32 1, %s4310_s11   ;;  %s4310_s11 = sphi %s4372_s11, %s6823_s11   ;;  %s4306_s10 = sphi %s4370_s10, %s6822_s10   ;;  %s4302_s30 = sphi %s4368_s30, %s6821_s30  }
   0x3   : > { %s222_s14 = ssub.s32 %s4310_s11, %s4383_s13  ;;  %s225_s15 = sadd.s32 1, %s4306_s10 }
   0x4   : > { %p223_p0 = scmp.eq.s32.totalorder %s222_s14, 0  ;;  %p235_p1 = scmp.ne.s32.totalorder %s4306_s10, %s4302_s30 }
   0x5   : > { %p236_p2 = scmp.eq.s32.totalorder %s4381_s12, 1  ;;  %p3514_p3 = scmp.ge.s32.totalorder %s4310_s11, 1 }
   0x6   : > { %s4391_s16 = scalar_select %p223_p0, %s4306_s10, %s225_s15  }
   0x7   : > { %p4393_p4 = por %p236_p2, %p235_p1  ;;  %p297_p5 = scmp.lt.s32.totalorder %s4310_s11, 3 }
   0x9   : > { %p298_p6 = pnand %p3514_p3, %p297_p5 }
   0xb   : > { %301 = sbr.rel (%p298_p6) target bundleno = 1437 (0x59d), region = 56 }
  0x10   : > { %v4192_v0 = vld [vmem:[%s6657_s2 + $0x38] sm:$0xff]   ;;  %v6665_v1 = vmov 0.0   ;;  %v4193_v2 = vld [vmem:[%s6657_s2 + $0x30] sm:$0xff]   ;;  %vm4313_vm0 = vmmov 0   ;;  %p337_p7 = scmp.lt.s32.totalorder %s4381_s12, 1  ;;  %v4194_v3 = vld [vmem:[%s6657_s2 + $0x28] sm:$0xff]   ;;  %v348_v44 = vlaneseq }
  0x11   : > { %3922 = vmatprep.subr.bf16.mxu0 %v6665_v1  ;;  %3942 = vmatprep.subr.bf16.mxu1 %v6665_v1  ;;  %v4195_v4 = vld [vmem:[%s6657_s2 + $0x20] sm:$0xff]   ;;  %v4196_v9 = vld [vmem:[%s6657_s2 + $0x18] sm:$0xff]   ;;  %v4197_v10 = vld [vmem:[%s6657_s2 + $0x10] sm:$0xff]   ;;  %s4314_s27 = smov 120   ;;  %s4316_s11 = smov 16  }
  0x12   : > { %3923 = vmatpush3.bf16.msra.mxu0 %v4192_v0  ;;  %3938 = vmatprep.mubr.msk.bf16.mxu0 %vm4313_vm0, %v6665_v1  ;;  %s4412_s22 = scalar_select %p337_p7, %s4381_s12, 1  ;;  %v4198_v11 = vld [vmem:[%s6657_s2 + $0x8] sm:$0xff]   ;;  %v4199_v12 = vld [vmem:[%s6657_s2] sm:$0xff]   ;;  %v4200_v14 = vld [vmem:[%s6659_s4 + $0x38] sm:$0xff]   ;;  %v4533_v45 = vshrl.u32 %v348_v44, 7  ;;  %v4550_v51 = vand.u32 127, %v348_v44 }
  0x13   : > { %3924 = vmatprep.subr.bf16.mxu0 %v6665_v1  ;;  %3958 = vmatprep.mubr.msk.bf16.mxu1 %vm4313_vm0, %v6665_v1  ;;  %v4201_v15 = vld [vmem:[%s6659_s4 + $0x30] sm:$0xff]   ;;  %v4202_v16 = vld [vmem:[%s6658_s3 + $0x38] sm:$0xff]   ;;  %v4203_v17 = vld [vmem:[%s6659_s4 + $0x28] sm:$0xff]   ;;  %s4317_s18 = smov 112   ;;  %s334_s23 = sand.u32 1, %s4302_s30  }
  0x14   : > { %s3811_s25 = sshll.u32 %s4412_s22, 4  ;;  %3943 = vmatpush3.bf16.msra.mxu1 %v4202_v16  ;;  %v3520_v18 = vld [vmem:[%s6660_s5] ss:$0 sm:$0xff]  ;;  %v4204_v22 = vld [vmem:[%s6658_s3 + $0x30] sm:$0xff]   ;;  %v4206_v28 = vld [vmem:[%s6658_s3 + $0x28] sm:$0xff]   ;;  %v4536_v46 = vsub.s32 4, %v4533_v45 }
  0x15   : > { %s341_s28 = scalar_lea.vmem %s6655_s0, %s3811_s25  ;;  %3944 = vmatprep.subr.bf16.mxu1 %v6665_v1  ;;  %v4205_v23 = vld [vmem:[%s6659_s4 + $0x20] sm:$0xff]   ;;  %v4207_v29 = vld [vmem:[%s6659_s4 + $0x18] sm:$0xff]   ;;  %v4209_v32 = vld [vmem:[%s6659_s4 + $0x10] sm:$0xff]   ;;  %s346_s24 = scalar_lea.vmem %s6656_s1, %s3811_s25  ;;  %v4545_v49 = vsub.s32 1, %v4533_v45  ;;  %v4548_v50 = vsub.s32 7, %v4533_v45  ;;  %v4553_v52 = vsub.s32 5, %v4533_v45 }
  0x16   : > { %3925 = vmatpush3.bf16.msra.mxu0 %v4193_v2  ;;  %v353_v5 = vld [vmem:[%s341_s28] sm:$0xff]  ;;  %v354_v6 = vld [vmem:[%s341_s28 + $0x8] sm:$0xff]  ;;  %s4315_s28 = smov 8   ;;  %v4210_v33 = vld [vmem:[%s6658_s3 + $0x18] sm:$0xff]   ;;  %6701 = vst [vmem:[#allocation3_spill] sm:$0xff] %v4536_v46  ;;  %vm655_vm1 = vcmp.lt.s32.totalorder %v4533_v45, 1 }
  0x17   : > { %3926 = vmatprep.subr.bf16.mxu0 %v6665_v1  ;;  %v355_v7 = vmax.f32 %v353_v5, 0.0  ;;  %v356_v8 = vmax.f32 %v354_v6, 0.0  ;;  %v4208_v31 = vld [vmem:[%s6658_s3 + $0x20] sm:$0xff]   ;;  %v4211_v34 = vld [vmem:[%s6659_s4 + $0x8] sm:$0xff]   ;;  %v4212_v35 = vld [vmem:[%s6658_s3 + $0x10] sm:$0xff]   ;;  %6702 = vst [vmem:[#allocation4_spill] sm:$0xff] %v4545_v49 }
  0x18   : > { %3945 = vmatpush3.bf16.msra.mxu1 %v4204_v22  ;;  %v4213_v36 = vld [vmem:[%s6659_s4] sm:$0xff]   ;;  %v4214_v37 = vld [vmem:[%s6658_s3 + $0x8] sm:$0xff]   ;;  %v3662_v48 = vld [vmem:[%s6661_s6 + $0x50] sm:$0xff]  ;;  %6703 = vst [vmem:[#allocation5_spill] sm:$0xff] %v4548_v50  ;;  %vm680_vm2 = vcmp.lt.s32.totalorder %v4533_v45, 7  ;;  %v4562_v57 = vadd.s32 8, %v4533_v45 }
  0x19   : > { %v373_v13 = vpack.c.bf16 %v356_v8, %v355_v7  ;;  %3946 = vmatprep.subr.bf16.mxu1 %v6665_v1  ;;  %v468_v38 = vld [vmem:[%s346_s24] sm:$0xff]  ;;  %v469_v39 = vld [vmem:[%s346_s24 + $0x8] sm:$0xff]  ;;  %6704 = vst [vmem:[#allocation6_spill] sm:$0xff] %v4553_v52  ;;  %v1861_v55 = vrot.slane %v3662_v48, %v4536_v46  ;;  %v4565_v58 = vsub.s32 3, %v4533_v45  ;;  %v4570_v61 = vsub.s32 2, %v4533_v45  ;;  %s3515_s29 = sshll.u32 %s334_s23, 6 }
  0x1a   : > { %3927 = vmatpush3.bf16.msra.mxu0 %v4194_v3  ;;  %v470_v40 = vmax.f32 %v468_v38, 0.0  ;;  %v471_v41 = vmax.f32 %v469_v39, 0.0  ;;  %v4215_v42 = vld [vmem:[%s6658_s3] sm:$0xff]   ;;  %vm605_vm3 = vcmp.lt.s32.totalorder %v4550_v51, 120  ;;  %v4575_v63 = vsub.s32 0, %v4533_v45  ;;  %s5831_s22 = scalar_lea.vmem [#allocation2], %s3515_s29 }
  0x1b   : > { %3928 = vmatprep.subr.bf16.mxu0 %v6665_v1  ;;  %v651_v47 = vld [vmem:[%s6661_s6] sm:$0xff]  ;;  %6705 = vst [vmem:[#allocation7_spill] sm:$0xff] %v4565_v58  ;;  %6706 = vst [vmem:[#allocation8_spill] sm:$0xff] %v4570_v61  ;;  %v4578_v0 = vsub.s32 6, %v4533_v45  ;;  %v1885_v2 = vrot.slane %v3662_v48, %v4553_v52  ;;  %vm658_vm4 = vcmp.ge.s32.totalorder %v4533_v45, 1  ;;  %vm598_vm5 = vcmp.ge.s32.totalorder %v4550_v51, 8 }
  0x1c   : > { %3947 = vmatpush3.bf16.msra.mxu1 %v4206_v28  ;;  %v488_v43 = vpack.c.bf16 %v471_v41, %v470_v40  ;;  %v712_v54 = vrot.slane %v651_v47, %v4536_v46  ;;  %v704_v56 = vrot.slane %v651_v47, %v4545_v49  ;;  %v726_v59 = vrot.slane %v651_v47, %v4548_v50 }
  0x1d   : > { %3948 = vmatprep.subr.bf16.mxu1 %v6665_v1  ;;  %v748_v62 = vrot.slane %v651_v47, %v4553_v52  ;;  %6707 = vst [vmem:[#allocation9_spill] sm:$0xff] %v4575_v63  ;;  %6708 = vst [vmem:[#allocation10_spill] sm:$0xff] %v4578_v0  ;;  %v1853_v5 = vrot.slane %v3662_v48, %v4545_v49  ;;  %v1869_v6 = vrot.slane %v3662_v48, %v4548_v50 }
  0x1e   : > { %3929 = vmatpush3.bf16.msra.mxu0 %v4195_v4  ;;  %vm684_vm6 = vcmp.lt.s32.totalorder %v4562_v57, 15  ;;  %v673_v7 = vrot.slane %v651_v47, %v4565_v58  ;;  %v1837_v8 = vrot.slane %v3662_v48, %v4565_v58  ;;  %v4602_v16 = vrot.slane %v651_v47, %v4578_v0 }
  0x1f   : > { %3930 = vmatprep.subr.bf16.mxu0 %v6665_v1  ;;  %vm1128_vm7 = vcmp.lt.s32.totalorder %v4533_v45, 2  ;;  %vm1131_vm8 = vcmp.ge.s32.totalorder %v4533_v45, 2  ;;  %vm1153_vm9 = vcmp.lt.s32.totalorder %v4533_v45, 6  ;;  %vm1157_vm10 = vcmp.lt.s32.totalorder %v4562_v57, 14  ;;  %v3368_v45 = vld [vmem:[%s6663_s8] sm:$0xff]  ;;  %v3369_v57 = vld [vmem:[%s6663_s8 + $0x8] sm:$0xff] }
  0x20   : > { %3949 = vmatpush3.bf16.msra.mxu1 %v4208_v31  ;;  %vm591_vm11 = vcmp.ge.s32.totalorder %v4550_v51, 16  ;;  %vm612_vm12 = vcmp.lt.s32.totalorder %v4550_v51, 112 }
  0x21   : > { %3950 = vmatprep.subr.bf16.mxu1 %v6665_v1 }
  0x22   : > { %3931 = vmatpush3.bf16.msra.mxu0 %v4196_v9 }
  0x23   : > { %3932 = vmatprep.subr.bf16.mxu0 %v6665_v1 }
  0x24   : > { %3951 = vmatpush3.bf16.msra.mxu1 %v4210_v33 }
  0x25   : > { %3952 = vmatprep.subr.bf16.mxu1 %v6665_v1 }
  0x26   : > { %3933 = vmatpush3.bf16.msra.mxu0 %v4197_v10  ;;  %v4593_v10 = vrot.slane %v651_v47, %v4570_v61 }
  0x27   : > { %3934 = vmatprep.subr.bf16.mxu0 %v6665_v1 }
  0x28   : > { %3953 = vmatpush3.bf16.msra.mxu1 %v4212_v35 }
  0x29   : > { %3954 = vmatprep.subr.bf16.mxu1 %v6665_v1 }
  0x2a   : > { %3935 = vmatpush3.bf16.msra.mxu0 %v4198_v11 }
  0x2b   : > { %3936 = vmatprep.subr.bf16.mxu0 %v6665_v1 }
  0x2c   : > { %3955 = vmatpush3.bf16.msra.mxu1 %v4214_v37 }
  0x2d   : > { %3956 = vmatprep.subr.bf16.mxu1 %v6665_v1 }
  0x2e   : > { %3937 = vmatpush3.bf16.msra.mxu0 %v4199_v12 }
  0x2f   : > { %3962 = vmatprep.subr.bf16.mxu0 %v6665_v1 }
  0x30   : > { %3957 = vmatpush3.bf16.msra.mxu1 %v4215_v42 }
  0x31   : > { %3939 = vmatmul.mubr.bf16.vlgmr.msra.gmra.mxu0 %v373_v13  ;;  %3982 = vmatprep.subr.bf16.mxu1 %v6665_v1 }
  0x32   : > { %3978 = vmatprep.mubr.msk.bf16.mxu0 %vm4313_vm0, %v6665_v1  ;;  %3963 = vmatpush3.bf16.msra.mxu0 %v4200_v14  ;;  %v4598_v14 = vrot.slane %v3662_v48, %v4570_v61 }
  0x33   : > { %3964 = vmatprep.subr.bf16.mxu0 %v6665_v1  ;;  %3959 = vmatmul.mubr.bf16.vlgmr.msra.gmra.mxu1 %v488_v43 }
  0x34   : > { %3998 = vmatprep.mubr.msk.bf16.mxu1 %vm4313_vm0, %v6665_v1 }
  0x36   : > { %3965 = vmatpush3.bf16.msra.mxu0 %v4201_v15  ;;  %v665_v15 = vrot.slane %v651_v47, %v4575_v63 }
  0x37   : > { %3966 = vmatprep.subr.bf16.mxu0 %v6665_v1 }
  0x3a   : > { %3967 = vmatpush3.bf16.msra.mxu0 %v4203_v17 }
  0x3b   : > { %3968 = vmatprep.subr.bf16.mxu0 %v6665_v1 }
  0x3e   : > { %3969 = vmatpush3.bf16.msra.mxu0 %v4205_v23 }
  0x3f   : > { %3970 = vmatprep.subr.bf16.mxu0 %v6665_v1 }
  0x42   : > { %3971 = vmatpush3.bf16.msra.mxu0 %v4207_v29 }
  0x43   : > { %3972 = vmatprep.subr.bf16.mxu0 %v6665_v1 }
  0x46   : > { %3973 = vmatpush3.bf16.msra.mxu0 %v4209_v32 }
  0x47   : > { %3974 = vmatprep.subr.bf16.mxu0 %v6665_v1 }
  0x4a   : > { %3975 = vmatpush3.bf16.msra.mxu0 %v4211_v34 }
  0x4b   : > { %3976 = vmatprep.subr.bf16.mxu0 %v6665_v1 }
  0x4e   : > { %3977 = vmatpush3.bf16.msra.mxu0 %v4213_v36 }
  0x4f   : > { %4002 = vmatprep.subr.bf16.mxu0 %v6665_v1 }
  0xf1   : > { %v461_v19 = vpop.f32.mrf.mxu0 }
  0xf2   : > { %v462_v20 = vadd.f32 %v3520_v18, %v461_v19  ;;  %v1829_v19 = vrot.slane %v3662_v48, %v4575_v63 }
  0xf3   : > { %v3940_v21 = vpop.f32.mrf.mxu0 }
  0xf4   : > { %v4472_v24 = vmax.f32 %v462_v20, 0.0  ;;  %v1845_v20 = vrot.slane %v3662_v48, %v4578_v0 }
  0xf5   : > { %v464_v25 = vpop.f32.mrf.mxu0 }
  0xf6   : > { %v465_v26 = vadd.f32 %v3520_v18, %v464_v25  ;;  %601 = vrot.lane.b32.xlu1 %v4472_v24, %s4314_s27  ;;  %594 = vrot.lane.b32.xlu0 %v4472_v24, %s4315_s28  ;;  %v695_v60 = vrot.slane %v4472_v24, 7  ;;  %v717_v9 = vrot.slane %v4472_v24, 1  ;;  %v4611_v21 = vmul.f32 %v712_v54, %v4472_v24 }
  0xf7   : > { %v3941_v27 = vpop.f32.mrf.mxu0  ;;  %v4614_v22 = vmul.f32 %v1861_v55, %v4472_v24 }
  0xf8   : > { %v4486_v30 = vmax.f32 %v465_v26, 0.0 }
  0xfa   : > { %603 = vrot.lane.b32.xlu1 %v4486_v30, %s4314_s27  ;;  %596 = vrot.lane.b32.xlu0 %v4486_v30, %s4315_s28  ;;  %v696_v53 = vrot.slane %v4486_v30, 7  ;;  %v718_v4 = vrot.slane %v4486_v30, 1  ;;  %v4617_v23 = vmul.f32 %v712_v54, %v4486_v30  ;;  %v4626_v36 = vmul.f32 %v1861_v55, %v4486_v30 }
  0xfc   : > { %v698_v3 = vsel %vm655_vm1, %v696_v53, %v695_v60  ;;  %v719_v18 = vsel %vm680_vm2, %v717_v9, %v718_v4  ;;  %v720_v25 = vsel %vm680_vm2, %v718_v4, %v717_v9  ;;  %v697_v29 = vsel %vm655_vm1, %v695_v60, %v696_v53 }
  0xfd   : > { %v699_v13 = vsel %vm658_vm4, %v698_v3, 0.0  ;;  %v1870_v33 = vmul.f32 %v1869_v6, %v719_v18  ;;  %v722_v40 = vsel %vm684_vm6, %v720_v25, 0.0  ;;  %v727_v41 = vmul.f32 %v726_v59, %v719_v18 }
  0xfe   : > { %v1854_v28 = vmul.f32 %v1853_v5, %v699_v13  ;;  %v705_v32 = vmul.f32 %v704_v56, %v699_v13  ;;  %v706_v43 = vmul.f32 %v704_v56, %v697_v29  ;;  %v1855_v44 = vmul.f32 %v1853_v5, %v697_v29 }
  0xff   : > { %v728_v3 = vmul.f32 %v726_v59, %v722_v40  ;;  %v1871_v4 = vmul.f32 %v1869_v6, %v722_v40 }
 0x168   : > { %v602_v11 = vpop.permute.xlu1 %601  ;;  %v595_v12 = vpop.permute.xlu0 %594 }
 0x169   : > { %v599_v17 = vsel %vm598_vm5, %v595_v12, 0.0  ;;  %v606_v31 = vsel %vm605_vm3, %v602_v11, 0.0 }
 0x16a   : > { %v674_v26 = vmul.f32 %v673_v7, %v599_v17  ;;  %v1838_v27 = vmul.f32 %v1837_v8, %v599_v17  ;;  %v1886_v47 = vmul.f32 %v1885_v2, %v606_v31  ;;  %v731_v55 = vrot.slane %v606_v31, 7 }
 0x16b   : > { %v749_v9 = vmul.f32 %v748_v62, %v606_v31  ;;  %v753_v11 = vrot.slane %v606_v31, 1  ;;  %v653_v12 = vrot.slane %v599_v17, 7 }
 0x16c   : > { %v604_v34 = vpop.permute.xlu1 %603  ;;  %v597_v35 = vpop.permute.xlu0 %596  ;;  %v1856_v37 = vadd.f32 %v1854_v28, %v1838_v27  ;;  %v707_v48 = vadd.f32 %v705_v32, %v674_v26  ;;  %v678_v27 = vrot.slane %v599_v17, 1 }
 0x16d   : > { %v607_v38 = vsel %vm605_vm3, %v604_v34, 0.0  ;;  %v600_v39 = vsel %vm598_vm5, %v597_v35, 0.0 }
 0x16e   : > { %v732_v42 = vrot.slane %v607_v38, 7  ;;  %v1872_v53 = vadd.f32 %v1870_v33, %v1856_v37  ;;  %v754_v54 = vrot.slane %v607_v38, 1  ;;  %v654_v60 = vrot.slane %v600_v39, 7 }
 0x16f   : > { %v750_v18 = vmul.f32 %v748_v62, %v607_v38  ;;  %v1887_v28 = vmul.f32 %v1885_v2, %v607_v38  ;;  %v729_v56 = vadd.f32 %v727_v41, %v707_v48  ;;  %v675_v29 = vmul.f32 %v673_v7, %v600_v39 }
 0x170   : > { %v1888_v13 = vadd.f32 %v1886_v47, %v1872_v53  ;;  %v734_v25 = vsel %vm655_vm1, %v732_v42, %v731_v55  ;;  %v733_v5 = vsel %vm655_vm1, %v731_v55, %v732_v42  ;;  %v755_v26 = vsel %vm680_vm2, %v753_v11, %v754_v54 }
 0x171   : > { %v756_v59 = vsel %vm680_vm2, %v754_v54, %v753_v11  ;;  %v656_v6 = vsel %vm655_vm1, %v653_v12, %v654_v60  ;;  %v657_v17 = vsel %vm655_vm1, %v654_v60, %v653_v12  ;;  %v679_v31 = vrot.slane %v600_v39, 1  ;;  %v3538_v60 = vld [vmem:[%s6661_s6 + $0x8] ss:$0 sm:$0xff] }
 0x172   : > { %v735_v62 = vsel %vm658_vm4, %v734_v25, 0.0  ;;  %v660_v2 = vsel %vm658_vm4, %v657_v17, 0.0  ;;  %v667_v32 = vmul.f32 %v665_v15, %v656_v6  ;;  %v1839_v33 = vmul.f32 %v1837_v8, %v600_v39 }
 0x173   : > { %v666_v34 = vmul.f32 %v665_v15, %v660_v2  ;;  %v681_v7 = vsel %vm680_vm2, %v678_v27, %v679_v31  ;;  %v682_v35 = vsel %vm680_vm2, %v679_v31, %v678_v27  ;;  %v1831_v37 = vmul.f32 %v1829_v19, %v656_v6 }
 0x174   : > { %v686_v38 = vsel %vm684_vm6, %v682_v35, 0.0  ;;  %v691_v40 = vmul.f32 %v4602_v16, %v681_v7  ;;  %v1830_v41 = vmul.f32 %v1829_v19, %v660_v2  ;;  %v1846_v42 = vmul.f32 %v1845_v20, %v681_v7  ;;  %v3664_v19 = vld [vmem:[%s6661_s6 + $0x58] ss:$0 sm:$0xff] }
 0x175   : > { %v692_v47 = vmul.f32 %v4602_v16, %v686_v38  ;;  %v708_v48 = vadd.f32 %v706_v43, %v675_v29  ;;  %v1847_v53 = vmul.f32 %v1845_v20, %v686_v38  ;;  %v1857_v8 = vadd.f32 %v1855_v44, %v1839_v33 }
 0x176   : > { %v741_v15 = vmul.f32 %v4593_v10, %v735_v62  ;;  %v742_v39 = vmul.f32 %v4593_v10, %v733_v5  ;;  %v693_v54 = vadd.f32 %v691_v40, %v666_v34  ;;  %v1848_v55 = vadd.f32 %v1846_v42, %v1830_v41  ;;  %v4217_v40 = vld [vmem:[%s6659_s4 + $0x70] sm:$0xff]   ;;  %v4218_v41 = vld [vmem:[%s6659_s4 + $0x68] sm:$0xff]   ;;  %v4219_v42 = vld [vmem:[%s6659_s4 + $0x60] sm:$0xff]  }
 0x177   : > { %v758_v16 = vsel %vm684_vm6, %v756_v59, 0.0  ;;  %v694_v43 = vadd.f32 %v692_v47, %v667_v32  ;;  %v1849_v20 = vadd.f32 %v1847_v53, %v1831_v37  ;;  %v1873_v44 = vadd.f32 %v1871_v4, %v1857_v8  ;;  %v3539_v47 = vld [vmem:[%s6660_s5 + $0x2] ss:$0 sm:$0xff]  ;;  %v4220_v53 = vld [vmem:[%s6659_s4 + $0x58] sm:$0xff]  }
 0x178   : > { %v1878_v11 = vmul.f32 %v4598_v14, %v735_v62  ;;  %v1879_v10 = vmul.f32 %v4598_v14, %v733_v5  ;;  %v715_v12 = vadd.f32 %v4611_v21, %v693_v54  ;;  %v1864_v27 = vadd.f32 %v4614_v22, %v1848_v55 }
 0x179   : > { %v716_v25 = vadd.f32 %v4617_v23, %v694_v43  ;;  %v730_v29 = vadd.f32 %v728_v3, %v708_v48  ;;  %v1865_v6 = vadd.f32 %v4626_v36, %v1849_v20  ;;  %v1889_v17 = vadd.f32 %v1887_v28, %v1873_v44  ;;  %v4221_v20 = vld [vmem:[%s6659_s4 + $0x50] sm:$0xff]  }
 0x17a   : > { %v763_v31 = vmul.f32 %v3538_v60, %v755_v26  ;;  %v1894_v2 = vmul.f32 %v3664_v19, %v755_v26  ;;  %v743_v59 = vadd.f32 %v741_v15, %v715_v12  ;;  %v1880_v32 = vadd.f32 %v1878_v11, %v1864_v27  ;;  %v3529_v15 = vld [vmem:[%s6660_s5 + $0x1] ss:$0 sm:$0xff] }
 0x17b   : > { %v764_v33 = vmul.f32 %v3538_v60, %v758_v16  ;;  %v1895_v4 = vmul.f32 %v3664_v19, %v758_v16  ;;  %v744_v34 = vadd.f32 %v742_v39, %v716_v25  ;;  %v1881_v62 = vadd.f32 %v1879_v10, %v1865_v6 }
 0x17c   : > { %v751_v7 = vadd.f32 %v749_v9, %v729_v56  ;;  %v765_v14 = vadd.f32 %v763_v31, %v743_v59  ;;  %v1896_v5 = vadd.f32 %v1894_v2, %v1880_v32  ;;  %v752_v21 = vadd.f32 %v750_v18, %v730_v29  ;;  %v576_v9 = vpop.f32.mrf.mxu1  ;;  %v4222_v59 = vld [vmem:[%s6659_s4 + $0x48] sm:$0xff]   ;;  %v4223_v32 = vld [vmem:[%s6659_s4 + $0xb8] sm:$0xff]  }
 0x17d   : > { %v766_v35 = vadd.f32 %v764_v33, %v744_v34  ;;  %v1897_v22 = vadd.f32 %v1895_v4, %v1881_v62  ;;  %v4710_v60 = vadd.f32 %v3529_v15, %v576_v9  ;;  %v4224_v33 = vld [vmem:[%s6659_s4 + $0x40] sm:$0xff]   ;;  %v4225_v4 = vld [vmem:[%s6659_s4 + $0xb0] sm:$0xff]   ;;  %v4227_v34 = vld [vmem:[%s6659_s4 + $0xa8] sm:$0xff]  }
 0x17e   : > { %v767_v37 = vadd.f32 %v765_v14, %v751_v7  ;;  %v4674_v23 = vadd.f32 %v1896_v5, %v1888_v13  ;;  %v3960_v56 = vpop.f32.mrf.mxu1  ;;  %v4216_v13 = vld [vmem:[%s6659_s4 + $0x78] sm:$0xff]   ;;  %v4229_v62 = vld [vmem:[%s6659_s4 + $0xa0] sm:$0xff]   ;;  %v4233_v14 = vld [vmem:[%s6659_s4 + $0x90] sm:$0xff]  }
 0x17f   : > { %v768_v3 = vadd.f32 %v766_v35, %v752_v21  ;;  %v4676_v36 = vadd.f32 %v1897_v22, %v1889_v17  ;;  %3983 = vmatpush3.bf16.msra.mxu1 %v4216_v13  ;;  %6711 = vst [vmem:[#allocation13_spill] sm:$0xff] %v4710_v60  ;;  %v4720_v44 = vmax.f32 %v4710_v60, 0.0  ;;  %v4231_v7 = vld [vmem:[%s6659_s4 + $0x98] sm:$0xff]   ;;  %v4235_v5 = vld [vmem:[%s6659_s4 + $0x88] sm:$0xff]   ;;  %v4237_v21 = vld [vmem:[%s6659_s4 + $0x80] sm:$0xff]   ;;  %v1169_v35 = vrot.slane %v4486_v30, 6 }
 0x180   : > { %6709 = vst [vmem:[#allocation11_spill] sm:$0xff] %v4674_v23  ;;  %v579_v38 = vpop.f32.mrf.mxu1  ;;  %3984 = vmatprep.subr.bf16.mxu1 %v6665_v1  ;;  %v4823_v22 = vld [vmem:[%s6661_s6 + $0x20] sm:$0xff] }
 0x181   : > { %6710 = vst [vmem:[#allocation12_spill] sm:$0xff] %v4676_v36  ;;  %v785_v28 = vpack.c.bf16 %v768_v3, %v767_v37  ;;  %v4722_v11 = vadd.f32 %v3529_v15, %v579_v38  ;;  %v1168_v37 = vrot.slane %v4472_v24, 6  ;;  %v4829_v3 = vld [vmem:[%s6661_s6 + $0x70] sm:$0xff]  ;;  %v1185_v56 = vrot.slane %v4823_v22, %v4536_v46 }
 0x182   : > { %v3961_v18 = vpop.f32.mrf.mxu1  ;;  %v1177_v38 = vrot.slane %v4823_v22, %v4545_v49  ;;  %v3161_v13 = vrot.slane %v4829_v3, %v4536_v46 }
 0x183   : > { %3979 = vmatmul.mubr.bf16.vlgmr.msra.gmra.mxu0 %v785_v28  ;;  %3985 = vmatpush3.bf16.msra.mxu1 %v4217_v40  ;;  %6712 = vst [vmem:[#allocation14_spill] sm:$0xff] %v4722_v11  ;;  %v4750_v2 = vmax.f32 %v4722_v11, 0.0  ;;  %v1191_v28 = vrot.slane %v4486_v30, 2  ;;  %v1171_v9 = vsel %vm1128_vm7, %v1169_v35, %v1168_v37  ;;  %v1190_v18 = vrot.slane %v4472_v24, 2 }
 0x184   : > { %4018 = vmatprep.mubr.msk.bf16.mxu0 %vm4313_vm0, %v6665_v1  ;;  %3986 = vmatprep.subr.bf16.mxu1 %v6665_v1  ;;  %v1393_v40 = vrot.slane %v4720_v44, 7  ;;  %v4857_v15 = vmul.f32 %v1185_v56, %v4472_v24 }
 0x185   : > { %4003 = vmatpush3.bf16.msra.mxu0 %v4223_v32  ;;  %v2372_v32 = vrot.slane %v4750_v2, 6 }
 0x186   : > { %4004 = vmatprep.subr.bf16.mxu0 %v6665_v1  ;;  %6713 = vst [vmem:[#allocation15_spill] sm:$0xff] %v4857_v15 }
 0x187   : > { %3987 = vmatpush3.bf16.msra.mxu1 %v4218_v41  ;;  %v1394_v41 = vrot.slane %v4750_v2, 7 }
 0x188   : > { %3988 = vmatprep.subr.bf16.mxu1 %v6665_v1 }
 0x189   : > { %4005 = vmatpush3.bf16.msra.mxu0 %v4225_v4 }
 0x18a   : > { %4006 = vmatprep.subr.bf16.mxu0 %v6665_v1 }
 0x18b   : > { %3989 = vmatpush3.bf16.msra.mxu1 %v4219_v42  ;;  %v1199_v42 = vrot.slane %v4823_v22, %v4548_v50 }
 0x18c   : > { %3990 = vmatprep.subr.bf16.mxu1 %v6665_v1 }
 0x18d   : > { %4007 = vmatpush3.bf16.msra.mxu0 %v4227_v34 }
 0x18e   : > { %4008 = vmatprep.subr.bf16.mxu0 %v6665_v1 }
 0x18f   : > { %3991 = vmatpush3.bf16.msra.mxu1 %v4220_v53  ;;  %v3153_v53 = vrot.slane %v4829_v3, %v4545_v49 }
 0x190   : > { %3992 = vmatprep.subr.bf16.mxu1 %v6665_v1 }
 0x191   : > { %4009 = vmatpush3.bf16.msra.mxu0 %v4229_v62  ;;  %v4901_v62 = vld [vmem:[%s6662_s7] sm:$0xff] }
 0x192   : > { %4010 = vmatprep.subr.bf16.mxu0 %v6665_v1  ;;  %v5102_v15 = vrot.slane %v4901_v62, %v4575_v63 }
 0x193   : > { %3993 = vmatpush3.bf16.msra.mxu1 %v4221_v20  ;;  %v4870_v20 = vmul.f32 %v3161_v13, %v4486_v30 }
 0x194   : > { %3994 = vmatprep.subr.bf16.mxu1 %v6665_v1 }
 0x195   : > { %4011 = vmatpush3.bf16.msra.mxu0 %v4231_v7  ;;  %6716 = vst [vmem:[#allocation18_spill] sm:$0xff] %v4870_v20  ;;  %v2409_v7 = vrot.slane %v4720_v44, 2 }
 0x196   : > { %4012 = vmatprep.subr.bf16.mxu0 %v6665_v1 }
 0x197   : > { %3995 = vmatpush3.bf16.msra.mxu1 %v4222_v59  ;;  %v4888_v59 = vld [vmem:[%s6661_s6 + $0x30] sm:$0xff] }
 0x198   : > { %3996 = vmatprep.subr.bf16.mxu1 %v6665_v1  ;;  %v1402_v34 = vrot.slane %v4888_v59, %v4545_v49  ;;  %v1410_v23 = vrot.slane %v4888_v59, %v4536_v46 }
 0x199   : > { %4013 = vmatpush3.bf16.msra.mxu0 %v4233_v14  ;;  %v2410_v14 = vrot.slane %v4750_v2, 2 }
 0x19a   : > { %4014 = vmatprep.subr.bf16.mxu0 %v6665_v1 }
 0x19b   : > { %3997 = vmatpush3.bf16.msra.mxu1 %v4224_v33 }
 0x19c   : > { %4022 = vmatprep.subr.bf16.mxu1 %v6665_v1 }
 0x19d   : > { %4015 = vmatpush3.bf16.msra.mxu0 %v4235_v5 }
 0x19e   : > { %4016 = vmatprep.subr.bf16.mxu0 %v6665_v1 }
 0x1a1   : > { %4017 = vmatpush3.bf16.msra.mxu0 %v4237_v21 }
 0x1a2   : > { %4042 = vmatprep.subr.bf16.mxu0 %v6665_v1  ;;  %v2380_v1 = vrot.slane %v4901_v62, %v4570_v61 }
 0x243   : > { %v873_v48 = vpop.f32.mrf.mxu0 }
 0x244   : > { %v874_v8 = vadd.f32 %v3539_v47, %v873_v48  ;;  %v1172_v48 = vsel %vm1131_vm8, %v1171_v9, 0.0  ;;  %v1416_v9 = vrot.slane %v4750_v2, 1 }
 0x245   : > { %v3980_v39 = vpop.f32.mrf.mxu0  ;;  %v4892_v33 = vmul.f32 %v3153_v53, %v1172_v48 }
 0x246   : > { %v4707_v54 = vmax.f32 %v874_v8, 0.0  ;;  %v1192_v8 = vsel %vm1153_vm9, %v1190_v18, %v1191_v28  ;;  %v1193_v39 = vsel %vm1153_vm9, %v1191_v28, %v1190_v18  ;;  %v1415_v28 = vrot.slane %v4720_v44, 1  ;;  %v4925_v18 = vld [vmem:[%s6662_s7 + $0x10] sm:$0xff] }
 0x247   : > { %v876_v55 = vpop.f32.mrf.mxu0  ;;  %v1195_v4 = vsel %vm1157_vm10, %v1193_v39, 0.0  ;;  %v2388_v39 = vrot.slane %v4901_v62, %v4548_v50  ;;  %v2418_v11 = vrot.slane %v4925_v18, %v4578_v0 }
 0x248   : > { %v877_v19 = vadd.f32 %v3539_v47, %v876_v55  ;;  %882 = vrot.lane.b32.xlu0 %v4707_v54, %s4315_s28  ;;  %v955_v10 = vrot.slane %v4707_v54, 1  ;;  %v933_v27 = vrot.slane %v4707_v54, 7  ;;  %v3169_v47 = vrot.slane %v4829_v3, %v4548_v50 }
 0x249   : > { %v3981_v16 = vpop.f32.mrf.mxu0  ;;  %v1170_v55 = vsel %vm1128_vm7, %v1168_v37, %v1169_v35  ;;  %v4912_v35 = vld [vmem:[%s6662_s7 + $0x8] sm:$0xff]  ;;  %v1418_v60 = vsel %vm680_vm2, %v1416_v9, %v1415_v28  ;;  %v1417_v20 = vsel %vm680_vm2, %v1415_v28, %v1416_v9 }
 0x24a   : > { %v4714_v43 = vmax.f32 %v877_v19, 0.0  ;;  %v4864_v19 = vmul.f32 %v3161_v13, %v4472_v24  ;;  %v4867_v16 = vmul.f32 %v1185_v56, %v4486_v30  ;;  %v4905_v5 = vmul.f32 %v1177_v38, %v1170_v55 }
 0x24b   : > { %v4914_v37 = vmul.f32 %v3153_v53, %v1170_v55  ;;  %v4927_v13 = vmul.f32 %v1199_v42, %v1195_v4 }
 0x24c   : > { %v956_v12 = vrot.slane %v4714_v43, 1  ;;  %888 = vrot.lane.b32.xlu0 %v4707_v54, %s4314_s27  ;;  %884 = vrot.lane.b32.xlu1 %v4714_v43, %s4315_s28  ;;  %v934_v25 = vrot.slane %v4714_v43, 7  ;;  %6714 = vst [vmem:[#allocation16_spill] sm:$0xff] %v4864_v19  ;;  %6715 = vst [vmem:[#allocation17_spill] sm:$0xff] %v4867_v16 }
 0x24d   : > { %6719 = vst [vmem:[#allocation21_spill] sm:$0xff] %v4905_v5  ;;  %6720 = vst [vmem:[#allocation22_spill] sm:$0xff] %v4914_v37 }
 0x24e   : > { %v4734_v29 = vsel %vm655_vm1, %v934_v25, %v933_v27  ;;  %v4738_v6 = vsel %vm680_vm2, %v955_v10, %v956_v12  ;;  %v4742_v17 = vsel %vm655_vm1, %v933_v27, %v934_v25  ;;  %v4746_v31 = vsel %vm680_vm2, %v956_v12, %v955_v10  ;;  %6721 = vst [vmem:[#allocation23_spill] sm:$0xff] %v4927_v13 }
 0x24f   : > { %v1396_v10 = vsel %vm655_vm1, %v1394_v41, %v1393_v40  ;;  %v4874_v12 = vmul.f32 %v1177_v38, %v1172_v48  ;;  %v4876_v27 = vmul.f32 %v1199_v42, %v1192_v8  ;;  %v4878_v25 = vmul.f32 %v3169_v47, %v1192_v8 }
 0x250   : > { %621 = vrot.lane.b32.xlu0 %v4720_v44, %s4315_s28  ;;  %890 = vrot.lane.b32.xlu1 %v4714_v43, %s4314_s27  ;;  %v1397_v21 = vsel %vm658_vm4, %v1396_v10, 0.0  ;;  %v4929_v48 = vmul.f32 %v3169_v47, %v1195_v4  ;;  %v1395_v42 = vsel %vm655_vm1, %v1393_v40, %v1394_v41  ;;  %v2396_v47 = vrot.slane %v4912_v35, %v4536_v46 }
 0x251   : > { %6717 = vst [vmem:[#allocation19_spill] sm:$0xff] %v4876_v27  ;;  %6718 = vst [vmem:[#allocation20_spill] sm:$0xff] %v4878_v25  ;;  %v4941_v10 = vmul.f32 %v1402_v34, %v1397_v21  ;;  %v2412_v4 = vsel %vm1153_vm9, %v2410_v14, %v2409_v7  ;;  %v2411_v41 = vsel %vm1153_vm9, %v2409_v7, %v2410_v14 }
 0x252   : > { %6722 = vst [vmem:[#allocation24_spill] sm:$0xff] %v4929_v48  ;;  %v2414_v36 = vsel %vm1157_vm10, %v2412_v4, 0.0  ;;  %v4973_v16 = vmul.f32 %v1402_v34, %v1395_v42  ;;  %v4975_v7 = vmul.f32 %v2388_v39, %v1395_v42  ;;  %v4978_v14 = vmul.f32 %v2396_v47, %v4720_v44 }
 0x253   : > { %v4987_v4 = vmul.f32 %v2396_v47, %v4750_v2  ;;  %v4989_v28 = vmul.f32 %v2418_v11, %v2411_v41  ;;  %v4991_v9 = vmul.f32 %v2418_v11, %v2414_v36  ;;  %v4994_v34 = vmul.f32 %v1410_v23, %v4720_v44 }
 0x254   : > { %627 = vrot.lane.b32.xlu0 %v4720_v44, %s4314_s27  ;;  %623 = vrot.lane.b32.xlu1 %v4750_v2, %s4315_s28  ;;  %6724 = vst [vmem:[#allocation26_spill] sm:$0xff] %v4975_v7  ;;  %6725 = vst [vmem:[#allocation27_spill] sm:$0xff] %v4978_v14  ;;  %v937_v36 = vsel %vm658_vm4, %v4734_v29, 0.0  ;;  %v960_v11 = vsel %vm684_vm6, %v4746_v31, 0.0  ;;  %v5030_v29 = vrot.slane %v4912_v35, %v4565_v58 }
 0x255   : > { %6727 = vst [vmem:[#allocation29_spill] sm:$0xff] %v4987_v4  ;;  %6728 = vst [vmem:[#allocation30_spill] sm:$0xff] %v4989_v28  ;;  %v5086_v7 = vrot.slane %v4901_v62, %v4565_v58  ;;  %v5106_v48 = vrot.slane %v4901_v62, %v4553_v52 }
 0x256   : > { %6729 = vst [vmem:[#allocation31_spill] sm:$0xff] %v4991_v9  ;;  %6730 = vst [vmem:[#allocation32_spill] sm:$0xff] %v4994_v34  ;;  %v5124_v9 = vrot.slane %v4823_v22, %v4565_v58 }
 0x258   : > { %615 = vrot.lane.b32.xlu0 %v4720_v44, %s4316_s11  ;;  %629 = vrot.lane.b32.xlu1 %v4750_v2, %s4314_s27 }
 0x25c   : > { %633 = vrot.lane.b32.xlu0 %v4720_v44, %s4317_s18  ;;  %617 = vrot.lane.b32.xlu1 %v4750_v2, %s4316_s11 }
 0x260   : > { %587 = vrot.lane.b32.xlu0 %v4472_v24, %s4316_s11  ;;  %635 = vrot.lane.b32.xlu1 %v4750_v2, %s4317_s18 }
 0x264   : > { %608 = vrot.lane.b32.xlu0 %v4472_v24, %s4317_s18  ;;  %589 = vrot.lane.b32.xlu1 %v4486_v30, %s4316_s11  ;;  %v4883_v24 = vld [vmem:[%s6661_s6 + $0x10] sm:$0xff] }
 0x265   : > { %v950_v56 = vrot.slane %v4883_v24, %v4536_v46  ;;  %v942_v38 = vrot.slane %v4883_v24, %v4545_v49  ;;  %v4933_v53 = vrot.slane %v4883_v24, %v4565_v58  ;;  %v964_v8 = vrot.slane %v4883_v24, %v4548_v50 }
 0x267   : > { %v5037_v41 = vmul.f32 %v950_v56, %v4714_v43  ;;  %v965_v31 = vmul.f32 %v964_v8, %v4738_v6  ;;  %v5057_v6 = vrot.slane %v4912_v35, %v4553_v52 }
 0x268   : > { %610 = vrot.lane.b32.xlu1 %v4486_v30, %s4317_s18  ;;  %v2371_v30 = vrot.slane %v4720_v44, 6  ;;  %v928_v44 = vrot.slane %v4883_v24, %v4578_v0 }
 0x269   : > { %6736 = vst [vmem:[#allocation38_spill] sm:$0xff] %v5057_v6 }
 0x26a   : > { %v2374_v55 = vsel %vm1128_vm7, %v2372_v32, %v2371_v30  ;;  %v2373_v26 = vsel %vm1128_vm7, %v2371_v30, %v2372_v32  ;;  %v1424_v30 = vrot.slane %v4888_v59, %v4548_v50  ;;  %v4965_v32 = vmul.f32 %v2388_v39, %v1397_v21 }
 0x26b   : > { %v2375_v40 = vsel %vm1131_vm8, %v2374_v55, 0.0  ;;  %v2404_v55 = vrot.slane %v4925_v18, %v4545_v49  ;;  %v1420_v21 = vsel %vm684_vm6, %v1418_v60, 0.0  ;;  %v4984_v19 = vmul.f32 %v2380_v1, %v2373_v26 }
 0x26c   : > { %6723 = vst [vmem:[#allocation25_spill] sm:$0xff] %v4965_v32  ;;  %v4982_v32 = vmul.f32 %v2380_v1, %v2375_v40  ;;  %v4997_v39 = vmul.f32 %v1410_v23, %v4750_v2  ;;  %v4999_v42 = vmul.f32 %v1424_v30, %v1417_v20  ;;  %v5003_v60 = vrot.slane %v4883_v24, %v4553_v52 }
 0x26d   : > { %6726 = vst [vmem:[#allocation28_spill] sm:$0xff] %v4984_v19  ;;  %v5005_v1 = vmul.f32 %v1424_v30, %v1420_v21  ;;  %v5007_v26 = vmul.f32 %v2404_v55, %v1417_v20  ;;  %v5009_v47 = vmul.f32 %v2404_v55, %v1420_v21  ;;  %v906_v23 = vrot.slane %v4883_v24, %v4575_v63 }
 0x26e   : > { %6731 = vst [vmem:[#allocation33_spill] sm:$0xff] %v4997_v39  ;;  %6732 = vst [vmem:[#allocation34_spill] sm:$0xff] %v4999_v42  ;;  %v5022_v2 = vmul.f32 %v950_v56, %v4707_v54  ;;  %v5026_v20 = vrot.slane %v4888_v59, %v4565_v58  ;;  %v5034_v40 = vrot.slane %v4883_v24, %v4570_v61 }
 0x26f   : > { %6733 = vst [vmem:[#allocation35_spill] sm:$0xff] %v5005_v1  ;;  %6734 = vst [vmem:[#allocation36_spill] sm:$0xff] %v5007_v26  ;;  %v944_v54 = vmul.f32 %v942_v38, %v4742_v17  ;;  %v5043_v30 = vrot.slane %v4888_v59, %v4553_v52  ;;  %v943_v21 = vmul.f32 %v942_v38, %v937_v36 }
 0x270   : > { %6735 = vst [vmem:[#allocation37_spill] sm:$0xff] %v5009_v47  ;;  %v966_v47 = vmul.f32 %v964_v8, %v960_v11  ;;  %v5047_v26 = vrot.slane %v4888_v59, %v4575_v63  ;;  %v5051_v24 = vrot.slane %v4888_v59, %v4578_v0  ;;  %v5061_v17 = vrot.slane %v4901_v62, %v4545_v49 }
 0x271   : > { %v5065_v56 = vrot.slane %v4901_v62, %v4578_v0  ;;  %v5070_v8 = vrot.slane %v4925_v18, %v4575_v63  ;;  %v5074_v36 = vrot.slane %v4925_v18, %v4553_v52  ;;  %v5078_v11 = vrot.slane %v4888_v59, %v4570_v61 }
 0x272   : > { %v5090_v1 = vrot.slane %v4912_v35, %v4575_v63  ;;  %v5094_v42 = vrot.slane %v4925_v18, %v4570_v61  ;;  %v5098_v59 = vrot.slane %v4925_v18, %v4548_v50  ;;  %v5145_v19 = vrot.slane %v4925_v18, %v4565_v58 }
 0x274   : > { %6737 = vst [vmem:[#allocation39_spill] sm:$0xff] %v5098_v59  ;;  %v5120_v59 = vrot.slane %v4925_v18, %v4536_v46  ;;  %6739 = vst [vmem:[#allocation41_spill] sm:$0xff] %v5145_v19 }
 0x2ba   : > { %v883_v55 = vpop.permute.xlu0 %882 }
 0x2bb   : > { %v886_v43 = vsel %vm598_vm5, %v883_v55, 0.0  ;;  %v5082_v55 = vrot.slane %v4912_v35, %v4570_v61 }
 0x2bc   : > { %v915_v38 = vmul.f32 %v4933_v53, %v886_v43  ;;  %v897_v5 = vrot.slane %v886_v43, 7  ;;  %v919_v28 = vrot.slane %v886_v43, 1 }
 0x2be   : > { %v945_v39 = vadd.f32 %v943_v21, %v915_v38  ;;  %v885_v34 = vpop.permute.xlu1 %884  ;;  %v889_v13 = vpop.permute.xlu0 %888  ;;  %v5112_v21 = vrot.slane %v4912_v35, %v4578_v0  ;;  %v5116_v38 = vrot.slane %v4912_v35, %v4548_v50 }
 0x2bf   : > { %v887_v37 = vsel %vm598_vm5, %v885_v34, 0.0  ;;  %v5128_v34 = vrot.slane %v4829_v3, %v4565_v58  ;;  %v5133_v14 = vsel %vm605_vm3, %v889_v13, 0.0 }
 0x2c0   : > { %v967_v27 = vadd.f32 %v965_v31, %v945_v39  ;;  %v898_v4 = vrot.slane %v887_v37, 7  ;;  %v916_v25 = vmul.f32 %v4933_v53, %v887_v37  ;;  %v920_v50 = vrot.slane %v887_v37, 1 }
 0x2c1   : > { %v5137_v39 = vrot.slane %v4901_v62, %v4536_v46  ;;  %v5141_v31 = vrot.slane %v4912_v35, %v4545_v49  ;;  %v5161_v46 = vrot.slane %v4823_v22, %v4553_v52 }
 0x2c2   : > { %v899_v53 = vsel %vm655_vm1, %v897_v5, %v898_v4  ;;  %v900_v37 = vsel %vm655_vm1, %v898_v4, %v897_v5  ;;  %v921_v13 = vsel %vm680_vm2, %v919_v28, %v920_v50  ;;  %v922_v62 = vsel %vm680_vm2, %v920_v50, %v919_v28  ;;  %v622_v19 = vpop.permute.xlu0 %621 }
 0x2c3   : > { %6738 = vst [vmem:[#allocation40_spill] sm:$0xff] %v5141_v31  ;;  %v901_v35 = vsel %vm658_vm4, %v900_v37, 0.0  ;;  %v908_v43 = vmul.f32 %v906_v23, %v899_v53  ;;  %v924_v18 = vsel %vm684_vm6, %v922_v62, 0.0  ;;  %v929_v58 = vmul.f32 %v928_v44, %v921_v13  ;;  %v891_v31 = vpop.permute.xlu1 %890 }
 0x2c4   : > { %v907_v49 = vmul.f32 %v906_v23, %v901_v35  ;;  %v930_v5 = vmul.f32 %v928_v44, %v924_v18  ;;  %v946_v4 = vadd.f32 %v944_v54, %v916_v25  ;;  %v987_v50 = vmul.f32 %v5003_v60, %v5133_v14 }
 0x2c5   : > { %v5167_v28 = vrot.slane %v4829_v3, %v4553_v52  ;;  %v5171_v53 = vrot.slane %v4823_v22, %v4575_v63  ;;  %v5175_v37 = vrot.slane %v4823_v22, %v4578_v0  ;;  %v5179_v25 = vrot.slane %v4829_v3, %v4575_v63 }
 0x2c6   : > { %v932_v23 = vadd.f32 %v930_v5, %v908_v43  ;;  %v5183_v44 = vrot.slane %v4829_v3, %v4578_v0  ;;  %v5187_v54 = vrot.slane %v4823_v22, %v4570_v61  ;;  %v5191_v13 = vsel %vm598_vm5, %v622_v19, 0.0 }
 0x2c7   : > { %6740 = vst [vmem:[#allocation42_spill] sm:$0xff] %v5175_v37  ;;  %6741 = vst [vmem:[#allocation43_spill] sm:$0xff] %v5179_v25  ;;  %v893_v62 = vsel %vm605_vm3, %v891_v31, 0.0  ;;  %v968_v35 = vadd.f32 %v966_v47, %v946_v4  ;;  %v5197_v43 = vrot.slane %v4829_v3, %v4570_v61  ;;  %v969_v18 = vrot.slane %v5133_v14, 7  ;;  %v3550_v3 = vld [vmem:[%s6661_s6 + $0x18] ss:$0 sm:$0xff] }
 0x2c8   : > { %6742 = vst [vmem:[#allocation44_spill] sm:$0xff] %v5183_v44  ;;  %6743 = vst [vmem:[#allocation45_spill] sm:$0xff] %v5187_v54  ;;  %v991_v5 = vrot.slane %v5133_v14, 1  ;;  %v931_v0 = vadd.f32 %v929_v58, %v907_v49  ;;  %v970_v63 = vrot.slane %v893_v62, 7  ;;  %v5201_v22 = vadd.f32 %v987_v50, %v967_v27  ;;  %v624_v27 = vpop.permute.xlu1 %623 }
 0x2c9   : > { %6744 = vst [vmem:[#allocation46_spill] sm:$0xff] %v5197_v43  ;;  %v1357_v52 = vrot.slane %v5191_v13, 7  ;;  %v954_v19 = vadd.f32 %v5037_v41, %v932_v23  ;;  %v992_v54 = vrot.slane %v893_v62, 1  ;;  %v1375_v47 = vmul.f32 %v5026_v20, %v5191_v13  ;;  %v628_v23 = vpop.permute.xlu0 %627 }
 0x2ca   : > { %v1379_v31 = vrot.slane %v5191_v13, 1  ;;  %v971_v49 = vsel %vm655_vm1, %v969_v18, %v970_v63  ;;  %v972_v58 = vsel %vm655_vm1, %v970_v63, %v969_v18  ;;  %v988_v4 = vmul.f32 %v5003_v60, %v893_v62 }
 0x2cb   : > { %v973_v14 = vsel %vm658_vm4, %v972_v58, 0.0  ;;  %v980_v41 = vmul.f32 %v5034_v40, %v971_v49  ;;  %v994_v50 = vsel %vm680_vm2, %v992_v54, %v991_v5  ;;  %v953_v61 = vadd.f32 %v5022_v2, %v931_v0 }
 0x2cc   : > { %v2319_v43 = vrot.slane %v5191_v13, 6  ;;  %v979_v44 = vmul.f32 %v5034_v40, %v973_v14  ;;  %v996_v63 = vsel %vm684_vm6, %v994_v50, 0.0  ;;  %v5228_v18 = vmul.f32 %v5030_v29, %v5191_v13 }
 0x2cd   : > { %v982_v49 = vadd.f32 %v980_v41, %v954_v19  ;;  %v1002_v58 = vmul.f32 %v3550_v3, %v996_v63  ;;  %v626_v60 = vsel %vm598_vm5, %v624_v27, 0.0  ;;  %v2357_v0 = vrot.slane %v5191_v13, 2 }
 0x2ce   : > { %v5236_v2 = vsel %vm605_vm3, %v628_v23, 0.0  ;;  %v1358_v40 = vrot.slane %v626_v60, 7  ;;  %v1380_v62 = vrot.slane %v626_v60, 1  ;;  %v5239_v14 = vadd.f32 %v4941_v10, %v1375_v47 }
 0x2cf   : > { %v990_v50 = vadd.f32 %v988_v4, %v968_v35  ;;  %v1004_v25 = vadd.f32 %v1002_v58, %v982_v49  ;;  %v1429_v19 = vrot.slane %v5236_v2, 7  ;;  %v981_v41 = vadd.f32 %v979_v44, %v953_v61 }
 0x2d0   : > { %6745 = vst [vmem:[#allocation47_spill] sm:$0xff] %v5239_v14  ;;  %v993_v27 = vsel %vm680_vm2, %v991_v5, %v992_v54  ;;  %v1360_v13 = vsel %vm655_vm1, %v1358_v40, %v1357_v52  ;;  %v2320_v63 = vrot.slane %v626_v60, 6  ;;  %v1381_v10 = vsel %vm680_vm2, %v1379_v31, %v1380_v62 }
 0x2d1   : > { %v5246_v37 = vadd.f32 %v1004_v25, %v990_v50  ;;  %v1361_v23 = vsel %vm658_vm4, %v1360_v13, 0.0  ;;  %v1382_v35 = vsel %vm680_vm2, %v1380_v62, %v1379_v31  ;;  %v5256_v61 = vmul.f32 %v5043_v30, %v5236_v2  ;;  %v630_v31 = vpop.permute.xlu1 %629 }
 0x2d2   : > { %v1451_v44 = vrot.slane %v5236_v2, 1  ;;  %v2423_v54 = vrot.slane %v5236_v2, 6  ;;  %v2358_v5 = vrot.slane %v626_v60, 2  ;;  %v1001_v25 = vmul.f32 %v3550_v3, %v993_v27  ;;  %v616_v27 = vpop.permute.xlu0 %615 }
 0x2d3   : > { %6746 = vst [vmem:[#allocation48_spill] sm:$0xff] %v5256_v61  ;;  %v5262_v47 = vsel %vm655_vm1, %v1357_v52, %v1358_v40  ;;  %v1376_v4 = vmul.f32 %v5026_v20, %v626_v60  ;;  %v1384_v49 = vsel %vm684_vm6, %v1382_v35, 0.0  ;;  %v5269_v58 = vmul.f32 %v5057_v6, %v5236_v2 }
 0x2d4   : > { %v1367_v62 = vmul.f32 %v5047_v26, %v1361_v23  ;;  %v1389_v50 = vmul.f32 %v5051_v24, %v1381_v10  ;;  %v2322_v3 = vsel %vm1128_vm7, %v2320_v63, %v2319_v43  ;;  %v5275_v52 = vadd.f32 %v1001_v25, %v981_v41 }
 0x2d5   : > { %6747 = vst [vmem:[#allocation49_spill] sm:$0xff] %v5269_v58  ;;  %v2461_v20 = vrot.slane %v5236_v2, 2  ;;  %v2321_v40 = vsel %vm1128_vm7, %v2319_v43, %v2320_v63  ;;  %v5281_v13 = vmul.f32 %v5030_v29, %v626_v60  ;;  %v1368_v35 = vmul.f32 %v5047_v26, %v5262_v47 }
 0x2d6   : > { %v1390_v58 = vmul.f32 %v5051_v24, %v1384_v49  ;;  %v2360_v6 = vsel %vm1153_vm9, %v2358_v5, %v2357_v0  ;;  %v5291_v41 = vsel %vm605_vm3, %v630_v31, 0.0  ;;  %v5294_v2 = vadd.f32 %v4973_v16, %v1376_v4 }
 0x2d7   : > { %6748 = vst [vmem:[#allocation50_spill] sm:$0xff] %v5291_v41  ;;  %v2323_v29 = vsel %vm1131_vm8, %v2322_v3, 0.0  ;;  %v5299_v43 = vmul.f32 %v5065_v56, %v1361_v23  ;;  %v2359_v26 = vsel %vm1153_vm9, %v2357_v0, %v2358_v5  ;;  %v5303_v24 = vadd.f32 %v1389_v50, %v1367_v62 }
 0x2d8   : > { %6749 = vst [vmem:[#allocation51_spill] sm:$0xff] %v5294_v2  ;;  %v5306_v60 = vmul.f32 %v5061_v17, %v2321_v40  ;;  %v5310_v63 = vsel %vm591_vm11, %v616_v27, 0.0  ;;  %v1430_v16 = vrot.slane %v5291_v41, 7  ;;  %v5314_v25 = vmul.f32 %v5070_v8, %v1381_v10  ;;  %v634_v10 = vpop.permute.xlu0 %633 }
 0x2d9   : > { %v2362_v23 = vsel %vm1157_vm10, %v2360_v6, 0.0  ;;  %v1452_v4 = vrot.slane %v5291_v41, 1  ;;  %v2424_v0 = vrot.slane %v5291_v41, 6  ;;  %v5320_v5 = vadd.f32 %v1390_v58, %v1368_v35  ;;  %v618_v35 = vpop.permute.xlu1 %617 }
 0x2da   : > { %v5323_v31 = vmul.f32 %v5061_v17, %v2323_v29  ;;  %v5326_v62 = vmul.f32 %v5070_v8, %v1384_v49  ;;  %v5329_v50 = vmul.f32 %v5074_v36, %v2359_v26  ;;  %v2255_v3 = vrot.slane %v5310_v63, 6 }
 0x2db   : > { %v2269_v6 = vrot.slane %v5310_v63, 7  ;;  %v2287_v27 = vmul.f32 %v5082_v55, %v5310_v63  ;;  %v1432_v58 = vsel %vm655_vm1, %v1430_v16, %v1429_v19  ;;  %v5338_v17 = vmul.f32 %v5074_v36, %v2362_v23 }
 0x2dc   : > { %v1431_v8 = vsel %vm655_vm1, %v1429_v19, %v1430_v16  ;;  %v1454_v49 = vsel %vm680_vm2, %v1452_v4, %v1451_v44  ;;  %v2426_v40 = vsel %vm1128_vm7, %v2424_v0, %v2423_v54  ;;  %v2291_v29 = vrot.slane %v5310_v63, 1 }
 0x2dd   : > { %v2425_v26 = vsel %vm1128_vm7, %v2423_v54, %v2424_v0  ;;  %v2427_v61 = vsel %vm1131_vm8, %v2426_v40, 0.0  ;;  %v2462_v36 = vrot.slane %v5291_v41, 2  ;;  %v2305_v23 = vrot.slane %v5310_v63, 2 }
 0x2de   : > { %v5355_v19 = vsel %vm658_vm4, %v1432_v58, 0.0  ;;  %v5359_v16 = vmul.f32 %v5043_v30, %v5291_v41  ;;  %v5363_v2 = vsel %vm612_vm12, %v634_v10, 0.0  ;;  %v5366_v54 = vmul.f32 %v5078_v11, %v1431_v8 }
 0x2df   : > { %v5370_v0 = vsel %vm680_vm2, %v1451_v44, %v1452_v4  ;;  %v5374_v63 = vsel %vm684_vm6, %v1454_v49, 0.0  ;;  %v5378_v58 = vmul.f32 %v5090_v1, %v5355_v19  ;;  %v5381_v30 = vmul.f32 %v5086_v7, %v2427_v61  ;;  %v588_v4 = vpop.permute.xlu0 %587 }
 0x2e0   : > { %6750 = vst [vmem:[#allocation52_spill] sm:$0xff] %v5359_v16  ;;  %6751 = vst [vmem:[#allocation53_spill] sm:$0xff] %v5366_v54  ;;  %v5384_v10 = vmul.f32 %v5086_v7, %v2425_v26  ;;  %v5387_v40 = vmul.f32 %v5090_v1, %v1431_v8  ;;  %v5391_v44 = vmul.f32 %v5094_v42, %v5370_v0  ;;  %v2475_v61 = vrot.slane %v5363_v2, 6 }
 0x2e1   : > { %6752 = vst [vmem:[#allocation54_spill] sm:$0xff] %v5370_v0  ;;  %6753 = vst [vmem:[#allocation55_spill] sm:$0xff] %v5381_v30  ;;  %v5395_v49 = vsel %vm1153_vm9, %v2461_v20, %v2462_v36  ;;  %v5399_v41 = vsel %vm1153_vm9, %v2462_v36, %v2461_v20  ;;  %v620_v7 = vsel %vm591_vm11, %v618_v35, 0.0  ;;  %v2489_v1 = vrot.slane %v5363_v2, 7  ;;  %v636_v30 = vpop.permute.xlu1 %635 }
 0x2e2   : > { %6754 = vst [vmem:[#allocation56_spill] sm:$0xff] %v5384_v10  ;;  %6755 = vst [vmem:[#allocation57_spill] sm:$0xff] %v5395_v49  ;;  %v2256_v8 = vrot.slane %v620_v7, 6  ;;  %v2270_v26 = vrot.slane %v620_v7, 7  ;;  %v2292_v10 = vrot.slane %v620_v7, 1  ;;  %v2288_v16 = vmul.f32 %v5082_v55, %v620_v7 }
 0x2e3   : > { %6756 = vst [vmem:[#allocation58_spill] sm:$0xff] %v5399_v41  ;;  %v2306_v14 = vrot.slane %v620_v7, 2  ;;  %v5408_v49 = vsel %vm591_vm11, %v588_v4, 0.0  ;;  %v5412_v20 = vsel %vm612_vm12, %v636_v30, 0.0 }
 0x2e4   : > { %v2257_v35 = vsel %vm1128_vm7, %v2255_v3, %v2256_v8  ;;  %v2258_v36 = vsel %vm1128_vm7, %v2256_v8, %v2255_v3  ;;  %v2271_v41 = vsel %vm655_vm1, %v2269_v6, %v2270_v26  ;;  %v2272_v55 = vsel %vm655_vm1, %v2270_v26, %v2269_v6 }
 0x2e5   : > { %v2259_v4 = vsel %vm1131_vm8, %v2258_v36, 0.0  ;;  %v2266_v7 = vmul.f32 %v5102_v15, %v2257_v35  ;;  %v2273_v30 = vsel %vm658_vm4, %v2272_v55, 0.0  ;;  %v2280_v0 = vmul.f32 %v5106_v48, %v2271_v41 }
 0x2e6   : > { %v2265_v54 = vmul.f32 %v5102_v15, %v2259_v4  ;;  %v2279_v3 = vmul.f32 %v5106_v48, %v2273_v30  ;;  %v2293_v8 = vsel %vm680_vm2, %v2291_v29, %v2292_v10  ;;  %v2294_v6 = vsel %vm680_vm2, %v2292_v10, %v2291_v29 }
 0x2e7   : > { %v2290_v26 = vadd.f32 %v2288_v16, %v2266_v7  ;;  %v2296_v36 = vsel %vm684_vm6, %v2294_v6, 0.0  ;;  %v2301_v35 = vmul.f32 %v5116_v38, %v2293_v8  ;;  %v2307_v55 = vsel %vm1153_vm9, %v2305_v23, %v2306_v14 }
 0x2e8   : > { %v2289_v41 = vadd.f32 %v2287_v27, %v2265_v54  ;;  %v2302_v15 = vmul.f32 %v5116_v38, %v2296_v36  ;;  %v2308_v48 = vsel %vm1153_vm9, %v2306_v14, %v2305_v23  ;;  %v2315_v4 = vmul.f32 %v5120_v59, %v2307_v55 }
 0x2e9   : > { %v2338_v29 = vmul.f32 %v5065_v56, %v5262_v47  ;;  %v2303_v16 = vadd.f32 %v2301_v35, %v2279_v3  ;;  %v2310_v10 = vsel %vm1157_vm10, %v2308_v48, 0.0  ;;  %v3138_v7 = vmul.f32 %v5128_v34, %v5408_v49  ;;  %v590_v48 = vpop.permute.xlu1 %589 }
 0x2ea   : > { %v2304_v30 = vadd.f32 %v2302_v15, %v2280_v0  ;;  %v2316_v27 = vmul.f32 %v5120_v59, %v2310_v10  ;;  %v2317_v54 = vadd.f32 %v2315_v4, %v2289_v41  ;;  %v2476_v38 = vrot.slane %v5412_v20, 6  ;;  %v6757_v10 = vld [vmem:[#allocation28_spill] sm:$0xff] }
 0x2eb   : > { %v5453_v14 = vmul.f32 %v5112_v21, %v5363_v2  ;;  %v1147_v56 = vmul.f32 %v5124_v9, %v5408_v49  ;;  %v3156_v47 = vadd.f32 %v4892_v33, %v3138_v7  ;;  %v2490_v23 = vrot.slane %v5412_v20, 7 }
 0x2ec   : > { %v2318_v3 = vadd.f32 %v2316_v27, %v2290_v26  ;;  %v2331_v8 = vadd.f32 %v5323_v31, %v2303_v16  ;;  %v2339_v0 = vadd.f32 %v5299_v43, %v2317_v54  ;;  %v2477_v59 = vsel %vm1128_vm7, %v2475_v61, %v2476_v38 }
 0x2ed   : > { %v2511_v6 = vrot.slane %v5363_v2, 1  ;;  %v2332_v36 = vadd.f32 %v5306_v60, %v2304_v30  ;;  %v2478_v35 = vsel %vm1128_vm7, %v2476_v38, %v2475_v61  ;;  %v5469_v33 = vsel %vm655_vm1, %v2489_v1, %v2490_v23  ;;  %v3718_v38 = vld [vmem:[%s6662_s7 + $0x18] ss:$0 sm:$0xff] }
 0x2ee   : > { %v2525_v26 = vrot.slane %v5363_v2, 2  ;;  %v2340_v55 = vadd.f32 %v2338_v29, %v2318_v3  ;;  %v2355_v31 = vadd.f32 %v5314_v25, %v2339_v0  ;;  %v2458_v43 = vmul.f32 %v5094_v42, %v5374_v63  ;;  %v4226_v0 = vld [vmem:[%s6659_s4 + $0xf8] sm:$0xff]  }
 0x2ef   : > { %v1126_v41 = vrot.slane %v5408_v49, 6  ;;  %v1151_v15 = vrot.slane %v5408_v49, 2  ;;  %v1180_v60 = vadd.f32 %v4874_v12, %v1147_v56  ;;  %v5480_v61 = vsel %vm655_vm1, %v2490_v23, %v2489_v1  ;;  %v6760_v56 = vld [vmem:[#allocation29_spill] sm:$0xff]  ;;  %v6761_v23 = vld [vmem:[#allocation30_spill] sm:$0xff] }
 0x2f0   : > { %v2347_v4 = vadd.f32 %v5228_v18, %v2331_v8  ;;  %v2356_v2 = vadd.f32 %v5326_v62, %v2340_v55  ;;  %v2383_v25 = vadd.f32 %v4982_v32, %v2355_v31  ;;  %v5487_v42 = vmul.f32 %v5112_v21, %v5412_v20  ;;  %v6758_v18 = vld [vmem:[#allocation27_spill] sm:$0xff]  ;;  %v6759_v62 = vld [vmem:[#allocation20_spill] sm:$0xff] }
 0x2f1   : > { %v2348_v29 = vadd.f32 %v5281_v13, %v2332_v36  ;;  %v2512_v16 = vrot.slane %v5412_v20, 1  ;;  %v2526_v12 = vrot.slane %v5412_v20, 2  ;;  %v1005_v1 = vadd.f32 %v5275_v52, %v5201_v22  ;;  %v609_v20 = vpop.permute.xlu0 %608  ;;  %v6762_v55 = vld [vmem:[#allocation31_spill] sm:$0xff] }
 0x2f2   : > { %v2384_v7 = vadd.f32 %v6757_v10, %v2356_v2  ;;  %v2399_v30 = vadd.f32 %v6758_v18, %v2383_v25  ;;  %v2479_v32 = vsel %vm1131_vm8, %v2478_v35, 0.0  ;;  %v3172_v27 = vadd.f32 %v6759_v62, %v3156_v47 }
 0x2f3   : > { %v5501_v21 = vsel %vm680_vm2, %v2511_v6, %v2512_v16  ;;  %v5505_v13 = vsel %vm680_vm2, %v2512_v16, %v2511_v6  ;;  %v2527_v22 = vsel %vm1153_vm9, %v2525_v26, %v2526_v12  ;;  %v2528_v52 = vsel %vm1153_vm9, %v2526_v12, %v2525_v26  ;;  %v611_v26 = vpop.permute.xlu1 %610  ;;  %v4228_v12 = vld [vmem:[%s6659_s4 + $0xf0] sm:$0xff]  }
 0x2f4   : > { %v5512_v54 = vadd.f32 %v5329_v50, %v2347_v4  ;;  %v2400_v47 = vadd.f32 %v6760_v56, %v2384_v7  ;;  %v2421_v3 = vadd.f32 %v6761_v23, %v2399_v30  ;;  %v2486_v8 = vmul.f32 %v5137_v39, %v2477_v59  ;;  %v6763_v59 = vld [vmem:[#allocation19_spill] sm:$0xff] }
 0x2f5   : > { %v5524_v6 = vadd.f32 %v5338_v17, %v2348_v29  ;;  %v2485_v50 = vmul.f32 %v5137_v39, %v2479_v32  ;;  %v2530_v36 = vsel %vm1157_vm10, %v2528_v52, 0.0  ;;  %v1024_v35 = vpack.c.bf16 %v5246_v37, %v1005_v1 }
 0x2f6   : > { %v2422_v31 = vadd.f32 %v6762_v55, %v2400_v47  ;;  %v2443_v4 = vadd.f32 %v5378_v58, %v2421_v3  ;;  %v5533_v2 = vadd.f32 %v6763_v59, %v1180_v60  ;;  %v5537_v25 = vsel %vm612_vm12, %v609_v20, 0.0  ;;  %v6765_v20 = vld [vmem:[#allocation21_spill] sm:$0xff]  ;;  %v6766_v3 = vld [vmem:[#allocation42_spill] sm:$0xff]  ;;  %v6768_v55 = vld [vmem:[#allocation44_spill] sm:$0xff] }
 0x2f7   : > { %v5539_v17 = vmul.f32 %v3718_v38, %v2527_v22  ;;  %v2536_v39 = vmul.f32 %v3718_v38, %v2530_v36  ;;  %3999 = vmatmul.mubr.bf16.vlgmr.msra.gmra.mxu1 %v1024_v35  ;;  %v1204_v29 = vrot.slane %v5537_v25, 6  ;;  %v3186_v37 = vmul.f32 %v5167_v28, %v5537_v25 }
 0x2f8   : > { %v2444_v16 = vadd.f32 %v5387_v40, %v2422_v31  ;;  %v2459_v58 = vadd.f32 %v5391_v44, %v2443_v4  ;;  %4023 = vmatpush3.bf16.msra.mxu1 %v4226_v0  ;;  %v593_v60 = vsel %vm591_vm11, %v590_v48, 0.0  ;;  %v5553_v1 = vsel %vm612_vm12, %v611_v26, 0.0  ;;  %v6767_v0 = vld [vmem:[#allocation43_spill] sm:$0xff]  ;;  %v6769_v4 = vld [vmem:[#allocation22_spill] sm:$0xff] }
 0x2f9   : > { %v6764_v10 = vmov 0.0   ;;  %v5560_v40 = vmul.f32 %v5161_v46, %v5537_v25  ;;  %v5562_v44 = vadd.f32 %v3186_v37, %v3172_v27  ;;  %v1127_v48 = vrot.slane %v593_v60, 6 }
 0x2fa   : > { %4038 = vmatprep.mubr.msk.bf16.mxu1 %vm4313_vm0, %v6764_v10  ;;  %4024 = vmatprep.subr.bf16.mxu1 %v6764_v10  ;;  %v1148_v7 = vmul.f32 %v5124_v9, %v593_v60  ;;  %v2460_v18 = vadd.f32 %v2458_v43, %v2444_v16  ;;  %v5565_v30 = vadd.f32 %v2485_v50, %v2459_v58  ;;  %v1152_v32 = vrot.slane %v593_v60, 2 }
 0x2fb   : > { %v3139_v62 = vmul.f32 %v5128_v34, %v593_v60  ;;  %v1129_v22 = vsel %vm1128_vm7, %v1126_v41, %v1127_v48  ;;  %v1130_v52 = vsel %vm1128_vm7, %v1127_v48, %v1126_v41  ;;  %v1205_v27 = vrot.slane %v5553_v1, 6  ;;  %v4230_v41 = vld [vmem:[%s6659_s4 + $0xe8] sm:$0xff]   ;;  %v4232_v60 = vld [vmem:[%s6659_s4 + $0xe0] sm:$0xff]  }
 0x2fc   : > { %v1181_v38 = vadd.f32 %v6765_v20, %v1148_v7  ;;  %v2488_v56 = vadd.f32 %v2486_v8, %v2460_v18  ;;  %v1133_v9 = vsel %vm1131_vm8, %v1130_v52, 0.0  ;;  %v1140_v43 = vmul.f32 %v5171_v53, %v1129_v22  ;;  %4025 = vmatpush3.bf16.msra.mxu1 %v4228_v12  ;;  %v6770_v7 = vld [vmem:[#allocation23_spill] sm:$0xff] }
 0x2fd   : > { %v1154_v34 = vsel %vm1153_vm9, %v1151_v15, %v1152_v32  ;;  %v1139_v47 = vmul.f32 %v5171_v53, %v1133_v9  ;;  %v1155_v23 = vsel %vm1153_vm9, %v1152_v32, %v1151_v15  ;;  %v3130_v50 = vmul.f32 %v6767_v0, %v1133_v9  ;;  %4026 = vmatprep.subr.bf16.mxu1 %v6764_v10  ;;  %v6771_v32 = vld [vmem:[#allocation24_spill] sm:$0xff] }
 0x2fe   : > { %v1164_v8 = vmul.f32 %v6766_v3, %v1154_v34  ;;  %v2510_v36 = vadd.f32 %v5487_v42, %v2488_v56  ;;  %v1159_v35 = vsel %vm1157_vm10, %v1155_v23, 0.0  ;;  %v3131_v26 = vmul.f32 %v6767_v0, %v1129_v22  ;;  %v6774_v56 = vld [vmem:[#allocation45_spill] sm:$0xff] }
 0x2ff   : > { %v3146_v53 = vmul.f32 %v6768_v55, %v1154_v34  ;;  %v1165_v49 = vmul.f32 %v6766_v3, %v1159_v35  ;;  %v3147_v15 = vmul.f32 %v6768_v55, %v1159_v35  ;;  %v3157_v59 = vadd.f32 %v6769_v4, %v3139_v62  ;;  %v6775_v34 = vld [vmem:[#allocation17_spill] sm:$0xff]  ;;  %v3778_v35 = vld [vmem:[%s6661_s6 + $0x78] ss:$0 sm:$0xff] }
 0x300   : > { %v1166_v31 = vadd.f32 %v1164_v8, %v1139_v47  ;;  %v5600_v37 = vadd.f32 %v2536_v39, %v2510_v36  ;;  %v1226_v16 = vrot.slane %v5537_v25, 2  ;;  %v1206_v42 = vsel %vm1128_vm7, %v1204_v29, %v1205_v27  ;;  %4027 = vmatpush3.bf16.msra.mxu1 %v4230_v41  ;;  %v6772_v39 = vld [vmem:[#allocation15_spill] sm:$0xff]  ;;  %v6773_v25 = vld [vmem:[#allocation16_spill] sm:$0xff]  ;;  %v4234_v36 = vld [vmem:[%s6659_s4 + $0xd8] sm:$0xff]  }
 0x301   : > { %v3148_v58 = vadd.f32 %v3146_v53, %v3130_v50  ;;  %v1167_v12 = vadd.f32 %v1165_v49, %v1140_v43  ;;  %v3149_v48 = vadd.f32 %v3147_v15, %v3131_v26  ;;  %v1203_v18 = vadd.f32 %v6770_v7, %v1181_v38  ;;  %4028 = vmatprep.subr.bf16.mxu1 %v6764_v10  ;;  %v3578_v43 = vld [vmem:[%s6661_s6 + $0x28] ss:$0 sm:$0xff]  ;;  %v6776_v38 = vld [vmem:[#allocation18_spill] sm:$0xff] }
 0x302   : > { %v3173_v22 = vadd.f32 %v6771_v32, %v3157_v59  ;;  %v1188_v62 = vadd.f32 %v6772_v39, %v1166_v31  ;;  %v1207_v20 = vsel %vm1128_vm7, %v1205_v27, %v1204_v29  ;;  %v1215_v9 = vmul.f32 %v6774_v56, %v1206_v42  ;;  %v6777_v27 = vld [vmem:[#allocation46_spill] sm:$0xff]  ;;  %v6779_v32 = vld [vmem:[#allocation33_spill] sm:$0xff] }
 0x303   : > { %v3164_v52 = vadd.f32 %v6773_v25, %v3148_v58  ;;  %v1189_v41 = vadd.f32 %v6775_v34, %v1167_v12  ;;  %v3165_v47 = vadd.f32 %v6776_v38, %v3149_v48  ;;  %v1208_v23 = vsel %vm1131_vm8, %v1207_v20, 0.0  ;;  %v6778_v48 = vld [vmem:[#allocation32_spill] sm:$0xff]  ;;  %v6780_v20 = vld [vmem:[#allocation53_spill] sm:$0xff] }
 0x304   : > { %v1227_v3 = vrot.slane %v5553_v1, 2  ;;  %v1214_v8 = vmul.f32 %v6774_v56, %v1208_v23  ;;  %v1223_v29 = vmul.f32 %v5161_v46, %v5553_v1  ;;  %v3178_v0 = vmul.f32 %v6777_v27, %v1208_v23  ;;  %4029 = vmatpush3.bf16.msra.mxu1 %v4232_v60 }
 0x305   : > { %v3179_v50 = vmul.f32 %v6777_v27, %v1206_v42  ;;  %v1217_v26 = vadd.f32 %v1215_v9, %v1189_v41  ;;  %v3187_v53 = vmul.f32 %v5167_v28, %v5553_v1  ;;  %4030 = vmatprep.subr.bf16.mxu1 %v6764_v10  ;;  %v1224_v59 = vadd.f32 %v5560_v40, %v5533_v2  ;;  %v4236_v28 = vld [vmem:[%s6659_s4 + $0xd0] sm:$0xff]   ;;  %v6781_v9 = vld [vmem:[#allocation54_spill] sm:$0xff]  ;;  %v6782_v41 = vld [vmem:[#allocation47_spill] sm:$0xff] }
 0x306   : > { %v1228_v55 = vsel %vm1153_vm9, %v1226_v16, %v1227_v3  ;;  %v1229_v46 = vsel %vm1153_vm9, %v1227_v3, %v1226_v16  ;;  %v1216_v49 = vadd.f32 %v1214_v8, %v1188_v62  ;;  %v3180_v4 = vadd.f32 %v3178_v0, %v3164_v52  ;;  %v3606_v16 = vld [vmem:[%s6661_s6 + $0x38] ss:$0 sm:$0xff]  ;;  %v6786_v8 = vld [vmem:[#allocation25_spill] sm:$0xff] }
 0x307   : > { %v1231_v31 = vsel %vm1157_vm10, %v1229_v46, 0.0  ;;  %v1236_v15 = vmul.f32 %v3578_v43, %v1228_v55  ;;  %v3181_v42 = vadd.f32 %v3179_v50, %v3165_v47  ;;  %v3189_v60 = vadd.f32 %v3187_v53, %v3173_v22  ;;  %v6784_v47 = vld [vmem:[#allocation51_spill] sm:$0xff]  ;;  %v6787_v27 = vld [vmem:[#allocation26_spill] sm:$0xff] }
 0x308   : > { %v1237_v58 = vmul.f32 %v3578_v43, %v1231_v31  ;;  %v3195_v12 = vmul.f32 %v3778_v35, %v1231_v31  ;;  %4031 = vmatpush3.bf16.msra.mxu1 %v4234_v36  ;;  %v1413_v7 = vadd.f32 %v6778_v48, %v5303_v24  ;;  %v1414_v2 = vadd.f32 %v6779_v32, %v5320_v5  ;;  %v6783_v24 = vld [vmem:[#allocation34_spill] sm:$0xff]  ;;  %v6785_v5 = vld [vmem:[#allocation35_spill] sm:$0xff]  ;;  %v6790_v31 = vld [vmem:[#allocation37_spill] sm:$0xff] }
 0x309   : > { %v1238_v1 = vadd.f32 %v1236_v15, %v1216_v49  ;;  %v1225_v40 = vadd.f32 %v1223_v29, %v1203_v18  ;;  %v3194_v22 = vmul.f32 %v3778_v35, %v1228_v55  ;;  %4032 = vmatprep.subr.bf16.mxu1 %v6764_v10  ;;  %v1439_v62 = vmul.f32 %v5078_v11, %v5355_v19  ;;  %v4238_v11 = vld [vmem:[%s6659_s4 + $0xc8] sm:$0xff]   ;;  %v6788_v55 = vld [vmem:[#allocation58_spill] sm:$0xff] }
 0x30a   : > { %v1239_v39 = vadd.f32 %v1237_v58, %v1217_v26  ;;  %v3197_v25 = vadd.f32 %v3195_v12, %v3181_v42  ;;  %v1442_v56 = vadd.f32 %v6780_v20, %v1414_v2  ;;  %v1461_v43 = vmul.f32 %v3606_v16, %v6781_v9  ;;  %v6791_v15 = vld [vmem:[#allocation48_spill] sm:$0xff]  ;;  %v6795_v12 = vld [vmem:[#allocation55_spill] sm:$0xff]  ;;  %v6797_v2 = vld [vmem:[#allocation57_spill] sm:$0xff] }
 0x30b   : > { %v1240_v52 = vadd.f32 %v1238_v1, %v1224_v59  ;;  %v1427_v38 = vadd.f32 %v6783_v24, %v6782_v41  ;;  %v1428_v18 = vadd.f32 %v6785_v5, %v6784_v47  ;;  %v1441_v23 = vadd.f32 %v1439_v62, %v1413_v7  ;;  %v6792_v59 = vld [vmem:[#allocation52_spill] sm:$0xff]  ;;  %v6799_v62 = vld [vmem:[#allocation49_spill] sm:$0xff] }
 0x30c   : > { %v1241_v34 = vadd.f32 %v1239_v39, %v1225_v40  ;;  %v5665_v3 = vadd.f32 %v3197_v25, %v3189_v60  ;;  %4033 = vmatpush3.bf16.msra.mxu1 %v4236_v28  ;;  %v1462_v19 = vmul.f32 %v3606_v16, %v5374_v63  ;;  %v2391_v29 = vadd.f32 %v6786_v8, %v5512_v54  ;;  %v6789_v63 = vld [vmem:[#allocation36_spill] sm:$0xff]  ;;  %v4239_v16 = vld [vmem:[%s6659_s4 + $0xc0] sm:$0xff]  }
 0x30d   : > { %v2392_v0 = vadd.f32 %v6787_v27, %v5524_v6  ;;  %4034 = vmatprep.subr.bf16.mxu1 %v6764_v10  ;;  %v1463_v36 = vadd.f32 %v1461_v43, %v1441_v23  ;;  %v2509_v35 = vadd.f32 %v5453_v14, %v5565_v30  ;;  %v3196_v26 = vadd.f32 %v3194_v22, %v3180_v4  ;;  %v6793_v14 = vld [vmem:[#allocation50_spill] sm:$0xff]  ;;  %v6796_v1 = vld [vmem:[#allocation56_spill] sm:$0xff]  ;;  %v6798_v40 = vld [vmem:[#allocation39_spill] sm:$0xff] }
 0x30e   : > { %v1259_v50 = vpack.c.bf16 %v1241_v34, %v1240_v52  ;;  %v2466_v46 = vsel %vm1157_vm10, %v6788_v55, 0.0  ;;  %v1464_v53 = vadd.f32 %v1462_v19, %v1442_v56  ;;  %v2407_v49 = vadd.f32 %v6789_v63, %v2391_v29  ;;  %v6794_v30 = vld [vmem:[#allocation38_spill] sm:$0xff]  ;;  %v4242_v8 = vld [vmem:[%s6659_s4 + $0x168] sm:$0xff]   ;;  %v4243_v27 = vld [vmem:[%s6659_s4 + $0x160] sm:$0xff]  }
 0x30f   : > { %v2408_v54 = vadd.f32 %v6790_v31, %v2392_v0  ;;  %v1449_v6 = vadd.f32 %v6791_v15, %v1427_v38  ;;  %v1450_v58 = vadd.f32 %v6792_v59, %v1428_v18  ;;  %v2537_v42 = vadd.f32 %v5539_v17, %v2509_v35  ;;  %v4240_v43 = vld [vmem:[%s6659_s4 + $0x178] sm:$0xff]   ;;  %v6801_v38 = vld [vmem:[#allocation41_spill] sm:$0xff]  ;;  %v6803_v55 = vld [vmem:[#allocation11_spill] sm:$0xff] }
 0x310   : > { %4019 = vmatmul.mubr.bf16.vlgmr.msra.gmra.mxu0 %v1259_v50  ;;  %v5687_v60 = vadd.f32 %v3196_v26, %v5562_v44  ;;  %v2450_v4 = vmul.f32 %v6794_v30, %v6793_v14  ;;  %4035 = vmatpush3.bf16.msra.mxu1 %v4238_v11  ;;  %v2435_v28 = vadd.f32 %v6795_v12, %v2407_v49  ;;  %v2493_v17 = vsel %vm658_vm4, %v5480_v61, 0.0  ;;  %v6800_v61 = vld [vmem:[#allocation40_spill] sm:$0xff]  ;;  %v4245_v0 = vld [vmem:[%s6659_s4 + $0x150] sm:$0xff]   ;;  %v4248_v35 = vld [vmem:[%s6659_s4 + $0x1f8] sm:$0xff]  }
 0x311   : > { %v2436_v48 = vadd.f32 %v6796_v1, %v2408_v54  ;;  %4058 = vmatprep.mubr.msk.bf16.mxu0 %vm4313_vm0, %v6764_v10  ;;  %4036 = vmatprep.subr.bf16.mxu1 %v6764_v10  ;;  %v1465_v44 = vadd.f32 %v1463_v36, %v1449_v6  ;;  %v1466_v7 = vadd.f32 %v1464_v53, %v1450_v58  ;;  %v2516_v20 = vsel %vm684_vm6, %v5505_v13, 0.0  ;;  %v4246_v50 = vld [vmem:[%s6659_s4 + $0x148] sm:$0xff]   ;;  %v4247_v36 = vld [vmem:[%s6659_s4 + $0x140] sm:$0xff]   ;;  %v4249_v53 = vld [vmem:[%s6659_s4 + $0x1f0] sm:$0xff]  }
 0x312   : > { %v3217_v32 = vpack.c.bf16 %v5665_v3, %v5687_v60  ;;  %v2471_v39 = vmul.f32 %v6798_v40, %v6797_v2  ;;  %v2472_v22 = vmul.f32 %v6798_v40, %v2466_v46  ;;  %v2451_v25 = vadd.f32 %v6799_v62, %v2435_v28  ;;  %v6802_v26 = vld [vmem:[#allocation12_spill] sm:$0xff]  ;;  %v4251_v49 = vld [vmem:[%s6659_s4 + $0x1e0] sm:$0xff]   ;;  %v4252_v31 = vld [vmem:[%s6659_s4 + $0x1d8] sm:$0xff]  }
 0x313   : > { %v2452_v52 = vadd.f32 %v2450_v4, %v2436_v48  ;;  %v2499_v56 = vmul.f32 %v6800_v61, %v2493_v17  ;;  %v2500_v9 = vmul.f32 %v6800_v61, %v5469_v33  ;;  %v1484_v24 = vpack.c.bf16 %v1466_v7, %v1465_v44  ;;  %v4241_v33 = vld [vmem:[%s6659_s4 + $0x170] sm:$0xff]   ;;  %v4250_v63 = vld [vmem:[%s6659_s4 + $0x1e8] sm:$0xff]   ;;  %v4255_v6 = vld [vmem:[%s6659_s4 + $0x1c0] sm:$0xff]  }
 0x314   : > { %4037 = vmatpush3.bf16.msra.mxu1 %v4239_v16  ;;  %v2473_v34 = vadd.f32 %v2471_v39, %v2451_v25  ;;  %v2521_v47 = vmul.f32 %v6801_v38, %v5501_v21  ;;  %v2522_v13 = vmul.f32 %v6801_v38, %v2516_v20  ;;  %v6804_v46 = vpack.c.bf16 %v6802_v26, %v6803_v55  ;;  %v4253_v54 = vld [vmem:[%s6659_s4 + $0x1d0] sm:$0xff]   ;;  %v4254_v15 = vld [vmem:[%s6659_s4 + $0x1c8] sm:$0xff]   ;;  %v4256_v59 = vld [vmem:[%s6659_s4 + $0x278] sm:$0xff]  }
 0x315   : > { %v2474_v41 = vadd.f32 %v2472_v22, %v2452_v52  ;;  %4062 = vmatprep.subr.bf16.mxu1 %v6764_v10  ;;  %v4257_v58 = vld [vmem:[%s6659_s4 + $0x270] sm:$0xff]   ;;  %v4259_v14 = vld [vmem:[%s6659_s4 + $0x260] sm:$0xff]   ;;  %v4260_v30 = vld [vmem:[%s6659_s4 + $0x258] sm:$0xff]  }
 0x316   : > { %v2501_v5 = vadd.f32 %v2499_v56, %v2473_v34  ;;  %v4261_v4 = vld [vmem:[%s6659_s4 + $0x250] sm:$0xff]   ;;  %v4262_v16 = vld [vmem:[%s6659_s4 + $0x248] sm:$0xff]   ;;  %v4263_v12 = vld [vmem:[%s6659_s4 + $0x240] sm:$0xff]  }
 0x317   : > { %v2502_v18 = vadd.f32 %v2500_v9, %v2474_v41  ;;  %4039 = vmatmul.mubr.bf16.vlgmr.msra.gmra.mxu1 %v1484_v24  ;;  %v3567_v28 = vld [vmem:[%s6660_s5 + $0x3] ss:$0 sm:$0xff]  ;;  %v6805_v44 = vld [vmem:[#allocation13_spill] sm:$0xff]  ;;  %v4264_v60 = vld [vmem:[%s6659_s4 + $0x138] sm:$0xff]  }
 0x318   : > { %4063 = vmatpush3.bf16.msra.mxu1 %v4240_v43  ;;  %4078 = vmatprep.mubr.msk.bf16.mxu1 %vm4313_vm0, %v6764_v10  ;;  %v2523_v23 = vadd.f32 %v2521_v47, %v2501_v5  ;;  %v4265_v22 = vld [vmem:[%s6659_s4 + $0x130] sm:$0xff]   ;;  %v4266_v52 = vld [vmem:[%s6659_s4 + $0x128] sm:$0xff]   ;;  %v3623_v56 = vld [vmem:[%s6660_s5 + $0x5] ss:$0 sm:$0xff] }
 0x319   : > { %v2524_v11 = vadd.f32 %v2522_v13, %v2502_v18  ;;  %4064 = vmatprep.subr.bf16.mxu1 %v6764_v10  ;;  %4043 = vmatpush3.bf16.msra.mxu0 %v4264_v60  ;;  %v4267_v13 = vld [vmem:[%s6659_s4 + $0x120] sm:$0xff]  }
 0x31a   : > { %v2539_v19 = vadd.f32 %v2537_v42, %v2523_v23  ;;  %v4258_v42 = vld [vmem:[%s6659_s4 + $0x268] sm:$0xff]   ;;  %4044 = vmatprep.subr.bf16.mxu0 %v6764_v10 }
 0x31b   : > { %v2540_v21 = vadd.f32 %v5600_v37, %v2524_v11  ;;  %v4244_v37 = vld [vmem:[%s6659_s4 + $0x158] sm:$0xff]  }
 0x31c   : > { %4065 = vmatpush3.bf16.msra.mxu1 %v4241_v33 }
 0x31d   : > { %v2558_v29 = vpack.c.bf16 %v2540_v21, %v2539_v19  ;;  %4066 = vmatprep.subr.bf16.mxu1 %v6764_v10  ;;  %4045 = vmatpush3.bf16.msra.mxu0 %v4265_v22 }
 0x31e   : > { %4046 = vmatprep.subr.bf16.mxu0 %v6764_v10 }
 0x320   : > { %4067 = vmatpush3.bf16.msra.mxu1 %v4242_v8 }
 0x321   : > { %4068 = vmatprep.subr.bf16.mxu1 %v6764_v10  ;;  %4047 = vmatpush3.bf16.msra.mxu0 %v4266_v52 }
 0x322   : > { %4048 = vmatprep.subr.bf16.mxu0 %v6764_v10 }
 0x324   : > { %4069 = vmatpush3.bf16.msra.mxu1 %v4243_v27  ;;  %v4268_v27 = vld [vmem:[%s6659_s4 + $0x118] sm:$0xff]  }
 0x325   : > { %4070 = vmatprep.subr.bf16.mxu1 %v6764_v10  ;;  %4049 = vmatpush3.bf16.msra.mxu0 %v4267_v13 }
 0x326   : > { %4050 = vmatprep.subr.bf16.mxu0 %v6764_v10 }
 0x328   : > { %4071 = vmatpush3.bf16.msra.mxu1 %v4244_v37  ;;  %v4269_v37 = vld [vmem:[%s6659_s4 + $0x110] sm:$0xff]  }
 0x329   : > { %4072 = vmatprep.subr.bf16.mxu1 %v6764_v10  ;;  %4051 = vmatpush3.bf16.msra.mxu0 %v4268_v27  ;;  %v3632_v27 = vld [vmem:[%s6661_s6 + $0x40] sm:$0xff] }
 0x32a   : > { %4052 = vmatprep.subr.bf16.mxu0 %v6764_v10 }
 0x32c   : > { %4073 = vmatpush3.bf16.msra.mxu1 %v4245_v0  ;;  %v4270_v0 = vld [vmem:[%s6659_s4 + $0x108] sm:$0xff]  }
 0x32d   : > { %4074 = vmatprep.subr.bf16.mxu1 %v6764_v10  ;;  %4053 = vmatpush3.bf16.msra.mxu0 %v4269_v37  ;;  %v6810_v37 = vld [vmem:[#allocation7_spill] sm:$0xff] }
 0x32e   : > { %4054 = vmatprep.subr.bf16.mxu0 %v6764_v10 }
 0x330   : > { %4075 = vmatpush3.bf16.msra.mxu1 %v4246_v50  ;;  %v4271_v50 = vld [vmem:[%s6659_s4 + $0x100] sm:$0xff]  }
 0x331   : > { %4076 = vmatprep.subr.bf16.mxu1 %v6764_v10  ;;  %4055 = vmatpush3.bf16.msra.mxu0 %v4270_v0  ;;  %v1613_v0 = vrot.slane %v3632_v27, %v6810_v37 }
 0x332   : > { %4056 = vmatprep.subr.bf16.mxu0 %v6764_v10 }
 0x334   : > { %4077 = vmatpush3.bf16.msra.mxu1 %v4247_v36  ;;  %v3681_v36 = vld [vmem:[%s6660_s5 + $0x7] ss:$0 sm:$0xff] }
 0x335   : > { %4102 = vmatprep.subr.bf16.mxu1 %v6764_v10  ;;  %4057 = vmatpush3.bf16.msra.mxu0 %v4271_v50  ;;  %v6811_v50 = vld [vmem:[#allocation4_spill] sm:$0xff] }
 0x336   : > { %4082 = vmatprep.subr.bf16.mxu0 %v6764_v10 }
 0x337   : > { %4079 = vmatmul.mubr.bf16.vlgmr.msra.gmra.mxu1 %v6804_v46 }
 0x338   : > { %4103 = vmatpush3.bf16.msra.mxu1 %v4248_v35  ;;  %4118 = vmatprep.mubr.msk.bf16.mxu1 %vm4313_vm0, %v6764_v10 }
 0x339   : > { %4104 = vmatprep.subr.bf16.mxu1 %v6764_v10 }
 0x33c   : > { %4105 = vmatpush3.bf16.msra.mxu1 %v4249_v53 }
 0x33d   : > { %4106 = vmatprep.subr.bf16.mxu1 %v6764_v10 }
 0x340   : > { %4107 = vmatpush3.bf16.msra.mxu1 %v4250_v63 }
 0x341   : > { %4108 = vmatprep.subr.bf16.mxu1 %v6764_v10 }
 0x344   : > { %4109 = vmatpush3.bf16.msra.mxu1 %v4251_v49 }
 0x345   : > { %4110 = vmatprep.subr.bf16.mxu1 %v6764_v10 }
 0x348   : > { %4111 = vmatpush3.bf16.msra.mxu1 %v4252_v31 }
 0x349   : > { %4112 = vmatprep.subr.bf16.mxu1 %v6764_v10 }
 0x34c   : > { %4113 = vmatpush3.bf16.msra.mxu1 %v4253_v54 }
 0x34d   : > { %4114 = vmatprep.subr.bf16.mxu1 %v6764_v10 }
 0x350   : > { %4115 = vmatpush3.bf16.msra.mxu1 %v4254_v15 }
 0x351   : > { %4116 = vmatprep.subr.bf16.mxu1 %v6764_v10 }
 0x354   : > { %4117 = vmatpush3.bf16.msra.mxu1 %v4255_v6 }
 0x355   : > { %4142 = vmatprep.subr.bf16.mxu1 %v6764_v10 }
 0x357   : > { %4119 = vmatmul.mubr.bf16.vlgmr.msra.gmra.mxu1 %v2558_v29 }
 0x358   : > { %4143 = vmatpush3.bf16.msra.mxu1 %v4256_v59  ;;  %4158 = vmatprep.mubr.msk.bf16.mxu1 %vm4313_vm0, %v6764_v10 }
 0x359   : > { %4144 = vmatprep.subr.bf16.mxu1 %v6764_v10 }
 0x35c   : > { %4145 = vmatpush3.bf16.msra.mxu1 %v4257_v58 }
 0x35d   : > { %4146 = vmatprep.subr.bf16.mxu1 %v6764_v10 }
 0x360   : > { %4147 = vmatpush3.bf16.msra.mxu1 %v4258_v42 }
 0x361   : > { %4148 = vmatprep.subr.bf16.mxu1 %v6764_v10 }
 0x364   : > { %4149 = vmatpush3.bf16.msra.mxu1 %v4259_v14 }
 0x365   : > { %4150 = vmatprep.subr.bf16.mxu1 %v6764_v10 }
 0x368   : > { %4151 = vmatpush3.bf16.msra.mxu1 %v4260_v30 }
 0x369   : > { %4152 = vmatprep.subr.bf16.mxu1 %v6764_v10 }
 0x36c   : > { %4153 = vmatpush3.bf16.msra.mxu1 %v4261_v4  ;;  %v3735_v4 = vld [vmem:[%s6660_s5 + $0x9] ss:$0 sm:$0xff] }
 0x36d   : > { %4154 = vmatprep.subr.bf16.mxu1 %v6764_v10 }
 0x370   : > { %4155 = vmatpush3.bf16.msra.mxu1 %v4262_v16 }
 0x371   : > { %4156 = vmatprep.subr.bf16.mxu1 %v6764_v10 }
 0x374   : > { %4157 = vmatpush3.bf16.msra.mxu1 %v4263_v12 }
 0x377   : > { %4159 = vmatmul.mubr.bf16.vlgmr.msra.gmra.mxu1 %v3217_v32  ;;  %v6806_v32 = vld [vmem:[#allocation14_spill] sm:$0xff] }
 0x3b7   : > { %v1112_v1 = vpop.f32.mrf.mxu1 }
 0x3b8   : > { %v1113_v48 = vadd.f32 %v3567_v28, %v1112_v1 }
 0x3b9   : > { %v4000_v17 = vpop.f32.mrf.mxu1 }
 0x3ba   : > { %v1119_v7 = vadd.f32 %v1113_v48, %v6805_v44 }
 0x3bb   : > { %v1115_v2 = vpop.f32.mrf.mxu1 }
 0x3bc   : > { %1121 = vst [vmem:[%s5831_s22] sm:$0xff] %v1119_v7  ;;  %v1116_v40 = vadd.f32 %v3567_v28, %v1115_v2 }
 0x3bd   : > { %v4001_v3 = vpop.f32.mrf.mxu1 }
 0x3be   : > { %v1120_v39 = vadd.f32 %v1116_v40, %v6806_v32 }
 0x3c0   : > { %1122 = vst [vmem:[%s5831_s22 + $0x8] sm:$0xff] %v1120_v39 }
 0x3d0   : > { %v5844_v62 = vpop.f32.mrf.mxu0 }
 0x3d1   : > { %6807 = vst [vmem:[#allocation28_spill] sm:$0xff] %v5844_v62 }
 0x3d2   : > { %v4020_v25 = vpop.f32.mrf.mxu0 }
 0x3d4   : > { %v5849_v20 = vpop.f32.mrf.mxu0 }
 0x3d5   : > { %6808 = vst [vmem:[#allocation27_spill] sm:$0xff] %v5849_v20 }
 0x3d6   : > { %v4021_v61 = vpop.f32.mrf.mxu0 }
 0x3d7   : > { %v1572_v9 = vpop.f32.mrf.mxu1 }
 0x3d8   : > { %v1573_v43 = vadd.f32 %v3623_v56, %v1572_v9 }
 0x3d9   : > { %v4040_v34 = vpop.f32.mrf.mxu1 }
 0x3da   : > { %v5855_v41 = vmax.f32 %v1573_v43, 0.0 }
 0x3db   : > { %v1575_v24 = vpop.f32.mrf.mxu1 }
 0x3dc   : > { %v1576_v38 = vadd.f32 %v3623_v56, %v1575_v24  ;;  %1581 = vrot.lane.b32.xlu0 %v5855_v41, %s4315_s28  ;;  %v1654_v18 = vrot.slane %v5855_v41, 1  ;;  %v1632_v23 = vrot.slane %v5855_v41, 7 }
 0x3dd   : > { %v4041_v47 = vpop.f32.mrf.mxu1 }
 0x3de   : > { %v5862_v5 = vmax.f32 %v1576_v38, 0.0 }
 0x3e0   : > { %v1655_v33 = vrot.slane %v5862_v5, 1  ;;  %1587 = vrot.lane.b32.xlu0 %v5855_v41, %s4314_s27  ;;  %1583 = vrot.lane.b32.xlu1 %v5862_v5, %s4315_s28  ;;  %v1633_v11 = vrot.slane %v5862_v5, 7 }
 0x3e2   : > { %v5875_v19 = vsel %vm655_vm1, %v1633_v11, %v1632_v23  ;;  %v5879_v21 = vsel %vm680_vm2, %v1654_v18, %v1655_v33  ;;  %v5883_v8 = vsel %vm655_vm1, %v1632_v23, %v1633_v11  ;;  %v5887_v29 = vsel %vm680_vm2, %v1655_v33, %v1654_v18 }
 0x3e4   : > { %1589 = vrot.lane.b32.xlu1 %v5862_v5, %s4314_s27 }
 0x3f7   : > { %v2005_v35 = vpop.f32.mrf.mxu1 }
 0x3f8   : > { %v2006_v26 = vadd.f32 %v3681_v36, %v2005_v35  ;;  %v1636_v35 = vsel %vm658_vm4, %v5875_v19, 0.0  ;;  %v6816_v19 = vld [vmem:[#allocation10_spill] sm:$0xff] }
 0x3f9   : > { %v4080_v55 = vpop.f32.mrf.mxu1 }
 0x3fa   : > { %v5910_v46 = vmax.f32 %v2006_v26, 0.0  ;;  %v6812_v55 = vld [vmem:[#allocation5_spill] sm:$0xff] }
 0x3fb   : > { %v2008_v53 = vpop.f32.mrf.mxu1 }
 0x3fc   : > { %v2009_v63 = vadd.f32 %v3681_v36, %v2008_v53  ;;  %2014 = vrot.lane.b32.xlu0 %v5910_v46, %s4315_s28  ;;  %v2087_v54 = vrot.slane %v5910_v46, 1  ;;  %v2065_v6 = vrot.slane %v5910_v46, 7  ;;  %v1641_v36 = vrot.slane %v3632_v27, %v6811_v50 }
 0x3fd   : > { %v4081_v49 = vpop.f32.mrf.mxu1  ;;  %v1663_v53 = vrot.slane %v3632_v27, %v6812_v55 }
 0x3fe   : > { %v5914_v31 = vmax.f32 %v2009_v63, 0.0  ;;  %v6813_v49 = vld [vmem:[#allocation3_spill] sm:$0xff] }
 0x400   : > { %v2088_v15 = vrot.slane %v5914_v31, 1  ;;  %2020 = vrot.lane.b32.xlu0 %v5910_v46, %s4314_s27  ;;  %2016 = vrot.lane.b32.xlu1 %v5914_v31, %s4315_s28  ;;  %v2066_v59 = vrot.slane %v5914_v31, 7 }
 0x402   : > { %v5926_v58 = vsel %vm655_vm1, %v2066_v59, %v2065_v6  ;;  %v5930_v42 = vsel %vm680_vm2, %v2087_v54, %v2088_v15  ;;  %v5934_v14 = vsel %vm655_vm1, %v2065_v6, %v2066_v59  ;;  %v5938_v30 = vsel %vm680_vm2, %v2088_v15, %v2087_v54 }
 0x403   : > { %v1649_v54 = vrot.slane %v3632_v27, %v6813_v49  ;;  %v1642_v6 = vmul.f32 %v1641_v36, %v1636_v35 }
 0x404   : > { %2022 = vrot.lane.b32.xlu1 %v5914_v31, %s4314_s27 }
 0x417   : > { %v2646_v16 = vpop.f32.mrf.mxu1 }
 0x418   : > { %v2647_v12 = vadd.f32 %v3735_v4, %v2646_v16 }
 0x419   : > { %v4120_v28 = vpop.f32.mrf.mxu1 }
 0x41a   : > { %v5945_v1 = vmax.f32 %v2647_v12, 0.0  ;;  %v1664_v12 = vmul.f32 %v1663_v53, %v5879_v21 }
 0x41b   : > { %v2649_v48 = vpop.f32.mrf.mxu1 }
 0x41c   : > { %v2650_v17 = vadd.f32 %v3735_v4, %v2649_v48  ;;  %2655 = vrot.lane.b32.xlu0 %v5945_v1, %s4316_s11  ;;  %v2812_v40 = vrot.slane %v5945_v1, 6  ;;  %v2826_v3 = vrot.slane %v5945_v1, 7  ;;  %v2848_v22 = vrot.slane %v5945_v1, 1  ;;  %v6814_v4 = vld [vmem:[#allocation6_spill] sm:$0xff] }
 0x41d   : > { %v4121_v7 = vpop.f32.mrf.mxu1  ;;  %v2862_v34 = vrot.slane %v5945_v1, 2  ;;  %v1685_v16 = vrot.slane %v3632_v27, %v6814_v4 }
 0x41e   : > { %v5949_v2 = vmax.f32 %v2650_v17, 0.0  ;;  %v6815_v17 = vld [vmem:[#allocation9_spill] sm:$0xff] }
 0x41f   : > { %v1605_v7 = vrot.slane %v3632_v27, %v6815_v17 }
 0x420   : > { %2661 = vrot.lane.b32.xlu0 %v5945_v1, %s4315_s28  ;;  %2657 = vrot.lane.b32.xlu1 %v5949_v2, %s4316_s11  ;;  %v2813_v60 = vrot.slane %v5949_v2, 6  ;;  %v2827_v39 = vrot.slane %v5949_v2, 7  ;;  %v2849_v25 = vrot.slane %v5949_v2, 1  ;;  %v2863_v52 = vrot.slane %v5949_v2, 2 }
 0x422   : > { %v5964_v61 = vsel %vm1128_vm7, %v2812_v40, %v2813_v60  ;;  %v5968_v56 = vsel %vm1128_vm7, %v2813_v60, %v2812_v40  ;;  %v5972_v9 = vsel %vm655_vm1, %v2826_v3, %v2827_v39  ;;  %v5976_v43 = vsel %vm655_vm1, %v2827_v39, %v2826_v3 }
 0x423   : > { %v5985_v24 = vsel %vm680_vm2, %v2848_v22, %v2849_v25  ;;  %v5989_v38 = vsel %vm680_vm2, %v2849_v25, %v2848_v22  ;;  %v5993_v47 = vsel %vm1153_vm9, %v2862_v34, %v2863_v52  ;;  %v5997_v13 = vsel %vm1153_vm9, %v2863_v52, %v2862_v34  ;;  %v6817_v52 = vld [vmem:[#allocation8_spill] sm:$0xff] }
 0x424   : > { %2667 = vrot.lane.b32.xlu0 %v5945_v1, %s4314_s27  ;;  %2663 = vrot.lane.b32.xlu1 %v5949_v2, %s4315_s28  ;;  %v1627_v40 = vrot.slane %v3632_v27, %v6816_v19  ;;  %v1659_v60 = vsel %vm684_vm6, %v5887_v29, 0.0  ;;  %v1650_v39 = vmul.f32 %v1649_v54, %v5855_v41  ;;  %v1677_v34 = vrot.slane %v3632_v27, %v6817_v52 }
 0x425   : > { %v1665_v20 = vmul.f32 %v1663_v53, %v1659_v60 }
 0x428   : > { %2673 = vrot.lane.b32.xlu0 %v5945_v1, %s4317_s18  ;;  %2669 = vrot.lane.b32.xlu1 %v5949_v2, %s4314_s27 }
 0x42c   : > { %639 = vrot.lane.b32.xlu0 %v6805_v44, %s4315_s28  ;;  %2675 = vrot.lane.b32.xlu1 %v5949_v2, %s4317_s18 }
 0x430   : > { %645 = vrot.lane.b32.xlu0 %v6805_v44, %s4314_s27  ;;  %641 = vrot.lane.b32.xlu1 %v6806_v32, %s4315_s28 }
 0x434   : > { %647 = vrot.lane.b32.xlu1 %v6806_v32, %s4314_s27  ;;  %s3813_s27 = sshll.u32 (%p4393_p4), %s4381_s12, 4 }
 0x435   : > { %s3386_s30 = scalar_lea.vmem (%p4393_p4), %s6664_s9, %s3813_s27 }
 0x437   : > { %v6013_v18 = vpop.f32.mrf.mxu1 }
 0x439   : > { %v4160_v33 = vpop.f32.mrf.mxu1 }
 0x43b   : > { %v6015_v23 = vpop.f32.mrf.mxu1 }
 0x43c   : > { %6809 = vst [vmem:[#allocation20_spill] sm:$0xff] %v6015_v23 }
 0x43d   : > { %v4161_v11 = vpop.f32.mrf.mxu1 }
 0x44e   : > { %v1582_v26 = vpop.permute.xlu0 %1581 }
 0x44f   : > { %v1585_v63 = vsel %vm598_vm5, %v1582_v26, 0.0  ;;  %v1651_v26 = vmul.f32 %v1649_v54, %v5862_v5 }
 0x450   : > { %v1614_v15 = vmul.f32 %v1613_v0, %v1585_v63  ;;  %v1596_v22 = vrot.slane %v1585_v63, 7  ;;  %v1618_v21 = vrot.slane %v1585_v63, 1 }
 0x452   : > { %v1644_v59 = vadd.f32 %v1642_v6, %v1614_v15  ;;  %v1584_v28 = vpop.permute.xlu1 %1583  ;;  %v1588_v48 = vpop.permute.xlu0 %1587  ;;  %v1643_v6 = vmul.f32 %v1641_v36, %v5883_v8 }
 0x453   : > { %v1586_v3 = vsel %vm598_vm5, %v1584_v28, 0.0  ;;  %v1591_v15 = vsel %vm605_vm3, %v1588_v48, 0.0 }
 0x454   : > { %v1666_v25 = vadd.f32 %v1664_v12, %v1644_v59  ;;  %v1597_v33 = vrot.slane %v1586_v3, 7  ;;  %v1615_v11 = vmul.f32 %v1613_v0, %v1586_v3  ;;  %v1619_v35 = vrot.slane %v1586_v3, 1 }
 0x455   : > { %v1668_v48 = vrot.slane %v1591_v15, 7  ;;  %v1690_v3 = vrot.slane %v1591_v15, 1 }
 0x456   : > { %v1590_v28 = vpop.permute.xlu1 %1589  ;;  %v1598_v41 = vsel %vm655_vm1, %v1596_v22, %v1597_v33  ;;  %v1599_v29 = vsel %vm655_vm1, %v1597_v33, %v1596_v22  ;;  %v1620_v27 = vsel %vm680_vm2, %v1618_v21, %v1619_v35  ;;  %v1621_v0 = vsel %vm680_vm2, %v1619_v35, %v1618_v21 }
 0x457   : > { %v1600_v5 = vsel %vm658_vm4, %v1599_v29, 0.0  ;;  %v1607_v63 = vmul.f32 %v1605_v7, %v1598_v41  ;;  %v1623_v8 = vsel %vm684_vm6, %v1621_v0, 0.0  ;;  %v1628_v36 = vmul.f32 %v1627_v40, %v1620_v27  ;;  %v3634_v41 = vld [vmem:[%s6661_s6 + $0x48] ss:$0 sm:$0xff] }
 0x458   : > { %v1606_v53 = vmul.f32 %v1605_v7, %v1600_v5  ;;  %v1629_v54 = vmul.f32 %v1627_v40, %v1623_v8  ;;  %v1645_v59 = vadd.f32 %v1643_v6, %v1615_v11  ;;  %v1592_v12 = vsel %vm605_vm3, %v1590_v28, 0.0 }
 0x459   : > { %v1669_v60 = vrot.slane %v1592_v12, 7  ;;  %v1691_v22 = vrot.slane %v1592_v12, 1  ;;  %v1687_v62 = vmul.f32 %v1685_v16, %v1592_v12  ;;  %v1686_v0 = vmul.f32 %v1685_v16, %v1591_v15  ;;  %v4273_v16 = vld [vmem:[%s6659_s4 + $0x1b0] sm:$0xff]  }
 0x45a   : > { %v1630_v33 = vadd.f32 %v1628_v36, %v1606_v53  ;;  %v1631_v21 = vadd.f32 %v1629_v54, %v1607_v63  ;;  %v1667_v35 = vadd.f32 %v1665_v20, %v1645_v59  ;;  %v2069_v15 = vsel %vm658_vm4, %v5926_v58, 0.0  ;;  %v4275_v58 = vld [vmem:[%s6659_s4 + $0x1a0] sm:$0xff]  }
 0x45b   : > { %v1670_v7 = vsel %vm655_vm1, %v1668_v48, %v1669_v60  ;;  %v1671_v40 = vsel %vm655_vm1, %v1669_v60, %v1668_v48  ;;  %v1692_v11 = vsel %vm680_vm2, %v1690_v3, %v1691_v22  ;;  %v1693_v6 = vsel %vm680_vm2, %v1691_v22, %v1690_v3 }
 0x45c   : > { %v1652_v28 = vadd.f32 %v1650_v39, %v1630_v33  ;;  %v1653_v29 = vadd.f32 %v1651_v26, %v1631_v21  ;;  %v1672_v20 = vsel %vm658_vm4, %v1671_v40, 0.0  ;;  %v1679_v27 = vmul.f32 %v1677_v34, %v1670_v7  ;;  %v4272_v26 = vld [vmem:[%s6659_s4 + $0x1b8] sm:$0xff]   ;;  %v4274_v33 = vld [vmem:[%s6659_s4 + $0x1a8] sm:$0xff]  }
 0x45d   : > { %v1678_v5 = vmul.f32 %v1677_v34, %v1672_v20  ;;  %v1695_v63 = vsel %vm684_vm6, %v1693_v6, 0.0  ;;  %v1700_v54 = vmul.f32 %v3634_v41, %v1692_v11  ;;  %v1689_v59 = vadd.f32 %v1687_v62, %v1667_v35  ;;  %v3690_v62 = vld [vmem:[%s6661_s6 + $0x60] sm:$0xff] }
 0x45e   : > { %v1681_v8 = vadd.f32 %v1679_v27, %v1653_v29  ;;  %v1701_v36 = vmul.f32 %v3634_v41, %v1695_v63  ;;  %v1688_v48 = vadd.f32 %v1686_v0, %v1666_v25  ;;  %v2046_v25 = vrot.slane %v3690_v62, %v6810_v37 }
 0x45f   : > { %v1680_v53 = vadd.f32 %v1678_v5, %v1652_v28  ;;  %v2074_v34 = vrot.slane %v3690_v62, %v6811_v50  ;;  %v2096_v35 = vrot.slane %v3690_v62, %v6812_v55  ;;  %v2082_v7 = vrot.slane %v3690_v62, %v6813_v49 }
 0x460   : > { %v1703_v12 = vadd.f32 %v1701_v36, %v1681_v8  ;;  %v2118_v28 = vrot.slane %v3690_v62, %v6814_v4  ;;  %v2038_v0 = vrot.slane %v3690_v62, %v6815_v17  ;;  %v2060_v5 = vrot.slane %v3690_v62, %v6816_v19 }
 0x461   : > { %v1702_v60 = vadd.f32 %v1700_v54, %v1680_v53  ;;  %v2075_v11 = vmul.f32 %v2074_v34, %v2069_v15  ;;  %v2097_v29 = vmul.f32 %v2096_v35, %v5930_v42  ;;  %v2092_v8 = vsel %vm684_vm6, %v5938_v30, 0.0 }
 0x462   : > { %v1705_v3 = vadd.f32 %v1703_v12, %v1689_v59  ;;  %v2083_v36 = vmul.f32 %v2082_v7, %v5910_v46  ;;  %v2110_v59 = vrot.slane %v3690_v62, %v6817_v52  ;;  %v2076_v46 = vmul.f32 %v2074_v34, %v5934_v14 }
 0x463   : > { %v1704_v39 = vadd.f32 %v1702_v60, %v1688_v48 }
 0x465   : > { %v1723_v22 = vpack.c.bf16 %v1705_v3, %v1704_v39  ;;  %v4276_v3 = vld [vmem:[%s6659_s4 + $0x198] sm:$0xff]   ;;  %v2084_v39 = vmul.f32 %v2082_v7, %v5914_v31 }
 0x467   : > { %4059 = vmatmul.mubr.bf16.vlgmr.msra.gmra.mxu0 %v1723_v22  ;;  %v2098_v22 = vmul.f32 %v2096_v35, %v2092_v8 }
 0x468   : > { %4083 = vmatpush3.bf16.msra.mxu0 %v4272_v26  ;;  %4098 = vmatprep.mubr.msk.bf16.mxu0 %vm4313_vm0, %v6764_v10 }
 0x469   : > { %4084 = vmatprep.subr.bf16.mxu0 %v6764_v10 }
 0x46c   : > { %4085 = vmatpush3.bf16.msra.mxu0 %v4273_v16 }
 0x46d   : > { %4086 = vmatprep.subr.bf16.mxu0 %v6764_v10 }
 0x46e   : > { %v2015_v21 = vpop.permute.xlu0 %2014 }
 0x46f   : > { %v2018_v41 = vsel %vm598_vm5, %v2015_v21, 0.0 }
 0x470   : > { %v2047_v40 = vmul.f32 %v2046_v25, %v2018_v41  ;;  %4087 = vmatpush3.bf16.msra.mxu0 %v4274_v33  ;;  %v2029_v53 = vrot.slane %v2018_v41, 7  ;;  %v2051_v42 = vrot.slane %v2018_v41, 1 }
 0x471   : > { %4088 = vmatprep.subr.bf16.mxu0 %v6764_v10 }
 0x472   : > { %v2077_v6 = vadd.f32 %v2075_v11, %v2047_v40  ;;  %v2017_v20 = vpop.permute.xlu1 %2016  ;;  %v2021_v27 = vpop.permute.xlu0 %2020  ;;  %v4277_v40 = vld [vmem:[%s6659_s4 + $0x190] sm:$0xff]  }
 0x473   : > { %v2019_v63 = vsel %vm598_vm5, %v2017_v20, 0.0  ;;  %v2024_v30 = vsel %vm605_vm3, %v2021_v27, 0.0 }
 0x474   : > { %v2099_v54 = vadd.f32 %v2097_v29, %v2077_v6  ;;  %v2030_v12 = vrot.slane %v2019_v63, 7  ;;  %v2048_v48 = vmul.f32 %v2046_v25, %v2019_v63  ;;  %v2052_v60 = vrot.slane %v2019_v63, 1  ;;  %4089 = vmatpush3.bf16.msra.mxu0 %v4275_v58 }
 0x475   : > { %4090 = vmatprep.subr.bf16.mxu0 %v6764_v10  ;;  %v2101_v11 = vrot.slane %v2024_v30, 7  ;;  %v2123_v58 = vrot.slane %v2024_v30, 1 }
 0x476   : > { %v2023_v26 = vpop.permute.xlu1 %2022  ;;  %v2031_v16 = vsel %vm655_vm1, %v2029_v53, %v2030_v12  ;;  %v2032_v62 = vsel %vm655_vm1, %v2030_v12, %v2029_v53  ;;  %v2053_v25 = vsel %vm680_vm2, %v2051_v42, %v2052_v60  ;;  %v2054_v31 = vsel %vm680_vm2, %v2052_v60, %v2051_v42 }
 0x477   : > { %v2033_v15 = vsel %vm658_vm4, %v2032_v62, 0.0  ;;  %v2040_v14 = vmul.f32 %v2038_v0, %v2031_v16  ;;  %v2056_v34 = vsel %vm684_vm6, %v2054_v31, 0.0  ;;  %v2061_v33 = vmul.f32 %v2060_v5, %v2053_v25 }
 0x478   : > { %v2039_v21 = vmul.f32 %v2038_v0, %v2033_v15  ;;  %v2062_v35 = vmul.f32 %v2060_v5, %v2056_v34  ;;  %v2078_v41 = vadd.f32 %v2076_v46, %v2048_v48  ;;  %v2025_v7 = vsel %vm605_vm3, %v2023_v26, 0.0  ;;  %4091 = vmatpush3.bf16.msra.mxu0 %v4276_v3  ;;  %v3692_v5 = vld [vmem:[%s6661_s6 + $0x68] ss:$0 sm:$0xff]  ;;  %v4279_v34 = vld [vmem:[%s6659_s4 + $0x180] sm:$0xff]  }
 0x479   : > { %v2102_v6 = vrot.slane %v2025_v7, 7  ;;  %v2124_v29 = vrot.slane %v2025_v7, 1  ;;  %4092 = vmatprep.subr.bf16.mxu0 %v6764_v10  ;;  %v2120_v0 = vmul.f32 %v2118_v28, %v2025_v7  ;;  %v4278_v26 = vld [vmem:[%s6659_s4 + $0x188] sm:$0xff]  }
 0x47a   : > { %v2063_v20 = vadd.f32 %v2061_v33, %v2039_v21  ;;  %v2064_v27 = vadd.f32 %v2062_v35, %v2040_v14  ;;  %v2100_v63 = vadd.f32 %v2098_v22, %v2078_v41  ;;  %v2119_v22 = vmul.f32 %v2118_v28, %v2024_v30 }
 0x47b   : > { %v2103_v8 = vsel %vm655_vm1, %v2101_v11, %v2102_v6  ;;  %v2104_v53 = vsel %vm655_vm1, %v2102_v6, %v2101_v11  ;;  %v2125_v42 = vsel %vm680_vm2, %v2123_v58, %v2124_v29  ;;  %v2126_v12 = vsel %vm680_vm2, %v2124_v29, %v2123_v58  ;;  %v3744_v6 = vld [vmem:[%s6662_s7 + $0x20] sm:$0xff]  ;;  %v6183_v29 = vld [vmem:[%s6662_s7 + $0x30] sm:$0xff] }
 0x47c   : > { %v2085_v48 = vadd.f32 %v2083_v36, %v2063_v20  ;;  %v2086_v60 = vadd.f32 %v2084_v39, %v2064_v27  ;;  %v2105_v3 = vsel %vm658_vm4, %v2104_v53, 0.0  ;;  %v2112_v46 = vmul.f32 %v2110_v59, %v2103_v8  ;;  %4093 = vmatpush3.bf16.msra.mxu0 %v4277_v40  ;;  %v6169_v40 = vld [vmem:[%s6662_s7 + $0x28] sm:$0xff] }
 0x47d   : > { %v2111_v16 = vmul.f32 %v2110_v59, %v2105_v3  ;;  %v2128_v62 = vsel %vm684_vm6, %v2126_v12, 0.0  ;;  %4094 = vmatprep.subr.bf16.mxu0 %v6764_v10  ;;  %v2133_v39 = vmul.f32 %v3692_v5, %v2125_v42  ;;  %v2122_v15 = vadd.f32 %v2120_v0, %v2100_v63  ;;  %v4281_v63 = vld [vmem:[%s6659_s4 + $0x230] sm:$0xff]  }
 0x47e   : > { %v2114_v25 = vadd.f32 %v2112_v46, %v2086_v60  ;;  %v2134_v31 = vmul.f32 %v3692_v5, %v2128_v62  ;;  %v2121_v33 = vadd.f32 %v2119_v22, %v2099_v54  ;;  %v3330_v28 = vrot.slane %v6805_v44, 7  ;;  %v4280_v54 = vld [vmem:[%s6659_s4 + $0x238] sm:$0xff]  }
 0x47f   : > { %v2113_v36 = vadd.f32 %v2111_v16, %v2085_v48  ;;  %v3331_v59 = vrot.slane %v6806_v32, 7  ;;  %v3340_v35 = vrot.slane %v6805_v44, 1  ;;  %v3341_v41 = vrot.slane %v6806_v32, 1 }
 0x480   : > { %v2136_v14 = vadd.f32 %v2134_v31, %v2114_v25  ;;  %4095 = vmatpush3.bf16.msra.mxu0 %v4278_v26  ;;  %v2843_v27 = vrot.slane %v6169_v40, %v6813_v49  ;;  %v2821_v53 = vrot.slane %v3744_v6, %v6817_v52  ;;  %v2835_v42 = vrot.slane %v3744_v6, %v6812_v55 }
 0x481   : > { %v2135_v21 = vadd.f32 %v2133_v39, %v2113_v36  ;;  %4096 = vmatprep.subr.bf16.mxu0 %v6764_v10  ;;  %v3333_v58 = vsel %vm655_vm1, %v3331_v59, %v3330_v28  ;;  %v3343_v20 = vsel %vm680_vm2, %v3341_v41, %v3340_v35  ;;  %v6198_v5 = vsel %vm680_vm2, %v3340_v35, %v3341_v41 }
 0x482   : > { %v2138_v30 = vadd.f32 %v2136_v14, %v2122_v15  ;;  %v6194_v0 = vsel %vm658_vm4, %v3333_v58, 0.0  ;;  %v6202_v8 = vsel %vm655_vm1, %v3330_v28, %v3331_v59  ;;  %v2857_v12 = vrot.slane %v6183_v29, %v6811_v50 }
 0x483   : > { %v2137_v7 = vadd.f32 %v2135_v21, %v2121_v33  ;;  %v6213_v48 = vsel %vm684_vm6, %v3343_v20, 0.0  ;;  %v6217_v60 = vrot.slane %v6169_v40, %v6817_v52  ;;  %v6221_v3 = vrot.slane %v6169_v40, %v6810_v37 }
 0x484   : > { %4097 = vmatpush3.bf16.msra.mxu0 %v4279_v34  ;;  %v6224_v46 = vrot.slane %v3744_v6, %v6815_v17  ;;  %v2871_v26 = vrot.slane %v6183_v29, %v6816_v19  ;;  %v6229_v22 = vrot.slane %v3744_v6, %v6814_v4  ;;  %v6233_v16 = vrot.slane %v6169_v40, %v6812_v55 }
 0x485   : > { %v2156_v11 = vpack.c.bf16 %v2138_v30, %v2137_v7  ;;  %4122 = vmatprep.subr.bf16.mxu0 %v6764_v10  ;;  %v6237_v62 = vrot.slane %v6183_v29, %v6813_v49  ;;  %v6240_v25 = vmul.f32 %v2843_v27, %v5945_v1  ;;  %v6244_v31 = vrot.slane %v6169_v40, %v6814_v4  ;;  %v4282_v1 = vld [vmem:[%s6659_s4 + $0x228] sm:$0xff]  }
 0x486   : > { %v6247_v36 = vrot.slane %v3744_v6, %v6811_v50  ;;  %v2816_v39 = vsel %vm1131_vm8, %v5968_v56, 0.0  ;;  %v2830_v15 = vsel %vm658_vm4, %v5976_v43, 0.0  ;;  %v6259_v34 = vrot.slane %v3744_v6, %v6816_v19 }
 0x487   : > { %4099 = vmatmul.mubr.bf16.vlgmr.msra.gmra.mxu0 %v2156_v11  ;;  %v6263_v33 = vrot.slane %v6183_v29, %v6815_v17  ;;  %v2853_v56 = vsel %vm684_vm6, %v5989_v38, 0.0  ;;  %v2867_v43 = vsel %vm1157_vm10, %v5997_v13, 0.0  ;;  %v6274_v21 = vrot.slane %v6183_v29, %v6814_v4 }
 0x488   : > { %4123 = vmatpush3.bf16.msra.mxu0 %v4280_v54  ;;  %4138 = vmatprep.mubr.msk.bf16.mxu0 %vm4313_vm0, %v6764_v10  ;;  %v6277_v28 = vmul.f32 %v2821_v53, %v5964_v61  ;;  %v6280_v59 = vmul.f32 %v2835_v42, %v5972_v9  ;;  %v6283_v30 = vmul.f32 %v2843_v27, %v5949_v2 }
 0x489   : > { %4124 = vmatprep.subr.bf16.mxu0 %v6764_v10  ;;  %v6285_v38 = vmul.f32 %v2821_v53, %v2816_v39  ;;  %v6287_v35 = vmul.f32 %v2835_v42, %v2830_v15  ;;  %v6290_v13 = vmul.f32 %v2857_v12, %v5985_v24  ;;  %v6293_v41 = vmul.f32 %v2871_v26, %v5993_v47  ;;  %v4283_v24 = vld [vmem:[%s6659_s4 + $0x220] sm:$0xff]  }
 0x48a   : > { %v6299_v9 = vrot.slane %v6169_v40, %v6816_v19  ;;  %v6301_v4 = vmul.f32 %v2857_v12, %v2853_v56  ;;  %v6303_v2 = vmul.f32 %v2871_v26, %v2867_v43  ;;  %v6309_v47 = vrot.slane %v3744_v6, %v6810_v37 }
 0x48b   : > { %v6313_v11 = vrot.slane %v6169_v40, %v6815_v17  ;;  %v6317_v19 = vrot.slane %v6183_v29, %v6817_v52  ;;  %v6321_v58 = vrot.slane %v6183_v29, %v6812_v55  ;;  %v6331_v17 = vrot.slane %v3744_v6, %v6813_v49  ;;  %v4284_v49 = vld [vmem:[%s6659_s4 + $0x218] sm:$0xff]  }
 0x48c   : > { %4125 = vmatpush3.bf16.msra.mxu0 %v4281_v63  ;;  %v6335_v52 = vrot.slane %v6169_v40, %v6811_v50  ;;  %v6340_v42 = vrot.slane %v6183_v29, %v6810_v37 }
 0x48d   : > { %4126 = vmatprep.subr.bf16.mxu0 %v6764_v10 }
 0x48e   : > { %v2656_v14 = vpop.permute.xlu0 %2655 }
 0x48f   : > { %v2659_v61 = vsel %vm591_vm11, %v2656_v14, 0.0 }
 0x490   : > { %4127 = vmatpush3.bf16.msra.mxu0 %v4282_v1  ;;  %v2684_v63 = vrot.slane %v2659_v61, 6  ;;  %v2698_v53 = vrot.slane %v2659_v61, 7  ;;  %v2716_v55 = vmul.f32 %v6217_v60, %v2659_v61  ;;  %v2720_v12 = vrot.slane %v2659_v61, 1 }
 0x491   : > { %4128 = vmatprep.subr.bf16.mxu0 %v6764_v10  ;;  %v2734_v26 = vrot.slane %v2659_v61, 2 }
 0x492   : > { %v2662_v7 = vpop.permute.xlu0 %2661  ;;  %v2658_v54 = vpop.permute.xlu1 %2657 }
 0x493   : > { %v6326_v20 = vsel %vm598_vm5, %v2662_v7, 0.0  ;;  %v2660_v27 = vsel %vm591_vm11, %v2658_v54, 0.0 }
 0x494   : > { %v2685_v39 = vrot.slane %v2660_v27, 6  ;;  %v2699_v15 = vrot.slane %v2660_v27, 7  ;;  %4129 = vmatpush3.bf16.msra.mxu0 %v4283_v24  ;;  %v2748_v50 = vrot.slane %v6326_v20, 6  ;;  %v2762_v40 = vrot.slane %v6326_v20, 7 }
 0x495   : > { %v2721_v6 = vrot.slane %v2660_v27, 1  ;;  %v2735_v1 = vrot.slane %v2660_v27, 2  ;;  %4130 = vmatprep.subr.bf16.mxu0 %v6764_v10  ;;  %v2717_v54 = vmul.f32 %v6217_v60, %v2660_v27 }
 0x496   : > { %v2686_v37 = vsel %vm1128_vm7, %v2684_v63, %v2685_v39  ;;  %v2687_v29 = vsel %vm1128_vm7, %v2685_v39, %v2684_v63  ;;  %v2700_v14 = vsel %vm655_vm1, %v2698_v53, %v2699_v15  ;;  %v2701_v56 = vsel %vm655_vm1, %v2699_v15, %v2698_v53  ;;  %v2668_v43 = vpop.permute.xlu0 %2667  ;;  %v2664_v15 = vpop.permute.xlu1 %2663 }
 0x497   : > { %v2688_v61 = vsel %vm1131_vm8, %v2687_v29, 0.0  ;;  %v2695_v24 = vmul.f32 %v6224_v46, %v2686_v37  ;;  %v2702_v7 = vsel %vm658_vm4, %v2701_v56, 0.0  ;;  %v2709_v63 = vmul.f32 %v6229_v22, %v2700_v14  ;;  %v4285_v37 = vld [vmem:[%s6659_s4 + $0x210] sm:$0xff]  }
 0x498   : > { %v2694_v23 = vmul.f32 %v6224_v46, %v2688_v61  ;;  %v2722_v39 = vsel %vm680_vm2, %v2720_v12, %v2721_v6  ;;  %v2723_v53 = vsel %vm680_vm2, %v2721_v6, %v2720_v12  ;;  %4131 = vmatpush3.bf16.msra.mxu0 %v4284_v49  ;;  %v2708_v29 = vmul.f32 %v6229_v22, %v2702_v7 }
 0x499   : > { %v2725_v60 = vsel %vm684_vm6, %v2723_v53, 0.0  ;;  %v2730_v46 = vmul.f32 %v6233_v16, %v2722_v39  ;;  %v2736_v27 = vsel %vm1153_vm9, %v2734_v26, %v2735_v1  ;;  %4132 = vmatprep.subr.bf16.mxu0 %v6764_v10  ;;  %v2719_v12 = vadd.f32 %v2717_v54, %v2695_v24  ;;  %v4286_v24 = vld [vmem:[%s6659_s4 + $0x208] sm:$0xff]  }
 0x49a   : > { %v2718_v14 = vadd.f32 %v2716_v55, %v2694_v23  ;;  %v2731_v49 = vmul.f32 %v6233_v16, %v2725_v60  ;;  %v2737_v6 = vsel %vm1153_vm9, %v2735_v1, %v2734_v26  ;;  %v2744_v56 = vmul.f32 %v6237_v62, %v2736_v27  ;;  %v2674_v1 = vpop.permute.xlu0 %2673 }
 0x49b   : > { %v2739_v22 = vsel %vm1157_vm10, %v2737_v6, 0.0  ;;  %v6386_v61 = vsel %vm605_vm3, %v2668_v43, 0.0  ;;  %v2666_v7 = vsel %vm598_vm5, %v2664_v15, 0.0  ;;  %v2780_v23 = vmul.f32 %v6221_v3, %v6326_v20 }
 0x49c   : > { %v2784_v16 = vrot.slane %v6326_v20, 1  ;;  %v2798_v55 = vrot.slane %v6326_v20, 2  ;;  %v2745_v26 = vmul.f32 %v6237_v62, %v2739_v22  ;;  %4133 = vmatpush3.bf16.msra.mxu0 %v4285_v37  ;;  %v2732_v43 = vadd.f32 %v2730_v46, %v2708_v29 }
 0x49d   : > { %v2746_v54 = vadd.f32 %v2744_v56, %v2718_v14  ;;  %v2876_v39 = vrot.slane %v6386_v61, 6  ;;  %v2890_v53 = vrot.slane %v6386_v61, 7  ;;  %4134 = vmatprep.subr.bf16.mxu0 %v6764_v10  ;;  %v2733_v60 = vadd.f32 %v2731_v49, %v2709_v63 }
 0x49e   : > { %v2747_v15 = vadd.f32 %v2745_v26, %v2719_v12  ;;  %v2749_v27 = vrot.slane %v2666_v7, 6  ;;  %v2763_v20 = vrot.slane %v2666_v7, 7  ;;  %v2781_v62 = vmul.f32 %v6221_v3, %v2666_v7  ;;  %v4287_v3 = vld [vmem:[%s6659_s4 + $0x200] sm:$0xff]  }
 0x49f   : > { %v2785_v6 = vrot.slane %v2666_v7, 1  ;;  %v2799_v37 = vrot.slane %v2666_v7, 2  ;;  %v6404_v22 = vsel %vm612_vm12, %v2674_v1, 0.0 }
 0x4a0   : > { %v2750_v29 = vsel %vm1128_vm7, %v2748_v50, %v2749_v27  ;;  %v2751_v46 = vsel %vm1128_vm7, %v2749_v27, %v2748_v50  ;;  %v2764_v14 = vsel %vm655_vm1, %v2762_v40, %v2763_v20  ;;  %v2765_v63 = vsel %vm655_vm1, %v2763_v20, %v2762_v40  ;;  %4135 = vmatpush3.bf16.msra.mxu0 %v4286_v24  ;;  %v2670_v24 = vpop.permute.xlu1 %2669 }
 0x4a1   : > { %v2752_v12 = vsel %vm1131_vm8, %v2751_v46, 0.0  ;;  %v2759_v49 = vmul.f32 %v6247_v36, %v2750_v29  ;;  %v2766_v56 = vsel %vm658_vm4, %v2765_v63, 0.0  ;;  %v2773_v50 = vmul.f32 %v6259_v34, %v2764_v14  ;;  %4136 = vmatprep.subr.bf16.mxu0 %v6764_v10 }
 0x4a2   : > { %v2758_v7 = vmul.f32 %v6247_v36, %v2752_v12  ;;  %v2772_v40 = vmul.f32 %v6259_v34, %v2766_v56  ;;  %v2786_v26 = vsel %vm680_vm2, %v2784_v16, %v2785_v6  ;;  %v2787_v1 = vsel %vm680_vm2, %v2785_v6, %v2784_v16 }
 0x4a3   : > { %v2761_v27 = vadd.f32 %v2759_v49, %v2733_v60  ;;  %v2775_v20 = vadd.f32 %v2773_v50, %v2747_v15  ;;  %v2789_v29 = vsel %vm684_vm6, %v2787_v1, 0.0  ;;  %v2794_v46 = vmul.f32 %v6263_v33, %v2786_v26 }
 0x4a4   : > { %v2760_v14 = vadd.f32 %v2758_v7, %v2732_v43  ;;  %v2774_v10 = vadd.f32 %v2772_v40, %v2746_v54  ;;  %v2795_v36 = vmul.f32 %v6263_v33, %v2789_v29  ;;  %v2800_v34 = vsel %vm1153_vm9, %v2798_v55, %v2799_v37  ;;  %4137 = vmatpush3.bf16.msra.mxu0 %v4287_v3 }
 0x4a5   : > { %v2783_v63 = vadd.f32 %v2781_v62, %v2761_v27  ;;  %v2801_v16 = vsel %vm1153_vm9, %v2799_v37, %v2798_v55  ;;  %v2808_v60 = vmul.f32 %v6274_v21, %v2800_v34  ;;  %v2672_v15 = vsel %vm605_vm3, %v2670_v24, 0.0  ;;  %v2676_v34 = vpop.permute.xlu1 %2675 }
 0x4a6   : > { %v2782_v6 = vadd.f32 %v2780_v23, %v2760_v14  ;;  %v2796_v12 = vadd.f32 %v2794_v46, %v2774_v10  ;;  %v2797_v49 = vadd.f32 %v2795_v36, %v2775_v20  ;;  %v2803_v43 = vsel %vm1157_vm10, %v2801_v16, 0.0  ;;  %v640_v36 = vpop.permute.xlu0 %639 }
 0x4a7   : > { %v2908_v33 = vmul.f32 %v6244_v31, %v6386_v61  ;;  %v2912_v54 = vrot.slane %v6386_v61, 1  ;;  %v2926_v62 = vrot.slane %v6386_v61, 2  ;;  %v2809_v55 = vmul.f32 %v6274_v21, %v2803_v43 }
 0x4a8   : > { %v2810_v37 = vadd.f32 %v2808_v60, %v2782_v6  ;;  %v2824_v3 = vadd.f32 %v6285_v38, %v2796_v12  ;;  %v2825_v56 = vadd.f32 %v6277_v28, %v2797_v49  ;;  %v2940_v23 = vrot.slane %v6404_v22, 6 }
 0x4a9   : > { %v2811_v50 = vadd.f32 %v2809_v55, %v2783_v63  ;;  %v2954_v7 = vrot.slane %v6404_v22, 7  ;;  %v2877_v40 = vrot.slane %v2672_v15, 6  ;;  %v2891_v26 = vrot.slane %v2672_v15, 7 }
 0x4aa   : > { %v2838_v1 = vadd.f32 %v6287_v35, %v2810_v37  ;;  %v2846_v24 = vadd.f32 %v6240_v25, %v2824_v3  ;;  %v2847_v27 = vadd.f32 %v6283_v30, %v2825_v56  ;;  %v2913_v20 = vrot.slane %v2672_v15, 1 }
 0x4ab   : > { %v2839_v21 = vadd.f32 %v6280_v59, %v2811_v50  ;;  %v2878_v28 = vsel %vm1128_vm7, %v2876_v39, %v2877_v40  ;;  %v2879_v38 = vsel %vm1128_vm7, %v2877_v40, %v2876_v39  ;;  %v2892_v25 = vsel %vm655_vm1, %v2890_v53, %v2891_v26 }
 0x4ac   : > { %v2860_v30 = vadd.f32 %v6290_v13, %v2838_v1  ;;  %v2874_v35 = vadd.f32 %v6293_v41, %v2846_v24  ;;  %v2875_v59 = vadd.f32 %v6303_v2, %v2847_v27  ;;  %v2880_v29 = vsel %vm1131_vm8, %v2879_v38, 0.0 }
 0x4ad   : > { %v2861_v46 = vadd.f32 %v6301_v4, %v2839_v21  ;;  %v2886_v14 = vmul.f32 %v6309_v47, %v2880_v29  ;;  %v2887_v39 = vmul.f32 %v6309_v47, %v2878_v28  ;;  %v2893_v10 = vsel %vm655_vm1, %v2891_v26, %v2890_v53 }
 0x4ae   : > { %v2894_v13 = vsel %vm658_vm4, %v2893_v10, 0.0  ;;  %v2901_v41 = vmul.f32 %v6313_v11, %v2892_v25  ;;  %v2914_v2 = vsel %vm680_vm2, %v2912_v54, %v2913_v20  ;;  %v2915_v4 = vsel %vm680_vm2, %v2913_v20, %v2912_v54  ;;  %v642_v20 = vpop.permute.xlu1 %641 }
 0x4af   : > { %v2888_v63 = vadd.f32 %v2886_v14, %v2860_v30  ;;  %v2889_v47 = vadd.f32 %v2887_v39, %v2861_v46  ;;  %v2900_v61 = vmul.f32 %v6313_v11, %v2894_v13  ;;  %v2917_v53 = vsel %vm684_vm6, %v2915_v4, 0.0 }
 0x4b0   : > { %v6492_v16 = vmul.f32 %v6299_v9, %v6404_v22  ;;  %v2976_v60 = vrot.slane %v6404_v22, 1  ;;  %v2990_v6 = vrot.slane %v6404_v22, 2  ;;  %v2927_v12 = vrot.slane %v2672_v15, 2 }
 0x4b1   : > { %v2902_v49 = vadd.f32 %v2900_v61, %v2874_v35  ;;  %v2903_v43 = vadd.f32 %v2901_v41, %v2875_v59  ;;  %v2909_v54 = vmul.f32 %v6244_v31, %v2672_v15  ;;  %v6499_v55 = vsel %vm598_vm5, %v640_v36, 0.0  ;;  %v646_v15 = vpop.permute.xlu0 %645 }
 0x4b2   : > { %v2922_v11 = vmul.f32 %v6317_v19, %v2914_v2  ;;  %v2923_v37 = vmul.f32 %v6317_v19, %v2917_v53  ;;  %v2928_v3 = vsel %vm1153_vm9, %v2926_v62, %v2927_v12  ;;  %v2929_v56 = vsel %vm1153_vm9, %v2927_v12, %v2926_v62  ;;  %v3748_v2 = vld [vmem:[%s6662_s7 + $0x38] ss:$0 sm:$0xff] }
 0x4b3   : > { %v2910_v50 = vadd.f32 %v2908_v33, %v2888_v63  ;;  %v2911_v40 = vadd.f32 %v2909_v54, %v2889_v47  ;;  %v2931_v26 = vsel %vm1157_vm10, %v2929_v56, 0.0  ;;  %v3312_v31 = vrot.slane %v6499_v55, 7 }
 0x4b4   : > { %v2924_v1 = vadd.f32 %v2922_v11, %v2902_v49  ;;  %v2936_v24 = vmul.f32 %v6321_v58, %v2928_v3  ;;  %v3322_v27 = vrot.slane %v6499_v55, 1  ;;  %v2678_v19 = vsel %vm612_vm12, %v2676_v34, 0.0 }
 0x4b5   : > { %v2937_v21 = vmul.f32 %v6321_v58, %v2931_v26  ;;  %v3336_v33 = vadd.f32 %v6194_v0, %v6499_v55  ;;  %v2941_v62 = vrot.slane %v2678_v19, 6  ;;  %v2955_v28 = vrot.slane %v2678_v19, 7 }
 0x4b6   : > { %v2925_v38 = vadd.f32 %v2923_v37, %v2903_v43  ;;  %v2977_v25 = vrot.slane %v2678_v19, 1  ;;  %v2991_v30 = vrot.slane %v2678_v19, 2  ;;  %v6519_v35 = vsel %vm605_vm3, %v646_v15, 0.0 }
 0x4b7   : > { %v2938_v59 = vadd.f32 %v2936_v24, %v2910_v50  ;;  %v2942_v29 = vsel %vm1128_vm7, %v2940_v23, %v2941_v62  ;;  %v2943_v0 = vsel %vm1128_vm7, %v2941_v62, %v2940_v23  ;;  %v2957_v58 = vsel %vm655_vm1, %v2955_v28, %v2954_v7 }
 0x4b8   : > { %v2944_v46 = vsel %vm1131_vm8, %v2943_v0, 0.0  ;;  %v2951_v14 = vmul.f32 %v6331_v17, %v2942_v29  ;;  %v2956_v39 = vsel %vm655_vm1, %v2954_v7, %v2955_v28  ;;  %v2958_v10 = vsel %vm658_vm4, %v2957_v58, 0.0 }
 0x4b9   : > { %v2939_v36 = vadd.f32 %v2937_v21, %v2911_v40  ;;  %v2973_v23 = vmul.f32 %v6299_v9, %v2678_v19  ;;  %v2978_v13 = vsel %vm680_vm2, %v2976_v60, %v2977_v25  ;;  %v2979_v41 = vsel %vm680_vm2, %v2977_v25, %v2976_v60  ;;  %v648_v9 = vpop.permute.xlu1 %647 }
 0x4ba   : > { %v2950_v22 = vmul.f32 %v6331_v17, %v2944_v46  ;;  %v2953_v4 = vadd.f32 %v2951_v14, %v2925_v38  ;;  %v2981_v7 = vsel %vm684_vm6, %v2979_v41, 0.0  ;;  %v2992_v34 = vsel %vm1153_vm9, %v2990_v6, %v2991_v30 }
 0x4bb   : > { %v2964_v63 = vmul.f32 %v6335_v52, %v2958_v10  ;;  %v2965_v47 = vmul.f32 %v6335_v52, %v2956_v39  ;;  %v2993_v61 = vsel %vm1153_vm9, %v2991_v30, %v2990_v6  ;;  %v3346_v53 = vadd.f32 %v6198_v5, %v3336_v33 }
 0x4bc   : > { %v2952_v60 = vadd.f32 %v2950_v22, %v2924_v1  ;;  %v2986_v17 = vmul.f32 %v6340_v42, %v2978_v13  ;;  %v2987_v12 = vmul.f32 %v6340_v42, %v2981_v7  ;;  %v2995_v49 = vsel %vm1157_vm10, %v2993_v61, 0.0  ;;  %v3795_v13 = vld [vmem:[%s6660_s5 + $0xb] ss:$0 sm:$0xff]  ;;  %v3595_v61 = vld [vmem:[%s6660_s5 + $0x4] ss:$0 sm:$0xff] }
 0x4bd   : > { %v2975_v43 = vadd.f32 %v2973_v23, %v2953_v4  ;;  %v3000_v54 = vmul.f32 %v3748_v2, %v2992_v34  ;;  %v644_v55 = vsel %vm598_vm5, %v642_v20, 0.0  ;;  %v650_v52 = vsel %vm605_vm3, %v648_v9, 0.0  ;;  %v6818_v4 = vld [vmem:[#allocation20_spill] sm:$0xff] }
 0x4be   : > { %v3348_v6 = vrot.slane %v6519_v35, 7  ;;  %v3313_v11 = vrot.slane %v644_v55, 7  ;;  %v3323_v5 = vrot.slane %v644_v55, 1  ;;  %v3349_v37 = vrot.slane %v650_v52, 7 }
 0x4bf   : > { %v3001_v3 = vmul.f32 %v3748_v2, %v2995_v49  ;;  %v3337_v56 = vadd.f32 %v6202_v8, %v644_v55  ;;  %v3359_v42 = vrot.slane %v650_v52, 1  ;;  %v2966_v50 = vadd.f32 %v2964_v63, %v2938_v59  ;;  %v6820_v55 = vld [vmem:[#allocation27_spill] sm:$0xff] }
 0x4c0   : > { %v3314_v40 = vsel %vm655_vm1, %v3312_v31, %v3313_v11  ;;  %v3315_v26 = vsel %vm655_vm1, %v3313_v11, %v3312_v31  ;;  %v3324_v51 = vsel %vm680_vm2, %v3322_v27, %v3323_v5  ;;  %v3325_v15 = vsel %vm680_vm2, %v3323_v5, %v3322_v27 }
 0x4c1   : > { %v3358_v1 = vrot.slane %v6519_v35, 1  ;;  %v3316_v24 = vsel %vm658_vm4, %v3315_v26, 0.0  ;;  %v3327_v8 = vsel %vm684_vm6, %v3325_v15, 0.0  ;;  %v2967_v19 = vadd.f32 %v2965_v47, %v2939_v36 }
 0x4c2   : > { %v3003_v20 = vadd.f32 %v3001_v3, %v2975_v43  ;;  %v3328_v21 = vadd.f32 %v3324_v51, %v3316_v24  ;;  %v3329_v33 = vadd.f32 %v3327_v8, %v3314_v40  ;;  %v3351_v31 = vsel %vm655_vm1, %v3349_v37, %v3348_v6  ;;  %v3765_v40 = vld [vmem:[%s6660_s5 + $0xa] ss:$0 sm:$0xff] }
 0x4c3   : > { %v3347_v62 = vadd.f32 %v6213_v48, %v3337_v56  ;;  %v3350_v27 = vsel %vm655_vm1, %v3348_v6, %v3349_v37  ;;  %v3352_v28 = vsel %vm658_vm4, %v3351_v31, 0.0  ;;  %v2974_v38 = vadd.f32 %v6492_v16, %v2952_v60  ;;  %v3429_v31 = vld [vmem:[%s5831_s22] sm:$0xff] (%p4393_p4) }
 0x4c4   : > { %v3338_v25 = vadd.f32 %v3328_v21, %v6805_v44  ;;  %v3339_v30 = vadd.f32 %v3329_v33, %v6806_v32  ;;  %v3361_v59 = vsel %vm680_vm2, %v3359_v42, %v3358_v1  ;;  %v2988_v29 = vadd.f32 %v2986_v17, %v2966_v50  ;;  %v3709_v50 = vld [vmem:[%s6660_s5 + $0x8] ss:$0 sm:$0xff]  ;;  %3430 = vst [vmem:[%s3386_s30] sm:$0xff] (%p4393_p4), %v3429_v31 }
 0x4c5   : > { %v2989_v0 = vadd.f32 %v2987_v12, %v2967_v19  ;;  %v3002_v58 = vadd.f32 %v3000_v54, %v2974_v38  ;;  %v3360_v14 = vsel %vm680_vm2, %v3358_v1, %v3359_v42  ;;  %v3363_v39 = vsel %vm684_vm6, %v3361_v59, 0.0 }
 0x4c6   : > { %v3354_v46 = vadd.f32 %v3352_v28, %v3338_v25  ;;  %v3355_v48 = vadd.f32 %v3350_v27, %v3339_v30  ;;  %v3356_v44 = vadd.f32 %v3346_v53, %v6519_v35  ;;  %v3357_v36 = vadd.f32 %v3347_v62, %v650_v52  ;;  %v3651_v53 = vld [vmem:[%s6660_s5 + $0x6] ss:$0 sm:$0xff]  ;;  %v3431_v62 = vld [vmem:[%s5831_s22 + $0x8] sm:$0xff] (%p4393_p4) }
 0x4c7   : > { %v3004_v10 = vadd.f32 %v3002_v58, %v2988_v29  ;;  %v3005_v16 = vadd.f32 %v3003_v20, %v2989_v0  ;;  %v3306_v22 = vadd.f32 %v3795_v13, %v6013_v18  ;;  %v3309_v7 = vadd.f32 %v3795_v13, %v6818_v4  ;;  %v6819_v18 = vld [vmem:[#allocation28_spill] sm:$0xff]  ;;  %3432 = vst [vmem:[%s3386_s30 + $0x8] sm:$0xff] (%p4393_p4), %v3431_v62 }
 0x4c8   : > { %v3364_v32 = vadd.f32 %v3360_v14, %v3354_v46  ;;  %v3365_v23 = vadd.f32 %v3363_v39, %v3355_v48  ;;  %v1348_v17 = vadd.f32 %v3595_v61, %v6819_v18  ;;  %v1351_v52 = vadd.f32 %v3595_v61, %v6820_v55 }
 0x4c9   : > { %v3023_v41 = vpack.c.bf16 %v3005_v16, %v3004_v10 }
 0x4ca   : > { %v3366_v2 = vadd.f32 %v3364_v32, %v3356_v44  ;;  %v3367_v35 = vadd.f32 %v3365_v23, %v3357_v36 }
 0x4cb   : > { %4139 = vmatmul.mubr.bf16.vlgmr.msra.gmra.mxu0 %v3023_v41 }
 0x4cc   : > { %v3370_v34 = vmul.f32 %v3368_v45, %v3366_v2  ;;  %v3371_v9 = vmul.f32 %v3369_v57, %v3367_v35 }
 0x4ce   : > { %v3372_v63 = vadd.f32 %v3370_v34, %v3306_v22  ;;  %v3373_v47 = vadd.f32 %v3371_v9, %v3309_v7 }
 0x4d0   : > { %3804 = vst [vmem:[%s5831_s22 + $0x30] sm:$0xff] %v3372_v63  ;;  %3805 = vst [vmem:[%s5831_s22 + $0x38] sm:$0xff] %v3373_v47 }
 0x4d7   : > { %v3441_v30 = vld [vmem:[%s5831_s22 + $0x30] sm:$0xff] (%p4393_p4)  ;;  %v3443_v59 = vld [vmem:[%s5831_s22 + $0x38] sm:$0xff] (%p4393_p4) }
 0x4d8   : > { %3442 = vst [vmem:[%s3386_s30 + $0x60] sm:$0xff] (%p4393_p4), %v3441_v30  ;;  %3444 = vst [vmem:[%s3386_s30 + $0x68] sm:$0xff] (%p4393_p4), %v3443_v59 }
 0x527   : > { %v1811_v60 = vpop.f32.mrf.mxu0 }
 0x528   : > { %v1812_v12 = vadd.f32 %v3651_v53, %v1811_v60 }
 0x529   : > { %v4060_v49 = vpop.f32.mrf.mxu0 }
 0x52a   : > { %v1818_v43 = vadd.f32 %v1812_v12, %v1348_v17 }
 0x52b   : > { %v1814_v54 = vpop.f32.mrf.mxu0 }
 0x52c   : > { %3660 = vst [vmem:[%s5831_s22 + $0x10] sm:$0xff] %v1818_v43  ;;  %v1815_v6 = vadd.f32 %v3651_v53, %v1814_v54 }
 0x52d   : > { %v4061_v11 = vpop.f32.mrf.mxu0 }
 0x52e   : > { %v1819_v5 = vadd.f32 %v1815_v6, %v1351_v52 }
 0x530   : > { %3661 = vst [vmem:[%s5831_s22 + $0x18] sm:$0xff] %v1819_v5 }
 0x533   : > { %v3433_v27 = vld [vmem:[%s5831_s22 + $0x10] sm:$0xff] (%p4393_p4) }
 0x534   : > { %3434 = vst [vmem:[%s3386_s30 + $0x20] sm:$0xff] (%p4393_p4), %v3433_v27 }
 0x537   : > { %v3435_v28 = vld [vmem:[%s5831_s22 + $0x18] sm:$0xff] (%p4393_p4) }
 0x538   : > { %3436 = vst [vmem:[%s3386_s30 + $0x28] sm:$0xff] (%p4393_p4), %v3435_v28 }
 0x547   : > { %v2244_v37 = vpop.f32.mrf.mxu0 }
 0x548   : > { %v2245_v51 = vadd.f32 %v3709_v50, %v2244_v37 }
 0x549   : > { %v4100_v3 = vpop.f32.mrf.mxu0 }
 0x54b   : > { %v2247_v56 = vpop.f32.mrf.mxu0 }
 0x54c   : > { %v2248_v19 = vadd.f32 %v3709_v50, %v2247_v56 }
 0x54d   : > { %v4101_v42 = vpop.f32.mrf.mxu0 }
 0x58b   : > { %v3111_v26 = vpop.f32.mrf.mxu0 }
 0x58c   : > { %v3112_v15 = vadd.f32 %v3765_v40, %v3111_v26 }
 0x58d   : > { %v4140_v1 = vpop.f32.mrf.mxu0 }
 0x58e   : > { %v3118_v24 = vadd.f32 %v3112_v15, %v2245_v51 }
 0x58f   : > { %v3114_v8 = vpop.f32.mrf.mxu0 }
 0x590   : > { %3774 = vst [vmem:[%s5831_s22 + $0x20] sm:$0xff] %v3118_v24  ;;  %v3115_v20 = vadd.f32 %v3765_v40, %v3114_v8  ;;  %3383 = sbr.rel (!%p4393_p4) target bundleno = 1437 (0x59d), region = 60 }
 0x591   : > { %v4141_v21 = vpop.f32.mrf.mxu0 }
 0x592   : > { %v3119_v33 = vadd.f32 %v3115_v20, %v2248_v19 }
 0x594   : > { %3775 = vst [vmem:[%s5831_s22 + $0x28] sm:$0xff] %v3119_v33 }
 0x597   : > { %v3437_v38 = vld [vmem:[%s5831_s22 + $0x20] sm:$0xff] }
 0x598   : > { %3438 = vst [vmem:[%s3386_s30 + $0x40] sm:$0xff] %v3437_v38 }
 0x59b   : > { %v3439_v25 = vld [vmem:[%s5831_s22 + $0x28] sm:$0xff] }
 0x59c   : > { %3440 = vst [vmem:[%s3386_s30 + $0x48] sm:$0xff] %v3439_v25 }
 0x59d PF: > { %p16_p8 = scmp.ge.s32.totalorder %s4383_s13, 4   ;;  %s6821_s30 = smov %s4306_s10 }
 0x59e   : > { %s6822_s10 = smov %s4391_s16  ;;  %s6823_s11 = smov %s4383_s13 }
 0x59f   :  { %18 = sbr.rel (!%p16_p8) target bundleno = 2 (0x2), region = 147 }

</bundles_post_ra>
